<compile_context>
chip_gen: v7x
topology: tpu7x:2x2x1
jax: 0.10.0
libtpu: 0.0.40
codegen_flags: <defaults>
</compile_context>

<pallas_src>
import jax
import jax.numpy as jnp
from jax import lax
from jax.experimental import pallas as pl
from jax.experimental.pallas import tpu as pltpu

EPS = 1e-5
CP = 128                 # padded channel width (lane-dense output / MXU N dim)
BF16 = jnp.bfloat16


# ----------------------------- fused Pallas kernel ----------------------------- #

def _make_fused_kernel(has_proj, m2, cp, eps):
    def bn_affine(z, g_ref, b_ref):
        # Training-mode BN folded to a per-channel affine (single pass, f32).
        mean = jnp.mean(z, axis=0, keepdims=True)
        var = jnp.maximum(jnp.mean(z * z, axis=0, keepdims=True) - mean * mean, 0.0)
        scale = g_ref[...] * lax.rsqrt(var + eps)
        shift = b_ref[...] - mean * scale
        return scale, shift

    def kernel(*refs):
        if has_proj:
            (x2d, xw, mask, w1, w2, w3, ws,
             g1, bt1, g2, bt2, g3, bt3, gs, bts, o_ref) = refs
        else:
            (x2d, xw, mask, xs, w1, w2, w3,
             g1, bt1, g2, bt2, g3, bt3, o_ref) = refs

        # --- conv1 at full resolution: only its batch statistics are needed ---
        w1v = w1[...]
        z1 = jnp.dot(x2d[...], w1v, preferred_element_type=jnp.float32)
        sc1, sh1 = bn_affine(z1, g1, bt1)

        # --- 3x3 conv: 9 accumulated matmuls over shifted/strided windows.
        #     conv1/BN1/ReLU are pointwise -> recomputed per window, masked at
        #     the zero-padded border positions. ---
        acc2 = jnp.zeros((m2, cp), jnp.float32)
        for t in range(9):
            z1w = jnp.dot(xw[t], w1v, preferred_element_type=jnp.float32)
            y1w = jnp.maximum(z1w * sc1 + sh1, 0.0) * mask[t]
            acc2 = acc2 + jnp.dot(y1w.astype(BF16), w2[t],
                                  preferred_element_type=jnp.float32)
        sc2, sh2 = bn_affine(acc2, g2, bt2)
        y2 = jnp.maximum(acc2 * sc2 + sh2, 0.0)

        # --- conv3 (1x1) + BN3 ---
        z3 = jnp.dot(y2.astype(BF16), w3[...], preferred_element_type=jnp.float32)
        sc3, sh3 = bn_affine(z3, g3, bt3)
        y3 = z3 * sc3 + sh3

        # --- shortcut (projection conv+BN, or identity) ---
        if has_proj:
            zs = jnp.dot(xw[4], ws[...], preferred_element_type=jnp.float32)
            scs, shs = bn_affine(zs, gs, bts)
            short = zs * scs + shs
        else:
            short = xs[...]

        o_ref[...] = jnp.maximum(y3 + short, 0.0).astype(o_ref.dtype)

    return kernel


# --------------------------------- wrapper ------------------------------------ #

def _pad_last(a, width):
    pad = width - a.shape[-1]
    if pad == 0:
        return a
    return jnp.pad(a, [(0, 0)] * (a.ndim - 1) + [(0, pad)])


def _pad2(a, rows, cols):
    return jnp.pad(a, ((0, rows - a.shape[0]), (0, cols - a.shape[1])))


def bottleneck_forward(x_nchw, params, stride):
    n, cin, h, w = x_nchw.shape
    cout = params["w1"].shape[0]
    c4 = 4 * cout
    ho = (h + 2 - 3) // stride + 1
    wo = (w + 2 - 3) // stride + 1
    m1 = n * h * w
    m2 = n * ho * wo
    cin_p = ((cin + 15) // 16) * 16                       # bf16-friendly K
    has_proj = (stride != 1) or (cin != c4)

    x = jnp.transpose(x_nchw, (0, 2, 3, 1))               # NHWC, f32

    # Full-resolution flattened input (for BN1 batch statistics).
    x2d = _pad_last(x.reshape(m1, cin), cin_p).astype(BF16)

    # 9 shifted/strided windows of the zero-padded raw input + validity mask.
    xp = jnp.pad(x, ((0, 0), (1, 1), (1, 1), (0, 0)))
    op = jnp.pad(jnp.ones((n, h, w, 1), jnp.float32), ((0, 0), (1, 1), (1, 1), (0, 0)))
    wins, masks = [], []
    for dh in range(3):
        for dw in range(3):
            sl = (slice(None),
                  slice(dh, dh + (ho - 1) * stride + 1, stride),
                  slice(dw, dw + (wo - 1) * stride + 1, stride),
                  slice(None))
            wins.append(xp[sl].reshape(m2, cin))
            masks.append(op[sl].reshape(m2, 1))
    xw = _pad_last(jnp.stack(wins, axis=0), cin_p).astype(BF16)   # (9, m2, cin_p)
    mask = jnp.stack(masks, axis=0)                               # (9, m2, 1) f32

    # Weights: bf16, zero-padded to lane-dense shapes.  Conv biases are dropped
    # (exactly cancelled by training-mode BN's mean subtraction).
    w1p = _pad2(params["w1"].reshape(cout, cin).T, cin_p, CP).astype(BF16)
    w2t = jnp.transpose(params["w2"], (2, 3, 1, 0)).reshape(9, cout, cout)
    w2p = jnp.pad(w2t, ((0, 0), (0, CP - cout), (0, CP - cout))).astype(BF16)
    w3p = _pad2(params["w3"].reshape(c4, cout).T, CP, CP).astype(BF16)

    def bnp(name):
        return _pad_last(params[name], CP).reshape(1, CP).astype(jnp.float32)

    inputs = [x2d, xw, mask]
    in_specs = [
        pl.BlockSpec((m1, cin_p), lambda i: (0, 0)),
        pl.BlockSpec((9, m2, cin_p), lambda i: (0, 0, 0)),
        pl.BlockSpec((9, m2, 1), lambda i: (0, 0, 0)),
    ]
    if not has_proj:
        xs = _pad_last(x[:, ::stride, ::stride, :].reshape(m2, cin), CP)
        inputs.append(xs.astype(jnp.float32))
        in_specs.append(pl.BlockSpec((m2, CP), lambda i: (0, 0)))

    inputs += [w1p, w2p, w3p]
    in_specs += [
        pl.BlockSpec((cin_p, CP), lambda i: (0, 0)),
        pl.BlockSpec((9, CP, CP), lambda i: (0, 0, 0)),
        pl.BlockSpec((CP, CP), lambda i: (0, 0)),
    ]
    if has_proj:
        wsp = _pad2(params["ws"].reshape(c4, cin).T, cin_p, CP).astype(BF16)
        inputs.append(wsp)
        in_specs.append(pl.BlockSpec((cin_p, CP), lambda i: (0, 0)))

    bn_params = [bnp("g1"), bnp("beta1"), bnp("g2"), bnp("beta2"),
                 bnp("g3"), bnp("beta3")]
    if has_proj:
        bn_params += [bnp("gs"), bnp("betas")]
    inputs += bn_params
    in_specs += [pl.BlockSpec((1, CP), lambda i: (0, 0)) for _ in bn_params]

    kernel = _make_fused_kernel(has_proj, m2, CP, EPS)
    out2d = pl.pallas_call(
        kernel,
        out_shape=jax.ShapeDtypeStruct((m2, CP), jnp.float32),
        grid=(1,),
        in_specs=in_specs,
        out_specs=pl.BlockSpec((m2, CP), lambda i: (0, 0)),
        compiler_params=pltpu.CompilerParams(dimension_semantics=("arbitrary",)),
    )(*inputs)

    out = out2d[:, :c4].reshape(n, ho, wo, c4)
    return jnp.transpose(out, (0, 3, 1, 2))               # back to NCHW


# -------------------------- pure-JAX reference ------------------------------ #

def _conv_ref(x_nhwc, w_oihw, b, stride, padding):
    w_hwio = jnp.transpose(w_oihw, (2, 3, 1, 0))
    y = lax.conv_general_dilated(
        x_nhwc, w_hwio, (stride, stride),
        ((padding, padding), (padding, padding)),
        dimension_numbers=("NHWC", "HWIO", "NHWC"),
        precision=lax.Precision.HIGHEST)
    return y + b


def _bn_train_ref(y, gamma, beta):
    mean = jnp.mean(y, axis=(0, 1, 2), keepdims=True)
    var = jnp.mean(jnp.square(y - mean), axis=(0, 1, 2), keepdims=True)
    return (y - mean) * (gamma * lax.rsqrt(var + EPS)) + beta


def bottleneck_reference(x_nchw, params, stride):
    x = jnp.transpose(x_nchw, (0, 2, 3, 1))
    cin = x.shape[-1]
    cout = params["w1"].shape[0]
    c4 = 4 * cout
    y = jnp.maximum(_bn_train_ref(_conv_ref(x, params["w1"], params["b1"], 1, 0),
                                  params["g1"], params["beta1"]), 0.0)
    y = jnp.maximum(_bn_train_ref(_conv_ref(y, params["w2"], params["b2"], stride, 1),
                                  params["g2"], params["beta2"]), 0.0)
    y = _bn_train_ref(_conv_ref(y, params["w3"], params["b3"], 1, 0),
                      params["g3"], params["beta3"])
    if stride != 1 or cin != c4:
        sc = _bn_train_ref(_conv_ref(x, params["ws"], params["bs"], stride, 0),
                           params["gs"], params["betas"])
    else:
        sc = x
    return jnp.transpose(jnp.maximum(y + sc, 0.0), (0, 3, 1, 2))


# --------------------------------- main ------------------------------------ #

def init_params(key, in_channel, out_channel):
    c4 = 4 * out_channel
    ks = jax.random.split(key, 16)
    def w(k, shape): return 0.1 * jax.random.normal(k, shape, jnp.float32)
    def g(k, shape): return jax.random.uniform(k, shape, jnp.float32, 0.5, 1.5)
    return {
        "w1": w(ks[0], (out_channel, in_channel, 1, 1)),
        "b1": w(ks[1], (out_channel,)),
        "g1": g(ks[2], (out_channel,)), "beta1": w(ks[3], (out_channel,)),
        "w2": w(ks[4], (out_channel, out_channel, 3, 3)),
        "b2": w(ks[5], (out_channel,)),
        "g2": g(ks[6], (out_channel,)), "beta2": w(ks[7], (out_channel,)),
        "w3": w(ks[8], (c4, out_channel, 1, 1)),
        "b3": w(ks[9], (c4,)),
        "g3": g(ks[10], (c4,)), "beta3": w(ks[11], (c4,)),
        "ws": w(ks[12], (c4, in_channel, 1, 1)),
        "bs": w(ks[13], (c4,)),
        "gs": g(ks[14], (c4,)), "betas": w(ks[15], (c4,)),
    }


if __name__ == "__main__":
    # TODO(synk): BatchNorm is implemented in training mode (batch statistics),
    # matching a freshly-constructed PyTorch module; running-stat updates are
    # not materialized (forward output does not depend on them).
    key = jax.random.PRNGKey(0)

    def run_case(in_channel, out_channel, stride, hw, k):
        k_x, k_p = jax.random.split(k)
        x = jax.random.normal(k_x, (2, in_channel, hw, hw), jnp.float32)  # NCHW
        params = init_params(k_p, in_channel, out_channel)
        out = jax.block_until_ready(bottleneck_forward(x, params, stride))
        ref = jax.block_until_ready(bottleneck_reference(x, params, stride))
        assert out.shape == ref.shape, (out.shape, ref.shape)
        # Tolerance reflects bf16 MXU operands (f32 accumulation) across three
        # chained conv+BN layers vs. an f32 HIGHEST-precision reference.
        err = float(jnp.max(jnp.abs(out - ref)))
        assert err < 5e-2, err
        return out

    k1, k2 = jax.random.split(key)
    o1 = run_case(4, 4, 2, 16, k1)          # projection shortcut, stride 2
    assert o1.shape == (2, 16, 8, 8), o1.shape
    o2 = run_case(16, 4, 1, 16, k2)         # identity shortcut, stride 1
    assert o2.shape == (2, 16, 16, 16), o2.shape

    print("KERNEL_OK")
</pallas_src>

<mosaic_0001>
module attributes {stable_mosaic.version = 11 : i64} {
  func.func @kernel(%arg0: i32, %arg1: memref<512x16xbf16, #tpu.memory_space<vmem>>, %arg2: memref<9x128x16xbf16, #tpu.memory_space<vmem>>, %arg3: memref<9x128x1xf32, #tpu.memory_space<vmem>>, %arg4: memref<16x128xbf16, #tpu.memory_space<vmem>>, %arg5: memref<9x128x128xbf16, #tpu.memory_space<vmem>>, %arg6: memref<128x128xbf16, #tpu.memory_space<vmem>>, %arg7: memref<16x128xbf16, #tpu.memory_space<vmem>>, %arg8: memref<1x128xf32, #tpu.memory_space<vmem>>, %arg9: memref<1x128xf32, #tpu.memory_space<vmem>>, %arg10: memref<1x128xf32, #tpu.memory_space<vmem>>, %arg11: memref<1x128xf32, #tpu.memory_space<vmem>>, %arg12: memref<1x128xf32, #tpu.memory_space<vmem>>, %arg13: memref<1x128xf32, #tpu.memory_space<vmem>>, %arg14: memref<1x128xf32, #tpu.memory_space<vmem>>, %arg15: memref<1x128xf32, #tpu.memory_space<vmem>>, %arg16: memref<128x128xf32, #tpu.memory_space<vmem>>) attributes {dimension_semantics = [#tpu.dimension_semantics<arbitrary>], iteration_bounds = array<i64: 1>, scalar_prefetch = 0 : i64, scratch_operands = 0 : i64, tpu.core_type = #tpu.core_type<tc>, window_params = [{pipeline_mode = #tpu.pipeline_mode<synchronous>, transform_indices = @transform_0, window_bounds = array<i64: 512, 16>}, {pipeline_mode = #tpu.pipeline_mode<synchronous>, transform_indices = @transform_1, window_bounds = array<i64: 9, 128, 16>}, {pipeline_mode = #tpu.pipeline_mode<synchronous>, transform_indices = @transform_2, window_bounds = array<i64: 9, 128, 1>}, {pipeline_mode = #tpu.pipeline_mode<synchronous>, transform_indices = @transform_3, window_bounds = array<i64: 16, 128>}, {pipeline_mode = #tpu.pipeline_mode<synchronous>, transform_indices = @transform_4, window_bounds = array<i64: 9, 128, 128>}, {pipeline_mode = #tpu.pipeline_mode<synchronous>, transform_indices = @transform_5, window_bounds = array<i64: 128, 128>}, {pipeline_mode = #tpu.pipeline_mode<synchronous>, transform_indices = @transform_6, window_bounds = array<i64: 16, 128>}, {pipeline_mode = #tpu.pipeline_mode<synchronous>, transform_indices = @transform_7, window_bounds = array<i64: 1, 128>}, {pipeline_mode = #tpu.pipeline_mode<synchronous>, transform_indices = @transform_8, window_bounds = array<i64: 1, 128>}, {pipeline_mode = #tpu.pipeline_mode<synchronous>, transform_indices = @transform_9, window_bounds = array<i64: 1, 128>}, {pipeline_mode = #tpu.pipeline_mode<synchronous>, transform_indices = @transform_10, window_bounds = array<i64: 1, 128>}, {pipeline_mode = #tpu.pipeline_mode<synchronous>, transform_indices = @transform_11, window_bounds = array<i64: 1, 128>}, {pipeline_mode = #tpu.pipeline_mode<synchronous>, transform_indices = @transform_12, window_bounds = array<i64: 1, 128>}, {pipeline_mode = #tpu.pipeline_mode<synchronous>, transform_indices = @transform_13, window_bounds = array<i64: 1, 128>}, {pipeline_mode = #tpu.pipeline_mode<synchronous>, transform_indices = @transform_14, window_bounds = array<i64: 1, 128>}, {pipeline_mode = #tpu.pipeline_mode<synchronous>, transform_indices = @transform_15, window_bounds = array<i64: 128, 128>}]} {
    %c0 = arith.constant 0 : index
    %c0_0 = arith.constant 0 : index
    %0 = vector.load %arg4[%c0, %c0_0] : memref<16x128xbf16, #tpu.memory_space<vmem>>, vector<16x128xbf16>
    %c0_1 = arith.constant 0 : index
    %c0_2 = arith.constant 0 : index
    %1 = vector.load %arg1[%c0_1, %c0_2] : memref<512x16xbf16, #tpu.memory_space<vmem>>, vector<512x16xbf16>
    %cst = arith.constant dense<0.000000e+00> : vector<512x128xf32>
    %2 = tpu.matmul %1, %0, %cst {dimension_numbers = #tpu.dot_dimension_numbers<[1], [0], [0], [1], [0, 0, 1, 1], [], []>} : vector<512x16xbf16>, vector<16x128xbf16>, vector<512x128xf32> -> vector<512x128xf32>
    %cst_3 = arith.constant dense<0.000000e+00> : vector<128xf32>
    %3 = vector.multi_reduction <add>, %2, %cst_3 [0] : vector<512x128xf32> to vector<128xf32>
    %4 = vector.shape_cast %3 : vector<128xf32> to vector<1x128xf32>
    %cst_4 = arith.constant 5.120000e+02 : f32
    %5 = vector.broadcast %cst_4 : f32 to vector<1x128xf32>
    %6 = arith.divf %4, %5 : vector<1x128xf32>
    %7 = arith.mulf %2, %2 : vector<512x128xf32>
    %cst_5 = arith.constant dense<0.000000e+00> : vector<128xf32>
    %8 = vector.multi_reduction <add>, %7, %cst_5 [0] : vector<512x128xf32> to vector<128xf32>
    %9 = vector.shape_cast %8 : vector<128xf32> to vector<1x128xf32>
    %cst_6 = arith.constant 5.120000e+02 : f32
    %10 = vector.broadcast %cst_6 : f32 to vector<1x128xf32>
    %11 = arith.divf %9, %10 : vector<1x128xf32>
    %12 = arith.mulf %6, %6 : vector<1x128xf32>
    %13 = arith.subf %11, %12 : vector<1x128xf32>
    %cst_7 = arith.constant 0.000000e+00 : f32
    %14 = vector.broadcast %cst_7 : f32 to vector<1x128xf32>
    %15 = arith.maximumf %13, %14 : vector<1x128xf32>
    %c0_8 = arith.constant 0 : index
    %c0_9 = arith.constant 0 : index
    %16 = vector.load %arg8[%c0_8, %c0_9] : memref<1x128xf32, #tpu.memory_space<vmem>>, vector<1x128xf32>
    %cst_10 = arith.constant 9.99999974E-6 : f32
    %17 = vector.broadcast %cst_10 : f32 to vector<1x128xf32>
    %18 = arith.addf %15, %17 : vector<1x128xf32>
    %19 = math.rsqrt %18 : vector<1x128xf32>
    %20 = arith.mulf %16, %19 : vector<1x128xf32>
    %c0_11 = arith.constant 0 : index
    %c0_12 = arith.constant 0 : index
    %21 = vector.load %arg9[%c0_11, %c0_12] : memref<1x128xf32, #tpu.memory_space<vmem>>, vector<1x128xf32>
    %22 = arith.mulf %6, %20 : vector<1x128xf32>
    %23 = arith.subf %21, %22 : vector<1x128xf32>
    %cst_13 = arith.constant 0.000000e+00 : f32
    %24 = vector.broadcast %cst_13 : f32 to vector<128x128xf32>
    %c0_14 = arith.constant 0 : index
    %c0_15 = arith.constant 0 : index
    %c0_16 = arith.constant 0 : index
    %25 = vector.load %arg2[%c0_14, %c0_15, %c0_16] : memref<9x128x16xbf16, #tpu.memory_space<vmem>>, vector<1x128x16xbf16>
    %26 = vector.shape_cast %25 : vector<1x128x16xbf16> to vector<128x16xbf16>
    %cst_17 = arith.constant dense<0.000000e+00> : vector<128x128xf32>
    %27 = tpu.matmul %26, %0, %cst_17 {dimension_numbers = #tpu.dot_dimension_numbers<[1], [0], [0], [1], [0, 0, 1, 1], [], []>} : vector<128x16xbf16>, vector<16x128xbf16>, vector<128x128xf32> -> vector<128x128xf32>
    %28 = vector.broadcast %20 : vector<1x128xf32> to vector<128x128xf32>
    %29 = arith.mulf %27, %28 : vector<128x128xf32>
    %30 = vector.broadcast %23 : vector<1x128xf32> to vector<128x128xf32>
    %31 = arith.addf %29, %30 : vector<128x128xf32>
    %cst_18 = arith.constant 0.000000e+00 : f32
    %32 = vector.broadcast %cst_18 : f32 to vector<128x128xf32>
    %33 = arith.maximumf %31, %32 : vector<128x128xf32>
    %c0_19 = arith.constant 0 : index
    %c0_20 = arith.constant 0 : index
    %c0_21 = arith.constant 0 : index
    %34 = vector.load %arg3[%c0_19, %c0_20, %c0_21] : memref<9x128x1xf32, #tpu.memory_space<vmem>>, vector<1x128x1xf32>
    %35 = vector.shape_cast %34 : vector<1x128x1xf32> to vector<128x1xf32>
    %36 = vector.broadcast %35 : vector<128x1xf32> to vector<128x128xf32>
    %37 = arith.mulf %33, %36 : vector<128x128xf32>
    %38 = arith.truncf %37 : vector<128x128xf32> to vector<128x128xbf16>
    %c0_22 = arith.constant 0 : index
    %c0_23 = arith.constant 0 : index
    %c0_24 = arith.constant 0 : index
    %39 = vector.load %arg5[%c0_22, %c0_23, %c0_24] : memref<9x128x128xbf16, #tpu.memory_space<vmem>>, vector<1x128x128xbf16>
    %40 = vector.shape_cast %39 : vector<1x128x128xbf16> to vector<128x128xbf16>
    %cst_25 = arith.constant dense<0.000000e+00> : vector<128x128xf32>
    %41 = tpu.matmul %38, %40, %cst_25 {dimension_numbers = #tpu.dot_dimension_numbers<[1], [0], [0], [1], [0, 0, 1, 1], [], []>} : vector<128x128xbf16>, vector<128x128xbf16>, vector<128x128xf32> -> vector<128x128xf32>
    %42 = arith.addf %24, %41 : vector<128x128xf32>
    %c1 = arith.constant 1 : index
    %c0_26 = arith.constant 0 : index
    %c0_27 = arith.constant 0 : index
    %43 = vector.load %arg2[%c1, %c0_26, %c0_27] : memref<9x128x16xbf16, #tpu.memory_space<vmem>>, vector<1x128x16xbf16>
    %44 = vector.shape_cast %43 : vector<1x128x16xbf16> to vector<128x16xbf16>
    %cst_28 = arith.constant dense<0.000000e+00> : vector<128x128xf32>
    %45 = tpu.matmul %44, %0, %cst_28 {dimension_numbers = #tpu.dot_dimension_numbers<[1], [0], [0], [1], [0, 0, 1, 1], [], []>} : vector<128x16xbf16>, vector<16x128xbf16>, vector<128x128xf32> -> vector<128x128xf32>
    %46 = vector.broadcast %20 : vector<1x128xf32> to vector<128x128xf32>
    %47 = arith.mulf %45, %46 : vector<128x128xf32>
    %48 = vector.broadcast %23 : vector<1x128xf32> to vector<128x128xf32>
    %49 = arith.addf %47, %48 : vector<128x128xf32>
    %cst_29 = arith.constant 0.000000e+00 : f32
    %50 = vector.broadcast %cst_29 : f32 to vector<128x128xf32>
    %51 = arith.maximumf %49, %50 : vector<128x128xf32>
    %c1_30 = arith.constant 1 : index
    %c0_31 = arith.constant 0 : index
    %c0_32 = arith.constant 0 : index
    %52 = vector.load %arg3[%c1_30, %c0_31, %c0_32] : memref<9x128x1xf32, #tpu.memory_space<vmem>>, vector<1x128x1xf32>
    %53 = vector.shape_cast %52 : vector<1x128x1xf32> to vector<128x1xf32>
    %54 = vector.broadcast %53 : vector<128x1xf32> to vector<128x128xf32>
    %55 = arith.mulf %51, %54 : vector<128x128xf32>
    %56 = arith.truncf %55 : vector<128x128xf32> to vector<128x128xbf16>
    %c1_33 = arith.constant 1 : index
    %c0_34 = arith.constant 0 : index
    %c0_35 = arith.constant 0 : index
    %57 = vector.load %arg5[%c1_33, %c0_34, %c0_35] : memref<9x128x128xbf16, #tpu.memory_space<vmem>>, vector<1x128x128xbf16>
    %58 = vector.shape_cast %57 : vector<1x128x128xbf16> to vector<128x128xbf16>
    %cst_36 = arith.constant dense<0.000000e+00> : vector<128x128xf32>
    %59 = tpu.matmul %56, %58, %cst_36 {dimension_numbers = #tpu.dot_dimension_numbers<[1], [0], [0], [1], [0, 0, 1, 1], [], []>} : vector<128x128xbf16>, vector<128x128xbf16>, vector<128x128xf32> -> vector<128x128xf32>
    %60 = arith.addf %42, %59 : vector<128x128xf32>
    %c2 = arith.constant 2 : index
    %c0_37 = arith.constant 0 : index
    %c0_38 = arith.constant 0 : index
    %61 = vector.load %arg2[%c2, %c0_37, %c0_38] : memref<9x128x16xbf16, #tpu.memory_space<vmem>>, vector<1x128x16xbf16>
    %62 = vector.shape_cast %61 : vector<1x128x16xbf16> to vector<128x16xbf16>
    %cst_39 = arith.constant dense<0.000000e+00> : vector<128x128xf32>
    %63 = tpu.matmul %62, %0, %cst_39 {dimension_numbers = #tpu.dot_dimension_numbers<[1], [0], [0], [1], [0, 0, 1, 1], [], []>} : vector<128x16xbf16>, vector<16x128xbf16>, vector<128x128xf32> -> vector<128x128xf32>
    %64 = vector.broadcast %20 : vector<1x128xf32> to vector<128x128xf32>
    %65 = arith.mulf %63, %64 : vector<128x128xf32>
    %66 = vector.broadcast %23 : vector<1x128xf32> to vector<128x128xf32>
    %67 = arith.addf %65, %66 : vector<128x128xf32>
    %cst_40 = arith.constant 0.000000e+00 : f32
    %68 = vector.broadcast %cst_40 : f32 to vector<128x128xf32>
    %69 = arith.maximumf %67, %68 : vector<128x128xf32>
    %c2_41 = arith.constant 2 : index
    %c0_42 = arith.constant 0 : index
    %c0_43 = arith.constant 0 : index
    %70 = vector.load %arg3[%c2_41, %c0_42, %c0_43] : memref<9x128x1xf32, #tpu.memory_space<vmem>>, vector<1x128x1xf32>
    %71 = vector.shape_cast %70 : vector<1x128x1xf32> to vector<128x1xf32>
    %72 = vector.broadcast %71 : vector<128x1xf32> to vector<128x128xf32>
    %73 = arith.mulf %69, %72 : vector<128x128xf32>
    %74 = arith.truncf %73 : vector<128x128xf32> to vector<128x128xbf16>
    %c2_44 = arith.constant 2 : index
    %c0_45 = arith.constant 0 : index
    %c0_46 = arith.constant 0 : index
    %75 = vector.load %arg5[%c2_44, %c0_45, %c0_46] : memref<9x128x128xbf16, #tpu.memory_space<vmem>>, vector<1x128x128xbf16>
    %76 = vector.shape_cast %75 : vector<1x128x128xbf16> to vector<128x128xbf16>
    %cst_47 = arith.constant dense<0.000000e+00> : vector<128x128xf32>
    %77 = tpu.matmul %74, %76, %cst_47 {dimension_numbers = #tpu.dot_dimension_numbers<[1], [0], [0], [1], [0, 0, 1, 1], [], []>} : vector<128x128xbf16>, vector<128x128xbf16>, vector<128x128xf32> -> vector<128x128xf32>
    %78 = arith.addf %60, %77 : vector<128x128xf32>
    %c3 = arith.constant 3 : index
    %c0_48 = arith.constant 0 : index
    %c0_49 = arith.constant 0 : index
    %79 = vector.load %arg2[%c3, %c0_48, %c0_49] : memref<9x128x16xbf16, #tpu.memory_space<vmem>>, vector<1x128x16xbf16>
    %80 = vector.shape_cast %79 : vector<1x128x16xbf16> to vector<128x16xbf16>
    %cst_50 = arith.constant dense<0.000000e+00> : vector<128x128xf32>
    %81 = tpu.matmul %80, %0, %cst_50 {dimension_numbers = #tpu.dot_dimension_numbers<[1], [0], [0], [1], [0, 0, 1, 1], [], []>} : vector<128x16xbf16>, vector<16x128xbf16>, vector<128x128xf32> -> vector<128x128xf32>
    %82 = vector.broadcast %20 : vector<1x128xf32> to vector<128x128xf32>
    %83 = arith.mulf %81, %82 : vector<128x128xf32>
    %84 = vector.broadcast %23 : vector<1x128xf32> to vector<128x128xf32>
    %85 = arith.addf %83, %84 : vector<128x128xf32>
    %cst_51 = arith.constant 0.000000e+00 : f32
    %86 = vector.broadcast %cst_51 : f32 to vector<128x128xf32>
    %87 = arith.maximumf %85, %86 : vector<128x128xf32>
    %c3_52 = arith.constant 3 : index
    %c0_53 = arith.constant 0 : index
    %c0_54 = arith.constant 0 : index
    %88 = vector.load %arg3[%c3_52, %c0_53, %c0_54] : memref<9x128x1xf32, #tpu.memory_space<vmem>>, vector<1x128x1xf32>
    %89 = vector.shape_cast %88 : vector<1x128x1xf32> to vector<128x1xf32>
    %90 = vector.broadcast %89 : vector<128x1xf32> to vector<128x128xf32>
    %91 = arith.mulf %87, %90 : vector<128x128xf32>
    %92 = arith.truncf %91 : vector<128x128xf32> to vector<128x128xbf16>
    %c3_55 = arith.constant 3 : index
    %c0_56 = arith.constant 0 : index
    %c0_57 = arith.constant 0 : index
    %93 = vector.load %arg5[%c3_55, %c0_56, %c0_57] : memref<9x128x128xbf16, #tpu.memory_space<vmem>>, vector<1x128x128xbf16>
    %94 = vector.shape_cast %93 : vector<1x128x128xbf16> to vector<128x128xbf16>
    %cst_58 = arith.constant dense<0.000000e+00> : vector<128x128xf32>
    %95 = tpu.matmul %92, %94, %cst_58 {dimension_numbers = #tpu.dot_dimension_numbers<[1], [0], [0], [1], [0, 0, 1, 1], [], []>} : vector<128x128xbf16>, vector<128x128xbf16>, vector<128x128xf32> -> vector<128x128xf32>
    %96 = arith.addf %78, %95 : vector<128x128xf32>
    %c4 = arith.constant 4 : index
    %c0_59 = arith.constant 0 : index
    %c0_60 = arith.constant 0 : index
    %97 = vector.load %arg2[%c4, %c0_59, %c0_60] : memref<9x128x16xbf16, #tpu.memory_space<vmem>>, vector<1x128x16xbf16>
    %98 = vector.shape_cast %97 : vector<1x128x16xbf16> to vector<128x16xbf16>
    %cst_61 = arith.constant dense<0.000000e+00> : vector<128x128xf32>
    %99 = tpu.matmul %98, %0, %cst_61 {dimension_numbers = #tpu.dot_dimension_numbers<[1], [0], [0], [1], [0, 0, 1, 1], [], []>} : vector<128x16xbf16>, vector<16x128xbf16>, vector<128x128xf32> -> vector<128x128xf32>
    %100 = vector.broadcast %20 : vector<1x128xf32> to vector<128x128xf32>
    %101 = arith.mulf %99, %100 : vector<128x128xf32>
    %102 = vector.broadcast %23 : vector<1x128xf32> to vector<128x128xf32>
    %103 = arith.addf %101, %102 : vector<128x128xf32>
    %cst_62 = arith.constant 0.000000e+00 : f32
    %104 = vector.broadcast %cst_62 : f32 to vector<128x128xf32>
    %105 = arith.maximumf %103, %104 : vector<128x128xf32>
    %c4_63 = arith.constant 4 : index
    %c0_64 = arith.constant 0 : index
    %c0_65 = arith.constant 0 : index
    %106 = vector.load %arg3[%c4_63, %c0_64, %c0_65] : memref<9x128x1xf32, #tpu.memory_space<vmem>>, vector<1x128x1xf32>
    %107 = vector.shape_cast %106 : vector<1x128x1xf32> to vector<128x1xf32>
    %108 = vector.broadcast %107 : vector<128x1xf32> to vector<128x128xf32>
    %109 = arith.mulf %105, %108 : vector<128x128xf32>
    %110 = arith.truncf %109 : vector<128x128xf32> to vector<128x128xbf16>
    %c4_66 = arith.constant 4 : index
    %c0_67 = arith.constant 0 : index
    %c0_68 = arith.constant 0 : index
    %111 = vector.load %arg5[%c4_66, %c0_67, %c0_68] : memref<9x128x128xbf16, #tpu.memory_space<vmem>>, vector<1x128x128xbf16>
    %112 = vector.shape_cast %111 : vector<1x128x128xbf16> to vector<128x128xbf16>
    %cst_69 = arith.constant dense<0.000000e+00> : vector<128x128xf32>
    %113 = tpu.matmul %110, %112, %cst_69 {dimension_numbers = #tpu.dot_dimension_numbers<[1], [0], [0], [1], [0, 0, 1, 1], [], []>} : vector<128x128xbf16>, vector<128x128xbf16>, vector<128x128xf32> -> vector<128x128xf32>
    %114 = arith.addf %96, %113 : vector<128x128xf32>
    %c5 = arith.constant 5 : index
    %c0_70 = arith.constant 0 : index
    %c0_71 = arith.constant 0 : index
    %115 = vector.load %arg2[%c5, %c0_70, %c0_71] : memref<9x128x16xbf16, #tpu.memory_space<vmem>>, vector<1x128x16xbf16>
    %116 = vector.shape_cast %115 : vector<1x128x16xbf16> to vector<128x16xbf16>
    %cst_72 = arith.constant dense<0.000000e+00> : vector<128x128xf32>
    %117 = tpu.matmul %116, %0, %cst_72 {dimension_numbers = #tpu.dot_dimension_numbers<[1], [0], [0], [1], [0, 0, 1, 1], [], []>} : vector<128x16xbf16>, vector<16x128xbf16>, vector<128x128xf32> -> vector<128x128xf32>
    %118 = vector.broadcast %20 : vector<1x128xf32> to vector<128x128xf32>
    %119 = arith.mulf %117, %118 : vector<128x128xf32>
    %120 = vector.broadcast %23 : vector<1x128xf32> to vector<128x128xf32>
    %121 = arith.addf %119, %120 : vector<128x128xf32>
    %cst_73 = arith.constant 0.000000e+00 : f32
    %122 = vector.broadcast %cst_73 : f32 to vector<128x128xf32>
    %123 = arith.maximumf %121, %122 : vector<128x128xf32>
    %c5_74 = arith.constant 5 : index
    %c0_75 = arith.constant 0 : index
    %c0_76 = arith.constant 0 : index
    %124 = vector.load %arg3[%c5_74, %c0_75, %c0_76] : memref<9x128x1xf32, #tpu.memory_space<vmem>>, vector<1x128x1xf32>
    %125 = vector.shape_cast %124 : vector<1x128x1xf32> to vector<128x1xf32>
    %126 = vector.broadcast %125 : vector<128x1xf32> to vector<128x128xf32>
    %127 = arith.mulf %123, %126 : vector<128x128xf32>
    %128 = arith.truncf %127 : vector<128x128xf32> to vector<128x128xbf16>
    %c5_77 = arith.constant 5 : index
    %c0_78 = arith.constant 0 : index
    %c0_79 = arith.constant 0 : index
    %129 = vector.load %arg5[%c5_77, %c0_78, %c0_79] : memref<9x128x128xbf16, #tpu.memory_space<vmem>>, vector<1x128x128xbf16>
    %130 = vector.shape_cast %129 : vector<1x128x128xbf16> to vector<128x128xbf16>
    %cst_80 = arith.constant dense<0.000000e+00> : vector<128x128xf32>
    %131 = tpu.matmul %128, %130, %cst_80 {dimension_numbers = #tpu.dot_dimension_numbers<[1], [0], [0], [1], [0, 0, 1, 1], [], []>} : vector<128x128xbf16>, vector<128x128xbf16>, vector<128x128xf32> -> vector<128x128xf32>
    %132 = arith.addf %114, %131 : vector<128x128xf32>
    %c6 = arith.constant 6 : index
    %c0_81 = arith.constant 0 : index
    %c0_82 = arith.constant 0 : index
    %133 = vector.load %arg2[%c6, %c0_81, %c0_82] : memref<9x128x16xbf16, #tpu.memory_space<vmem>>, vector<1x128x16xbf16>
    %134 = vector.shape_cast %133 : vector<1x128x16xbf16> to vector<128x16xbf16>
    %cst_83 = arith.constant dense<0.000000e+00> : vector<128x128xf32>
    %135 = tpu.matmul %134, %0, %cst_83 {dimension_numbers = #tpu.dot_dimension_numbers<[1], [0], [0], [1], [0, 0, 1, 1], [], []>} : vector<128x16xbf16>, vector<16x128xbf16>, vector<128x128xf32> -> vector<128x128xf32>
    %136 = vector.broadcast %20 : vector<1x128xf32> to vector<128x128xf32>
    %137 = arith.mulf %135, %136 : vector<128x128xf32>
    %138 = vector.broadcast %23 : vector<1x128xf32> to vector<128x128xf32>
    %139 = arith.addf %137, %138 : vector<128x128xf32>
    %cst_84 = arith.constant 0.000000e+00 : f32
    %140 = vector.broadcast %cst_84 : f32 to vector<128x128xf32>
    %141 = arith.maximumf %139, %140 : vector<128x128xf32>
    %c6_85 = arith.constant 6 : index
    %c0_86 = arith.constant 0 : index
    %c0_87 = arith.constant 0 : index
    %142 = vector.load %arg3[%c6_85, %c0_86, %c0_87] : memref<9x128x1xf32, #tpu.memory_space<vmem>>, vector<1x128x1xf32>
    %143 = vector.shape_cast %142 : vector<1x128x1xf32> to vector<128x1xf32>
    %144 = vector.broadcast %143 : vector<128x1xf32> to vector<128x128xf32>
    %145 = arith.mulf %141, %144 : vector<128x128xf32>
    %146 = arith.truncf %145 : vector<128x128xf32> to vector<128x128xbf16>
    %c6_88 = arith.constant 6 : index
    %c0_89 = arith.constant 0 : index
    %c0_90 = arith.constant 0 : index
    %147 = vector.load %arg5[%c6_88, %c0_89, %c0_90] : memref<9x128x128xbf16, #tpu.memory_space<vmem>>, vector<1x128x128xbf16>
    %148 = vector.shape_cast %147 : vector<1x128x128xbf16> to vector<128x128xbf16>
    %cst_91 = arith.constant dense<0.000000e+00> : vector<128x128xf32>
    %149 = tpu.matmul %146, %148, %cst_91 {dimension_numbers = #tpu.dot_dimension_numbers<[1], [0], [0], [1], [0, 0, 1, 1], [], []>} : vector<128x128xbf16>, vector<128x128xbf16>, vector<128x128xf32> -> vector<128x128xf32>
    %150 = arith.addf %132, %149 : vector<128x128xf32>
    %c7 = arith.constant 7 : index
    %c0_92 = arith.constant 0 : index
    %c0_93 = arith.constant 0 : index
    %151 = vector.load %arg2[%c7, %c0_92, %c0_93] : memref<9x128x16xbf16, #tpu.memory_space<vmem>>, vector<1x128x16xbf16>
    %152 = vector.shape_cast %151 : vector<1x128x16xbf16> to vector<128x16xbf16>
    %cst_94 = arith.constant dense<0.000000e+00> : vector<128x128xf32>
    %153 = tpu.matmul %152, %0, %cst_94 {dimension_numbers = #tpu.dot_dimension_numbers<[1], [0], [0], [1], [0, 0, 1, 1], [], []>} : vector<128x16xbf16>, vector<16x128xbf16>, vector<128x128xf32> -> vector<128x128xf32>
    %154 = vector.broadcast %20 : vector<1x128xf32> to vector<128x128xf32>
    %155 = arith.mulf %153, %154 : vector<128x128xf32>
    %156 = vector.broadcast %23 : vector<1x128xf32> to vector<128x128xf32>
    %157 = arith.addf %155, %156 : vector<128x128xf32>
    %cst_95 = arith.constant 0.000000e+00 : f32
    %158 = vector.broadcast %cst_95 : f32 to vector<128x128xf32>
    %159 = arith.maximumf %157, %158 : vector<128x128xf32>
    %c7_96 = arith.constant 7 : index
    %c0_97 = arith.constant 0 : index
    %c0_98 = arith.constant 0 : index
    %160 = vector.load %arg3[%c7_96, %c0_97, %c0_98] : memref<9x128x1xf32, #tpu.memory_space<vmem>>, vector<1x128x1xf32>
    %161 = vector.shape_cast %160 : vector<1x128x1xf32> to vector<128x1xf32>
    %162 = vector.broadcast %161 : vector<128x1xf32> to vector<128x128xf32>
    %163 = arith.mulf %159, %162 : vector<128x128xf32>
    %164 = arith.truncf %163 : vector<128x128xf32> to vector<128x128xbf16>
    %c7_99 = arith.constant 7 : index
    %c0_100 = arith.constant 0 : index
    %c0_101 = arith.constant 0 : index
    %165 = vector.load %arg5[%c7_99, %c0_100, %c0_101] : memref<9x128x128xbf16, #tpu.memory_space<vmem>>, vector<1x128x128xbf16>
    %166 = vector.shape_cast %165 : vector<1x128x128xbf16> to vector<128x128xbf16>
    %cst_102 = arith.constant dense<0.000000e+00> : vector<128x128xf32>
    %167 = tpu.matmul %164, %166, %cst_102 {dimension_numbers = #tpu.dot_dimension_numbers<[1], [0], [0], [1], [0, 0, 1, 1], [], []>} : vector<128x128xbf16>, vector<128x128xbf16>, vector<128x128xf32> -> vector<128x128xf32>
    %168 = arith.addf %150, %167 : vector<128x128xf32>
    %c8 = arith.constant 8 : index
    %c0_103 = arith.constant 0 : index
    %c0_104 = arith.constant 0 : index
    %169 = vector.load %arg2[%c8, %c0_103, %c0_104] : memref<9x128x16xbf16, #tpu.memory_space<vmem>>, vector<1x128x16xbf16>
    %170 = vector.shape_cast %169 : vector<1x128x16xbf16> to vector<128x16xbf16>
    %cst_105 = arith.constant dense<0.000000e+00> : vector<128x128xf32>
    %171 = tpu.matmul %170, %0, %cst_105 {dimension_numbers = #tpu.dot_dimension_numbers<[1], [0], [0], [1], [0, 0, 1, 1], [], []>} : vector<128x16xbf16>, vector<16x128xbf16>, vector<128x128xf32> -> vector<128x128xf32>
    %172 = vector.broadcast %20 : vector<1x128xf32> to vector<128x128xf32>
    %173 = arith.mulf %171, %172 : vector<128x128xf32>
    %174 = vector.broadcast %23 : vector<1x128xf32> to vector<128x128xf32>
    %175 = arith.addf %173, %174 : vector<128x128xf32>
    %cst_106 = arith.constant 0.000000e+00 : f32
    %176 = vector.broadcast %cst_106 : f32 to vector<128x128xf32>
    %177 = arith.maximumf %175, %176 : vector<128x128xf32>
    %c8_107 = arith.constant 8 : index
    %c0_108 = arith.constant 0 : index
    %c0_109 = arith.constant 0 : index
    %178 = vector.load %arg3[%c8_107, %c0_108, %c0_109] : memref<9x128x1xf32, #tpu.memory_space<vmem>>, vector<1x128x1xf32>
    %179 = vector.shape_cast %178 : vector<1x128x1xf32> to vector<128x1xf32>
    %180 = vector.broadcast %179 : vector<128x1xf32> to vector<128x128xf32>
    %181 = arith.mulf %177, %180 : vector<128x128xf32>
    %182 = arith.truncf %181 : vector<128x128xf32> to vector<128x128xbf16>
    %c8_110 = arith.constant 8 : index
    %c0_111 = arith.constant 0 : index
    %c0_112 = arith.constant 0 : index
    %183 = vector.load %arg5[%c8_110, %c0_111, %c0_112] : memref<9x128x128xbf16, #tpu.memory_space<vmem>>, vector<1x128x128xbf16>
    %184 = vector.shape_cast %183 : vector<1x128x128xbf16> to vector<128x128xbf16>
    %cst_113 = arith.constant dense<0.000000e+00> : vector<128x128xf32>
    %185 = tpu.matmul %182, %184, %cst_113 {dimension_numbers = #tpu.dot_dimension_numbers<[1], [0], [0], [1], [0, 0, 1, 1], [], []>} : vector<128x128xbf16>, vector<128x128xbf16>, vector<128x128xf32> -> vector<128x128xf32>
    %186 = arith.addf %168, %185 : vector<128x128xf32>
    %cst_114 = arith.constant dense<0.000000e+00> : vector<128xf32>
    %187 = vector.multi_reduction <add>, %186, %cst_114 [0] : vector<128x128xf32> to vector<128xf32>
    %188 = vector.shape_cast %187 : vector<128xf32> to vector<1x128xf32>
    %cst_115 = arith.constant 1.280000e+02 : f32
    %189 = vector.broadcast %cst_115 : f32 to vector<1x128xf32>
    %190 = arith.divf %188, %189 : vector<1x128xf32>
    %191 = arith.mulf %186, %186 : vector<128x128xf32>
    %cst_116 = arith.constant dense<0.000000e+00> : vector<128xf32>
    %192 = vector.multi_reduction <add>, %191, %cst_116 [0] : vector<128x128xf32> to vector<128xf32>
    %193 = vector.shape_cast %192 : vector<128xf32> to vector<1x128xf32>
    %cst_117 = arith.constant 1.280000e+02 : f32
    %194 = vector.broadcast %cst_117 : f32 to vector<1x128xf32>
    %195 = arith.divf %193, %194 : vector<1x128xf32>
    %196 = arith.mulf %190, %190 : vector<1x128xf32>
    %197 = arith.subf %195, %196 : vector<1x128xf32>
    %cst_118 = arith.constant 0.000000e+00 : f32
    %198 = vector.broadcast %cst_118 : f32 to vector<1x128xf32>
    %199 = arith.maximumf %197, %198 : vector<1x128xf32>
    %c0_119 = arith.constant 0 : index
    %c0_120 = arith.constant 0 : index
    %200 = vector.load %arg10[%c0_119, %c0_120] : memref<1x128xf32, #tpu.memory_space<vmem>>, vector<1x128xf32>
    %cst_121 = arith.constant 9.99999974E-6 : f32
    %201 = vector.broadcast %cst_121 : f32 to vector<1x128xf32>
    %202 = arith.addf %199, %201 : vector<1x128xf32>
    %203 = math.rsqrt %202 : vector<1x128xf32>
    %204 = arith.mulf %200, %203 : vector<1x128xf32>
    %c0_122 = arith.constant 0 : index
    %c0_123 = arith.constant 0 : index
    %205 = vector.load %arg11[%c0_122, %c0_123] : memref<1x128xf32, #tpu.memory_space<vmem>>, vector<1x128xf32>
    %206 = arith.mulf %190, %204 : vector<1x128xf32>
    %207 = arith.subf %205, %206 : vector<1x128xf32>
    %208 = vector.broadcast %204 : vector<1x128xf32> to vector<128x128xf32>
    %209 = arith.mulf %186, %208 : vector<128x128xf32>
    %210 = vector.broadcast %207 : vector<1x128xf32> to vector<128x128xf32>
    %211 = arith.addf %209, %210 : vector<128x128xf32>
    %cst_124 = arith.constant 0.000000e+00 : f32
    %212 = vector.broadcast %cst_124 : f32 to vector<128x128xf32>
    %213 = arith.maximumf %211, %212 : vector<128x128xf32>
    %214 = arith.truncf %213 : vector<128x128xf32> to vector<128x128xbf16>
    %c0_125 = arith.constant 0 : index
    %c0_126 = arith.constant 0 : index
    %215 = vector.load %arg6[%c0_125, %c0_126] : memref<128x128xbf16, #tpu.memory_space<vmem>>, vector<128x128xbf16>
    %cst_127 = arith.constant dense<0.000000e+00> : vector<128x128xf32>
    %216 = tpu.matmul %214, %215, %cst_127 {dimension_numbers = #tpu.dot_dimension_numbers<[1], [0], [0], [1], [0, 0, 1, 1], [], []>} : vector<128x128xbf16>, vector<128x128xbf16>, vector<128x128xf32> -> vector<128x128xf32>
    %cst_128 = arith.constant dense<0.000000e+00> : vector<128xf32>
    %217 = vector.multi_reduction <add>, %216, %cst_128 [0] : vector<128x128xf32> to vector<128xf32>
    %218 = vector.shape_cast %217 : vector<128xf32> to vector<1x128xf32>
    %cst_129 = arith.constant 1.280000e+02 : f32
    %219 = vector.broadcast %cst_129 : f32 to vector<1x128xf32>
    %220 = arith.divf %218, %219 : vector<1x128xf32>
    %221 = arith.mulf %216, %216 : vector<128x128xf32>
    %cst_130 = arith.constant dense<0.000000e+00> : vector<128xf32>
    %222 = vector.multi_reduction <add>, %221, %cst_130 [0] : vector<128x128xf32> to vector<128xf32>
    %223 = vector.shape_cast %222 : vector<128xf32> to vector<1x128xf32>
    %cst_131 = arith.constant 1.280000e+02 : f32
    %224 = vector.broadcast %cst_131 : f32 to vector<1x128xf32>
    %225 = arith.divf %223, %224 : vector<1x128xf32>
    %226 = arith.mulf %220, %220 : vector<1x128xf32>
    %227 = arith.subf %225, %226 : vector<1x128xf32>
    %cst_132 = arith.constant 0.000000e+00 : f32
    %228 = vector.broadcast %cst_132 : f32 to vector<1x128xf32>
    %229 = arith.maximumf %227, %228 : vector<1x128xf32>
    %c0_133 = arith.constant 0 : index
    %c0_134 = arith.constant 0 : index
    %230 = vector.load %arg12[%c0_133, %c0_134] : memref<1x128xf32, #tpu.memory_space<vmem>>, vector<1x128xf32>
    %cst_135 = arith.constant 9.99999974E-6 : f32
    %231 = vector.broadcast %cst_135 : f32 to vector<1x128xf32>
    %232 = arith.addf %229, %231 : vector<1x128xf32>
    %233 = math.rsqrt %232 : vector<1x128xf32>
    %234 = arith.mulf %230, %233 : vector<1x128xf32>
    %c0_136 = arith.constant 0 : index
    %c0_137 = arith.constant 0 : index
    %235 = vector.load %arg13[%c0_136, %c0_137] : memref<1x128xf32, #tpu.memory_space<vmem>>, vector<1x128xf32>
    %236 = arith.mulf %220, %234 : vector<1x128xf32>
    %237 = arith.subf %235, %236 : vector<1x128xf32>
    %238 = vector.broadcast %234 : vector<1x128xf32> to vector<128x128xf32>
    %239 = arith.mulf %216, %238 : vector<128x128xf32>
    %240 = vector.broadcast %237 : vector<1x128xf32> to vector<128x128xf32>
    %241 = arith.addf %239, %240 : vector<128x128xf32>
    %c4_138 = arith.constant 4 : index
    %c0_139 = arith.constant 0 : index
    %c0_140 = arith.constant 0 : index
    %242 = vector.load %arg2[%c4_138, %c0_139, %c0_140] : memref<9x128x16xbf16, #tpu.memory_space<vmem>>, vector<1x128x16xbf16>
    %243 = vector.shape_cast %242 : vector<1x128x16xbf16> to vector<128x16xbf16>
    %c0_141 = arith.constant 0 : index
    %c0_142 = arith.constant 0 : index
    %244 = vector.load %arg7[%c0_141, %c0_142] : memref<16x128xbf16, #tpu.memory_space<vmem>>, vector<16x128xbf16>
    %cst_143 = arith.constant dense<0.000000e+00> : vector<128x128xf32>
    %245 = tpu.matmul %243, %244, %cst_143 {dimension_numbers = #tpu.dot_dimension_numbers<[1], [0], [0], [1], [0, 0, 1, 1], [], []>} : vector<128x16xbf16>, vector<16x128xbf16>, vector<128x128xf32> -> vector<128x128xf32>
    %cst_144 = arith.constant dense<0.000000e+00> : vector<128xf32>
    %246 = vector.multi_reduction <add>, %245, %cst_144 [0] : vector<128x128xf32> to vector<128xf32>
    %247 = vector.shape_cast %246 : vector<128xf32> to vector<1x128xf32>
    %cst_145 = arith.constant 1.280000e+02 : f32
    %248 = vector.broadcast %cst_145 : f32 to vector<1x128xf32>
    %249 = arith.divf %247, %248 : vector<1x128xf32>
    %250 = arith.mulf %245, %245 : vector<128x128xf32>
    %cst_146 = arith.constant dense<0.000000e+00> : vector<128xf32>
    %251 = vector.multi_reduction <add>, %250, %cst_146 [0] : vector<128x128xf32> to vector<128xf32>
    %252 = vector.shape_cast %251 : vector<128xf32> to vector<1x128xf32>
    %cst_147 = arith.constant 1.280000e+02 : f32
    %253 = vector.broadcast %cst_147 : f32 to vector<1x128xf32>
    %254 = arith.divf %252, %253 : vector<1x128xf32>
    %255 = arith.mulf %249, %249 : vector<1x128xf32>
    %256 = arith.subf %254, %255 : vector<1x128xf32>
    %cst_148 = arith.constant 0.000000e+00 : f32
    %257 = vector.broadcast %cst_148 : f32 to vector<1x128xf32>
    %258 = arith.maximumf %256, %257 : vector<1x128xf32>
    %c0_149 = arith.constant 0 : index
    %c0_150 = arith.constant 0 : index
    %259 = vector.load %arg14[%c0_149, %c0_150] : memref<1x128xf32, #tpu.memory_space<vmem>>, vector<1x128xf32>
    %cst_151 = arith.constant 9.99999974E-6 : f32
    %260 = vector.broadcast %cst_151 : f32 to vector<1x128xf32>
    %261 = arith.addf %258, %260 : vector<1x128xf32>
    %262 = math.rsqrt %261 : vector<1x128xf32>
    %263 = arith.mulf %259, %262 : vector<1x128xf32>
    %c0_152 = arith.constant 0 : index
    %c0_153 = arith.constant 0 : index
    %264 = vector.load %arg15[%c0_152, %c0_153] : memref<1x128xf32, #tpu.memory_space<vmem>>, vector<1x128xf32>
    %265 = arith.mulf %249, %263 : vector<1x128xf32>
    %266 = arith.subf %264, %265 : vector<1x128xf32>
    %267 = vector.broadcast %263 : vector<1x128xf32> to vector<128x128xf32>
    %268 = arith.mulf %245, %267 : vector<128x128xf32>
    %269 = vector.broadcast %266 : vector<1x128xf32> to vector<128x128xf32>
    %270 = arith.addf %268, %269 : vector<128x128xf32>
    %271 = arith.addf %241, %270 : vector<128x128xf32>
    %cst_154 = arith.constant 0.000000e+00 : f32
    %272 = vector.broadcast %cst_154 : f32 to vector<128x128xf32>
    %273 = arith.maximumf %271, %272 : vector<128x128xf32>
    %c0_155 = arith.constant 0 : index
    %c0_156 = arith.constant 0 : index
    %274 = vector.load %arg16[%c0_155, %c0_156] : memref<128x128xf32, #tpu.memory_space<vmem>>, vector<128x128xf32>
    tpu.vector_store %arg16[%c0_155, %c0_156], %273 {strides = array<i32>} : memref<128x128xf32, #tpu.memory_space<vmem>>, vector<128x128xf32>,
    return
  }
  func.func @transform_0(%arg0: i32) -> (i32, i32) {
    %c0_i32 = arith.constant 0 : i32
    %c0_i32_0 = arith.constant 0 : i32
    %c0_i32_1 = arith.constant 0 : i32
    return %c0_i32, %c0_i32_0 : i32, i32
  }
  func.func @transform_1(%arg0: i32) -> (i32, i32, i32) {
    %c0_i32 = arith.constant 0 : i32
    %c0_i32_0 = arith.constant 0 : i32
    %c0_i32_1 = arith.constant 0 : i32
    %c0_i32_2 = arith.constant 0 : i32
    return %c0_i32, %c0_i32_0, %c0_i32_1 : i32, i32, i32
  }
  func.func @transform_2(%arg0: i32) -> (i32, i32, i32) {
    %c0_i32 = arith.constant 0 : i32
    %c0_i32_0 = arith.constant 0 : i32
    %c0_i32_1 = arith.constant 0 : i32
    %c0_i32_2 = arith.constant 0 : i32
    return %c0_i32, %c0_i32_0, %c0_i32_1 : i32, i32, i32
  }
  func.func @transform_3(%arg0: i32) -> (i32, i32) {
    %c0_i32 = arith.constant 0 : i32
    %c0_i32_0 = arith.constant 0 : i32
    %c0_i32_1 = arith.constant 0 : i32
    return %c0_i32, %c0_i32_0 : i32, i32
  }
  func.func @transform_4(%arg0: i32) -> (i32, i32, i32) {
    %c0_i32 = arith.constant 0 : i32
    %c0_i32_0 = arith.constant 0 : i32
    %c0_i32_1 = arith.constant 0 : i32
    %c0_i32_2 = arith.constant 0 : i32
    return %c0_i32, %c0_i32_0, %c0_i32_1 : i32, i32, i32
  }
  func.func @transform_5(%arg0: i32) -> (i32, i32) {
    %c0_i32 = arith.constant 0 : i32
    %c0_i32_0 = arith.constant 0 : i32
    %c0_i32_1 = arith.constant 0 : i32
    return %c0_i32, %c0_i32_0 : i32, i32
  }
  func.func @transform_6(%arg0: i32) -> (i32, i32) {
    %c0_i32 = arith.constant 0 : i32
    %c0_i32_0 = arith.constant 0 : i32
    %c0_i32_1 = arith.constant 0 : i32
    return %c0_i32, %c0_i32_0 : i32, i32
  }
  func.func @transform_7(%arg0: i32) -> (i32, i32) {
    %c0_i32 = arith.constant 0 : i32
    %c0_i32_0 = arith.constant 0 : i32
    %c0_i32_1 = arith.constant 0 : i32
    return %c0_i32, %c0_i32_0 : i32, i32
  }
  func.func @transform_8(%arg0: i32) -> (i32, i32) {
    %c0_i32 = arith.constant 0 : i32
    %c0_i32_0 = arith.constant 0 : i32
    %c0_i32_1 = arith.constant 0 : i32
    return %c0_i32, %c0_i32_0 : i32, i32
  }
  func.func @transform_9(%arg0: i32) -> (i32, i32) {
    %c0_i32 = arith.constant 0 : i32
    %c0_i32_0 = arith.constant 0 : i32
    %c0_i32_1 = arith.constant 0 : i32
    return %c0_i32, %c0_i32_0 : i32, i32
  }
  func.func @transform_10(%arg0: i32) -> (i32, i32) {
    %c0_i32 = arith.constant 0 : i32
    %c0_i32_0 = arith.constant 0 : i32
    %c0_i32_1 = arith.constant 0 : i32
    return %c0_i32, %c0_i32_0 : i32, i32
  }
  func.func @transform_11(%arg0: i32) -> (i32, i32) {
    %c0_i32 = arith.constant 0 : i32
    %c0_i32_0 = arith.constant 0 : i32
    %c0_i32_1 = arith.constant 0 : i32
    return %c0_i32, %c0_i32_0 : i32, i32
  }
  func.func @transform_12(%arg0: i32) -> (i32, i32) {
    %c0_i32 = arith.constant 0 : i32
    %c0_i32_0 = arith.constant 0 : i32
    %c0_i32_1 = arith.constant 0 : i32
    return %c0_i32, %c0_i32_0 : i32, i32
  }
  func.func @transform_13(%arg0: i32) -> (i32, i32) {
    %c0_i32 = arith.constant 0 : i32
    %c0_i32_0 = arith.constant 0 : i32
    %c0_i32_1 = arith.constant 0 : i32
    return %c0_i32, %c0_i32_0 : i32, i32
  }
  func.func @transform_14(%arg0: i32) -> (i32, i32) {
    %c0_i32 = arith.constant 0 : i32
    %c0_i32_0 = arith.constant 0 : i32
    %c0_i32_1 = arith.constant 0 : i32
    return %c0_i32, %c0_i32_0 : i32, i32
  }
  func.func @transform_15(%arg0: i32) -> (i32, i32) {
    %c0_i32 = arith.constant 0 : i32
    %c0_i32_0 = arith.constant 0 : i32
    %c0_i32_1 = arith.constant 0 : i32
    return %c0_i32, %c0_i32_0 : i32, i32
  }
}

</mosaic_0001>

<bundles_post_ra>
// kernel: tpu_custom_call.1
= control target key start
LH: loop header
LB: loop body
LE: loop exit
PB: predicated region body
PF: predicated region fallthrough
CT: control target
= control target key end

     0   :  { %v8177_v2 = vmov 0   ;;  %vm284_vm0 = vcmask 130048   ;;  %s11378_s0 = inlined_call_operand.vmem [shape: bf16[512,16], index: 0, kind: input, shape index: {}]   ;;  %s11379_s1 = inlined_call_operand.vmem [shape: bf16[9,128,16], index: 1, kind: input, shape index: {}]   ;;  %s11380_s2 = inlined_call_operand.vmem [shape: f32[9,128,1], index: 2, kind: input, shape index: {}]   ;;  %s11381_s3 = inlined_call_operand.vmem [shape: bf16[16,128], index: 3, kind: input, shape index: {}]   ;;  %s11382_s4 = inlined_call_operand.vmem [shape: bf16[9,128,128], index: 4, kind: input, shape index: {}]   ;;  %s11383_s5 = inlined_call_operand.vmem [shape: bf16[128,128], index: 5, kind: input, shape index: {}]   ;;  %s11384_s6 = inlined_call_operand.vmem [shape: bf16[16,128], index: 6, kind: input, shape index: {}]   ;;  %s11385_s7 = inlined_call_operand.vmem [shape: f32[1,128], index: 7, kind: input, shape index: {}]   ;;  %s11386_s8 = inlined_call_operand.vmem [shape: f32[1,128], index: 8, kind: input, shape index: {}]   ;;  %s11387_s9 = inlined_call_operand.vmem [shape: f32[1,128], index: 9, kind: input, shape index: {}]   ;;  %s11388_s10 = inlined_call_operand.vmem [shape: f32[1,128], index: 10, kind: input, shape index: {}]   ;;  %s11389_s11 = inlined_call_operand.vmem [shape: f32[1,128], index: 11, kind: input, shape index: {}]   ;;  %s11390_s12 = inlined_call_operand.vmem [shape: f32[1,128], index: 12, kind: input, shape index: {}]   ;;  %s11391_s13 = inlined_call_operand.vmem [shape: f32[1,128], index: 13, kind: input, shape index: {}]   ;;  %s11392_s14 = inlined_call_operand.vmem [shape: f32[1,128], index: 14, kind: input, shape index: {}]   ;;  %s11393_s15 = inlined_call_operand.hbm [shape: f32[128,128], index: 15, kind: output, shape index: {}]  }
   0x1   :  { %v6399_v0 = vld [vmem:[%s11380_s2 + $0x90] sm:$0xff]  ;;  %v6397_v1 = vld [vmem:[%s11380_s2 + $0x80] sm:$0xff]  ;;  %7948 = vset.pattern.permute.xlu1 %v8177_v2  ;;  %7947 = vset.pattern.permute.xlu0 %v8177_v2  ;;  %v6400_v4 = vld [vmem:[%s11380_s2 + $0x98] sm:$0xff] }
   0x2   :  { %v8270_v3 = vld [vmem:[%s11381_s3] sm:$0xff]   ;;  %1513 = vperm.xlu1 %7948, %v6399_v0   ;;  %1503 = vperm.xlu0 %7947, %v6397_v1   ;;  %v6398_v5 = vld [vmem:[%s11380_s2 + $0x88] sm:$0xff]  ;;  %v7952_v8 = vld [vmem:[%s11378_s0 + $0x10] sm:$0xff]  }
   0x3   :  { %7249 = vmatprep.subr.bf16.mxu0 %v8270_v3  ;;  %v7950_v6 = vld [vmem:[%s11378_s0] sm:$0xff]   ;;  %7315 = vmatprep.subr.bf16.mxu1 %v8270_v3  ;;  %v7951_v7 = vld [vmem:[%s11378_s0 + $0x8] sm:$0xff]   ;;  %v6404_v11 = vld [vmem:[%s11380_s2 + $0xb8] sm:$0xff] }
   0x4   :  { %7250 = vmatpush3.bf16.msra.mxu0 %v8270_v3  ;;  %7316 = vmatpush3.bf16.msra.mxu1 %v8270_v3  ;;  %v6402_v9 = vld [vmem:[%s11380_s2 + $0xa8] sm:$0xff]  ;;  %v6401_v10 = vld [vmem:[%s11380_s2 + $0xa0] sm:$0xff]  ;;  %v6403_v12 = vld [vmem:[%s11380_s2 + $0xb0] sm:$0xff] }
   0x5   :  { %7251 = vmatprep.mubr.msk.bf16.mxu0 %vm284_vm0, %v7950_v6  ;;  %7415 = vmatprep.subr.bf16.mxu0 %v8270_v3  ;;  %v7953_v13 = vld [vmem:[%s11378_s0 + $0x18] sm:$0xff]   ;;  %v7954_v14 = vld [vmem:[%s11378_s0 + $0x20] sm:$0xff]   ;;  %v6406_v15 = vld [vmem:[%s11380_s2 + $0xc8] sm:$0xff] }
   0x6   :  { %1518 = vperm.xlu1 %7948, %v6400_v4   ;;  %1508 = vperm.xlu0 %7947, %v6398_v5   ;;  %v6405_v16 = vld [vmem:[%s11380_s2 + $0xc0] sm:$0xff]  ;;  %v6408_v17 = vld [vmem:[%s11380_s2 + $0xd8] sm:$0xff]  ;;  %v6407_v18 = vld [vmem:[%s11380_s2 + $0xd0] sm:$0xff] }
   0x7   :  { %7252 = vmatmul.mubr.msk.bf16.vlgmr.msra.gmra.mrb[0].mxu0 %vm284_vm0, %v7951_v7  ;;  %7333 = vmatprep.subr.bf16.mxu1 %v8270_v3  ;;  %v7955_v19 = vld [vmem:[%s11378_s0 + $0x28] sm:$0xff]   ;;  %v7956_v20 = vld [vmem:[%s11378_s0 + $0x30] sm:$0xff]   ;;  %v6409_v22 = vld [vmem:[%s11380_s2 + $0xe0] sm:$0xff] }
   0x8   :  { %7255 = vmatprep.mubr.msk.bf16.mxu0 %vm284_vm0, %v7952_v8  ;;  %7416 = vmatpush3.bf16.msra.mxu0 %v8270_v3  ;;  %v6410_v21 = vld [vmem:[%s11380_s2 + $0xe8] sm:$0xff]  ;;  %v6412_v23 = vld [vmem:[%s11380_s2 + $0xf8] sm:$0xff]  ;;  %v6411_v24 = vld [vmem:[%s11380_s2 + $0xf0] sm:$0xff] }
   0x9   :  { %7465 = vmatprep.subr.bf16.mxu0 %v8270_v3  ;;  %v7957_v25 = vld [vmem:[%s11378_s0 + $0x38] sm:$0xff]   ;;  %v7958_v26 = vld [vmem:[%s11378_s0 + $0x40] sm:$0xff]   ;;  %v1123_v27 = vld [vmem:[%s11380_s2 + $0x8] sm:$0xff] }
   0xa   :  { %1528 = vperm.xlu1 %7948, %v6402_v9   ;;  %1523 = vperm.xlu0 %7947, %v6401_v10   ;;  %v1122_v28 = vld [vmem:[%s11380_s2] sm:$0xff]  ;;  %v1125_v29 = vld [vmem:[%s11380_s2 + $0x18] sm:$0xff]  ;;  %v1124_v30 = vld [vmem:[%s11380_s2 + $0x10] sm:$0xff] }
   0xb   :  { %v7959_v31 = vld [vmem:[%s11378_s0 + $0x48] sm:$0xff]   ;;  %v7960_v32 = vld [vmem:[%s11378_s0 + $0x50] sm:$0xff]   ;;  %v1126_v34 = vld [vmem:[%s11380_s2 + $0x20] sm:$0xff] }
   0xc   :  { %v1127_v33 = vld [vmem:[%s11380_s2 + $0x28] sm:$0xff]  ;;  %v1129_v35 = vld [vmem:[%s11380_s2 + $0x38] sm:$0xff]  ;;  %v1128_v36 = vld [vmem:[%s11380_s2 + $0x30] sm:$0xff] }
   0xd   :  { %v7961_v37 = vld [vmem:[%s11378_s0 + $0x58] sm:$0xff]   ;;  %v7962_v38 = vld [vmem:[%s11378_s0 + $0x60] sm:$0xff]   ;;  %v1131_v39 = vld [vmem:[%s11380_s2 + $0x48] sm:$0xff] }
   0xe   :  { %1538 = vperm.xlu1 %7948, %v6404_v11   ;;  %1533 = vperm.xlu0 %7947, %v6403_v12   ;;  %v1130_v40 = vld [vmem:[%s11380_s2 + $0x40] sm:$0xff]  ;;  %v1133_v42 = vld [vmem:[%s11380_s2 + $0x58] sm:$0xff]  ;;  %v1132_v43 = vld [vmem:[%s11380_s2 + $0x50] sm:$0xff] }
   0xf   :  { %7256 = vmatmul.mubr.msk.bf16.gmra.mrb[4].mxu0 %vm284_vm0, %v7953_v13  ;;  %v7978_v41 = vld [vmem:[%s11379_s1] sm:$0xff]   ;;  %v7979_v44 = vld [vmem:[%s11379_s1 + $0x8] sm:$0xff]   ;;  %v7964_v46 = vld [vmem:[%s11378_s0 + $0x70] sm:$0xff]  }
  0x10   :  { %7259 = vmatprep.mubr.msk.bf16.mxu0 %vm284_vm0, %v7954_v14  ;;  %v7963_v45 = vld [vmem:[%s11378_s0 + $0x68] sm:$0xff]   ;;  %7317 = vmatprep.mubr.msk.bf16.mxu1 %vm284_vm0, %v7978_v41  ;;  %v7982_v47 = vld [vmem:[%s11379_s1 + $0x10] sm:$0xff]   ;;  %v1134_v49 = vld [vmem:[%s11380_s2 + $0x60] sm:$0xff] }
  0x11   :  { %7318 = vmatmul.mubr.msk.bf16.vlgmr.msra.gmra.mrb[0].mxu1 %vm284_vm0, %v7979_v44  ;;  %v1135_v48 = vld [vmem:[%s11380_s2 + $0x68] sm:$0xff]  ;;  %v7983_v50 = vld [vmem:[%s11379_s1 + $0x18] sm:$0xff]   ;;  %v1136_v52 = vld [vmem:[%s11380_s2 + $0x70] sm:$0xff] }
  0x12   :  { %1548 = vperm.xlu1 %7948, %v6406_v15   ;;  %1543 = vperm.xlu0 %7947, %v6405_v16   ;;  %v1137_v51 = vld [vmem:[%s11380_s2 + $0x78] sm:$0xff]  ;;  %v7986_v54 = vld [vmem:[%s11379_s1 + $0x20] sm:$0xff]   ;;  %v6478_v56 = vld [vmem:[%s11380_s2 + $0x108] sm:$0xff] }
  0x13   :  { %7334 = vmatpush3.bf16.msra.mxu1 %v8270_v3  ;;  %7321 = vmatprep.mubr.msk.bf16.mxu1 %vm284_vm0, %v7982_v47  ;;  %v7965_v53 = vld [vmem:[%s11378_s0 + $0x78] sm:$0xff]   ;;  %v7966_v55 = vld [vmem:[%s11378_s0 + $0x80] sm:$0xff]   ;;  %v7987_v58 = vld [vmem:[%s11379_s1 + $0x28] sm:$0xff]  }
  0x14   :  { %v6477_v57 = vld [vmem:[%s11380_s2 + $0x100] sm:$0xff]  ;;  %v7990_v59 = vld [vmem:[%s11379_s1 + $0x30] sm:$0xff]   ;;  %v6480_v60 = vld [vmem:[%s11380_s2 + $0x118] sm:$0xff] }
  0x15   :  { %v6479_v61 = vld [vmem:[%s11380_s2 + $0x110] sm:$0xff]  ;;  %v7967_v62 = vld [vmem:[%s11378_s0 + $0x88] sm:$0xff]   ;;  %v6481_v1 = vld [vmem:[%s11380_s2 + $0x120] sm:$0xff] }
  0x16   :  { %1558 = vperm.xlu1 %7948, %v6408_v17   ;;  %1553 = vperm.xlu0 %7947, %v6407_v18   ;;  %v7968_v63 = vld [vmem:[%s11378_s0 + $0x90] sm:$0xff]   ;;  %v6482_v0 = vld [vmem:[%s11380_s2 + $0x128] sm:$0xff]  ;;  %v7991_v2 = vld [vmem:[%s11379_s1 + $0x38] sm:$0xff]  }
  0x17   :  { %7260 = vmatmul.mubr.msk.bf16.gmra.mrb[8].mxu0 %vm284_vm0, %v7955_v19  ;;  %v7994_v4 = vld [vmem:[%s11379_s1 + $0x40] sm:$0xff]   ;;  %v6484_v5 = vld [vmem:[%s11380_s2 + $0x138] sm:$0xff]  ;;  %v6483_v6 = vld [vmem:[%s11380_s2 + $0x130] sm:$0xff] }
  0x18   :  { %7263 = vmatprep.mubr.msk.bf16.mxu0 %vm284_vm0, %v7956_v20  ;;  %v7969_v7 = vld [vmem:[%s11378_s0 + $0x98] sm:$0xff]   ;;  %v7970_v8 = vld [vmem:[%s11378_s0 + $0xa0] sm:$0xff]   ;;  %v6486_v9 = vld [vmem:[%s11380_s2 + $0x148] sm:$0xff] }
  0x19   :  { %7322 = vmatmul.mubr.msk.bf16.gmra.mrb[4].mxu1 %vm284_vm0, %v7983_v50  ;;  %v6485_v10 = vld [vmem:[%s11380_s2 + $0x140] sm:$0xff]  ;;  %v7995_v11 = vld [vmem:[%s11379_s1 + $0x48] sm:$0xff]   ;;  %v7998_v12 = vld [vmem:[%s11379_s1 + $0x50] sm:$0xff]  }
  0x1a   :  { %1568 = vperm.xlu1 %7948, %v6410_v21   ;;  %1563 = vperm.xlu0 %7947, %v6409_v22   ;;  %v6488_v13 = vld [vmem:[%s11380_s2 + $0x158] sm:$0xff]  ;;  %v6487_v14 = vld [vmem:[%s11380_s2 + $0x150] sm:$0xff]  ;;  %v7971_v15 = vld [vmem:[%s11378_s0 + $0xa8] sm:$0xff]  }
  0x1b   :  { %7325 = vmatprep.mubr.msk.bf16.mxu1 %vm284_vm0, %v7986_v54  ;;  %v7972_v16 = vld [vmem:[%s11378_s0 + $0xb0] sm:$0xff]   ;;  %v6490_v17 = vld [vmem:[%s11380_s2 + $0x168] sm:$0xff]  ;;  %v6489_v18 = vld [vmem:[%s11380_s2 + $0x160] sm:$0xff] }
  0x1c   :  { %v7999_v19 = vld [vmem:[%s11379_s1 + $0x58] sm:$0xff]   ;;  %v8002_v20 = vld [vmem:[%s11379_s1 + $0x60] sm:$0xff]   ;;  %v6491_v22 = vld [vmem:[%s11380_s2 + $0x170] sm:$0xff] }
  0x1d   :  { %v6492_v21 = vld [vmem:[%s11380_s2 + $0x178] sm:$0xff]  ;;  %v6557_v41 = vld [vmem:[%s11380_s2 + $0x1c0] sm:$0xff]  ;;  %v7981_v44 = vld [vmem:[%s11378_s0 + $0xe8] sm:$0xff]  }
  0x1e   :  { %1578 = vperm.xlu1 %7948, %v6412_v23   ;;  %1573 = vperm.xlu0 %7947, %v6411_v24   ;;  %v7973_v23 = vld [vmem:[%s11378_s0 + $0xb8] sm:$0xff]   ;;  %v7974_v24 = vld [vmem:[%s11378_s0 + $0xc0] sm:$0xff]  }
  0x1f   :  { %7264 = vmatmul.mubr.msk.bf16.gmra.mrb[12].mxu0 %vm284_vm0, %v7957_v25  ;;  %v6550_v25 = vld [vmem:[%s11380_s2 + $0x188] sm:$0xff]  ;;  %v6561_v47 = vld [vmem:[%s11380_s2 + $0x1e0] sm:$0xff]  ;;  %v7985_v50 = vld [vmem:[%s11378_s0 + $0xf8] sm:$0xff]  }
  0x20   :  { %7267 = vmatprep.mubr.msk.bf16.mxu0 %vm284_vm0, %v7958_v26  ;;  %v6549_v26 = vld [vmem:[%s11380_s2 + $0x180] sm:$0xff] }
  0x21   :  { %7326 = vmatmul.mubr.msk.bf16.gmra.mrb[8].mxu1 %vm284_vm0, %v7987_v58  ;;  %v7992_v58 = vld [vmem:[%s11379_s1 + $0x90] sm:$0xff]  }
  0x22   :  { %1145 = vperm.xlu1 %7948, %v1123_v27   ;;  %1140 = vperm.xlu0 %7947, %v1122_v28   ;;  %v8003_v27 = vld [vmem:[%s11379_s1 + $0x68] sm:$0xff]   ;;  %v6552_v28 = vld [vmem:[%s11380_s2 + $0x198] sm:$0xff] }
  0x23   :  { %7329 = vmatprep.mubr.msk.bf16.mxu1 %vm284_vm0, %v7990_v59 }
  0x26   :  { %1155 = vperm.xlu1 %7948, %v1125_v29   ;;  %1150 = vperm.xlu0 %7947, %v1124_v30   ;;  %v8006_v29 = vld [vmem:[%s11379_s1 + $0x70] sm:$0xff]  }
  0x27   :  { %7268 = vmatmul.mubr.msk.bf16.gmra.mrb[16].mxu0 %vm284_vm0, %v7959_v31  ;;  %v6551_v30 = vld [vmem:[%s11380_s2 + $0x190] sm:$0xff]  ;;  %v7975_v31 = vld [vmem:[%s11378_s0 + $0xc8] sm:$0xff]  }
  0x28   :  { %7271 = vmatprep.mubr.msk.bf16.mxu0 %vm284_vm0, %v7960_v32  ;;  %v7976_v32 = vld [vmem:[%s11378_s0 + $0xd0] sm:$0xff]  }
  0x29   :  { %7330 = vmatmul.mubr.msk.bf16.gmra.mrb[12].mxu1 %vm284_vm0, %v7991_v2 }
  0x2a   :  { %1165 = vperm.xlu1 %7948, %v1127_v33   ;;  %1160 = vperm.xlu0 %7947, %v1126_v34   ;;  %v6554_v33 = vld [vmem:[%s11380_s2 + $0x1a8] sm:$0xff]  ;;  %v6553_v34 = vld [vmem:[%s11380_s2 + $0x1a0] sm:$0xff] }
  0x2b   :  { %7335 = vmatprep.mubr.msk.bf16.mxu1 %vm284_vm0, %v7994_v4  ;;  %v7993_v4 = vld [vmem:[%s11379_s1 + $0x98] sm:$0xff]  }
  0x2e   :  { %1175 = vperm.xlu1 %7948, %v1129_v35   ;;  %1170 = vperm.xlu0 %7947, %v1128_v36   ;;  %v8007_v35 = vld [vmem:[%s11379_s1 + $0x78] sm:$0xff]  }
  0x2f   :  { %7272 = vmatmul.mubr.msk.bf16.gmra.mrb[20].mxu0 %vm284_vm0, %v7961_v37  ;;  %v6556_v36 = vld [vmem:[%s11380_s2 + $0x1b8] sm:$0xff]  ;;  %v6555_v37 = vld [vmem:[%s11380_s2 + $0x1b0] sm:$0xff] }
  0x30   :  { %7275 = vmatprep.mubr.msk.bf16.mxu0 %vm284_vm0, %v7962_v38  ;;  %v7977_v38 = vld [vmem:[%s11378_s0 + $0xd8] sm:$0xff]  }
  0x31   :  { %7336 = vmatmul.mubr.msk.bf16.vlgmr.msra.gmra.mrb[16].mxu1 %vm284_vm0, %v7995_v11  ;;  %v7997_v11 = vld [vmem:[%s11379_s1 + $0xa8] sm:$0xff]  }
  0x32   :  { %1185 = vperm.xlu1 %7948, %v1131_v39   ;;  %1180 = vperm.xlu0 %7947, %v1130_v40   ;;  %v7980_v39 = vld [vmem:[%s11378_s0 + $0xe0] sm:$0xff]   ;;  %v6558_v40 = vld [vmem:[%s11380_s2 + $0x1c8] sm:$0xff] }
  0x33   :  { %7339 = vmatprep.mubr.msk.bf16.mxu1 %vm284_vm0, %v7998_v12  ;;  %v8000_v12 = vld [vmem:[%s11379_s1 + $0xb0] sm:$0xff]  }
  0x36   :  { %1195 = vperm.xlu1 %7948, %v1133_v42   ;;  %1190 = vperm.xlu0 %7947, %v1132_v43   ;;  %v6560_v42 = vld [vmem:[%s11380_s2 + $0x1d8] sm:$0xff]  ;;  %v6559_v43 = vld [vmem:[%s11380_s2 + $0x1d0] sm:$0xff] }
  0x37   :  { %7276 = vmatmul.mubr.msk.bf16.gmra.mrb[24].mxu0 %vm284_vm0, %v7963_v45  ;;  %v7984_v45 = vld [vmem:[%s11378_s0 + $0xf0] sm:$0xff]  }
  0x38   :  { %7279 = vmatprep.mubr.msk.bf16.mxu0 %vm284_vm0, %v7964_v46  ;;  %v6562_v46 = vld [vmem:[%s11380_s2 + $0x1e8] sm:$0xff] }
  0x39   :  { %7340 = vmatmul.mubr.msk.bf16.gmra.mrb[20].mxu1 %vm284_vm0, %v7999_v19  ;;  %v8001_v19 = vld [vmem:[%s11379_s1 + $0xb8] sm:$0xff]  }
  0x3a   :  { %1205 = vperm.xlu1 %7948, %v1135_v48   ;;  %1200 = vperm.xlu0 %7947, %v1134_v49   ;;  %v6564_v48 = vld [vmem:[%s11380_s2 + $0x1f8] sm:$0xff]  ;;  %v6563_v49 = vld [vmem:[%s11380_s2 + $0x1f0] sm:$0xff] }
  0x3b   :  { %7343 = vmatprep.mubr.msk.bf16.mxu1 %vm284_vm0, %v8002_v20  ;;  %v8004_v20 = vld [vmem:[%s11379_s1 + $0xc0] sm:$0xff]  }
  0x3e   :  { %1215 = vperm.xlu1 %7948, %v1137_v51   ;;  %1210 = vperm.xlu0 %7947, %v1136_v52   ;;  %v7988_v51 = vld [vmem:[%s11379_s1 + $0x80] sm:$0xff]   ;;  %v6622_v52 = vld [vmem:[%s11380_s2 + $0x208] sm:$0xff] }
  0x3f   :  { %7280 = vmatmul.mubr.msk.bf16.gmra.mrb[28].mxu0 %vm284_vm0, %v7965_v53  ;;  %v6621_v53 = vld [vmem:[%s11380_s2 + $0x200] sm:$0xff] }
  0x40   :  { %7283 = vmatprep.mubr.msk.bf16.mxu0 %vm284_vm0, %v7966_v55  ;;  %v6624_v55 = vld [vmem:[%s11380_s2 + $0x218] sm:$0xff] }
  0x41   :  { %7344 = vmatmul.mubr.msk.bf16.gmra.mrb[24].mxu1 %vm284_vm0, %v8003_v27  ;;  %v8005_v27 = vld [vmem:[%s11379_s1 + $0xc8] sm:$0xff]  }
  0x42   :  { %2162 = vperm.xlu1 %7948, %v6478_v56   ;;  %2157 = vperm.xlu0 %7947, %v6477_v57   ;;  %v6623_v56 = vld [vmem:[%s11380_s2 + $0x210] sm:$0xff]  ;;  %v7989_v57 = vld [vmem:[%s11379_s1 + $0x88] sm:$0xff]  }
  0x43   :  { %7347 = vmatprep.mubr.msk.bf16.mxu1 %vm284_vm0, %v8006_v29  ;;  %v8008_v29 = vld [vmem:[%s11379_s1 + $0xd0] sm:$0xff]  }
  0x46   :  { %2172 = vperm.xlu1 %7948, %v6480_v60   ;;  %2167 = vperm.xlu0 %7947, %v6479_v61   ;;  %v6626_v61 = vld [vmem:[%s11380_s2 + $0x228] sm:$0xff] }
  0x47   :  { %7284 = vmatmul.mubr.msk.bf16.gmra.mrb[32].mxu0 %vm284_vm0, %v7967_v62  ;;  %v6625_v62 = vld [vmem:[%s11380_s2 + $0x220] sm:$0xff] }
  0x48   :  { %7287 = vmatprep.mubr.msk.bf16.mxu0 %vm284_vm0, %v7968_v63  ;;  %v6628_v63 = vld [vmem:[%s11380_s2 + $0x238] sm:$0xff] }
  0x49   :  { %7348 = vmatmul.mubr.msk.bf16.gmra.mrb[28].mxu1 %vm284_vm0, %v8007_v35 }
  0x4a   :  { %2182 = vperm.xlu1 %7948, %v6482_v0   ;;  %2177 = vperm.xlu0 %7947, %v6481_v1   ;;  %v6627_v0 = vld [vmem:[%s11380_s2 + $0x230] sm:$0xff] }
  0x4e   :  { %2192 = vperm.xlu1 %7948, %v6484_v5   ;;  %2187 = vperm.xlu0 %7947, %v6483_v6   ;;  %v7996_v5 = vld [vmem:[%s11379_s1 + $0xa0] sm:$0xff]  }
  0x4f   :  { %7288 = vmatmul.mubr.msk.bf16.gmra.mrb[36].mxu0 %vm284_vm0, %v7969_v7  ;;  %v6629_v6 = vld [vmem:[%s11380_s2 + $0x240] sm:$0xff] }
  0x50   :  { %7291 = vmatprep.mubr.msk.bf16.mxu0 %vm284_vm0, %v7970_v8 }
  0x52   :  { %2202 = vperm.xlu1 %7948, %v6486_v9   ;;  %2197 = vperm.xlu0 %7947, %v6485_v10   ;;  %v6632_v9 = vld [vmem:[%s11380_s2 + $0x258] sm:$0xff]  ;;  %v6631_v10 = vld [vmem:[%s11380_s2 + $0x250] sm:$0xff] }
  0x56   :  { %2212 = vperm.xlu1 %7948, %v6488_v13   ;;  %2207 = vperm.xlu0 %7947, %v6487_v14  }
  0x57   :  { %7292 = vmatmul.mubr.msk.bf16.gmra.mrb[40].mxu0 %vm284_vm0, %v7971_v15  ;;  %v6634_v15 = vld [vmem:[%s11380_s2 + $0x268] sm:$0xff] }
  0x58   :  { %7295 = vmatprep.mubr.msk.bf16.mxu0 %vm284_vm0, %v7972_v16  ;;  %v6633_v16 = vld [vmem:[%s11380_s2 + $0x260] sm:$0xff] }
  0x5a   :  { %2222 = vperm.xlu1 %7948, %v6490_v17   ;;  %2217 = vperm.xlu0 %7947, %v6489_v18   ;;  %v6636_v17 = vld [vmem:[%s11380_s2 + $0x278] sm:$0xff]  ;;  %v6635_v18 = vld [vmem:[%s11380_s2 + $0x270] sm:$0xff] }
  0x5e   :  { %2232 = vperm.xlu1 %7948, %v6492_v21   ;;  %2227 = vperm.xlu0 %7947, %v6491_v22  }
  0x5f   :  { %7296 = vmatmul.mubr.msk.bf16.gmra.mrb[44].mxu0 %vm284_vm0, %v7973_v23  ;;  %v6694_v23 = vld [vmem:[%s11380_s2 + $0x288] sm:$0xff] }
  0x60   :  { %7299 = vmatprep.mubr.msk.bf16.mxu0 %vm284_vm0, %v7974_v24  ;;  %v6693_v24 = vld [vmem:[%s11380_s2 + $0x280] sm:$0xff] }
  0x62   :  { %2687 = vperm.xlu1 %7948, %v6550_v25   ;;  %2682 = vperm.xlu0 %7947, %v6549_v26   ;;  %v6696_v25 = vld [vmem:[%s11380_s2 + $0x298] sm:$0xff]  ;;  %v6695_v26 = vld [vmem:[%s11380_s2 + $0x290] sm:$0xff] }
  0x66   :  { %2697 = vperm.xlu1 %7948, %v6552_v28   ;;  %2692 = vperm.xlu0 %7947, %v6551_v30  }
  0x67   :  { %7300 = vmatmul.mubr.msk.bf16.gmra.mrb[48].mxu0 %vm284_vm0, %v7975_v31  ;;  %v6698_v31 = vld [vmem:[%s11380_s2 + $0x2a8] sm:$0xff] }
  0x68   :  { %7303 = vmatprep.mubr.msk.bf16.mxu0 %vm284_vm0, %v7976_v32  ;;  %v6697_v32 = vld [vmem:[%s11380_s2 + $0x2a0] sm:$0xff] }
  0x6a   :  { %2707 = vperm.xlu1 %7948, %v6554_v33   ;;  %2702 = vperm.xlu0 %7947, %v6553_v34   ;;  %v8802_v34 = vld [vmem:[%s11381_s3] sm:$0xff]  }
  0x6e   :  { %2717 = vperm.xlu1 %7948, %v6556_v36   ;;  %2712 = vperm.xlu0 %7947, %v6555_v37   ;;  %v6700_v36 = vld [vmem:[%s11380_s2 + $0x2b8] sm:$0xff]  ;;  %v6699_v37 = vld [vmem:[%s11380_s2 + $0x2b0] sm:$0xff] }
  0x6f   :  { %7304 = vmatmul.mubr.msk.bf16.gmra.mrb[52].mxu0 %vm284_vm0, %v7977_v38  ;;  %v8009_v38 = vld [vmem:[%s11379_s1 + $0xd8] sm:$0xff]  }
  0x70   :  { %7307 = vmatprep.mubr.msk.bf16.mxu0 %vm284_vm0, %v7980_v39  ;;  %v8010_v39 = vld [vmem:[%s11379_s1 + $0xe0] sm:$0xff]  }
  0x72   :  { %2727 = vperm.xlu1 %7948, %v6558_v40   ;;  %2722 = vperm.xlu0 %7947, %v6557_v41   ;;  %v6702_v40 = vld [vmem:[%s11380_s2 + $0x2c8] sm:$0xff] }
  0x76   :  { %2737 = vperm.xlu1 %7948, %v6560_v42   ;;  %2732 = vperm.xlu0 %7947, %v6559_v43   ;;  %v6701_v42 = vld [vmem:[%s11380_s2 + $0x2c0] sm:$0xff] }
  0x77   :  { %7308 = vmatmul.mubr.msk.bf16.gmra.mrb[56].mxu0 %vm284_vm0, %v7981_v44  ;;  %v6704_v44 = vld [vmem:[%s11380_s2 + $0x2d8] sm:$0xff] }
  0x78   :  { %7311 = vmatprep.mubr.msk.bf16.mxu0 %vm284_vm0, %v7984_v45  ;;  %v6703_v45 = vld [vmem:[%s11380_s2 + $0x2d0] sm:$0xff] }
  0x7a   :  { %2747 = vperm.xlu1 %7948, %v6562_v46   ;;  %2742 = vperm.xlu0 %7947, %v6561_v47   ;;  %v8011_v46 = vld [vmem:[%s11379_s1 + $0xe8] sm:$0xff]   ;;  %v8012_v47 = vld [vmem:[%s11379_s1 + $0xf0] sm:$0xff]  }
  0x7e   :  { %2757 = vperm.xlu1 %7948, %v6564_v48   ;;  %2752 = vperm.xlu0 %7947, %v6563_v49  }
  0x7f   :  { %7312 = vmatmul.mubr.msk.bf16.gmra.mrb[60].mxu0 %vm284_vm0, %v7985_v50  ;;  %v6706_v50 = vld [vmem:[%s11380_s2 + $0x2e8] sm:$0xff] }
  0x80   :  { %7417 = vmatprep.mubr.msk.bf16.mxu0 %vm284_vm0, %v7988_v51  ;;  %v6705_v51 = vld [vmem:[%s11380_s2 + $0x2e0] sm:$0xff] }
  0x81   :  { %v8669_v54 = vpop.permute.xlu1 %1513  ;;  %v8683_v59 = vpop.permute.xlu0 %1503 }
  0x82   :  { %3212 = vperm.xlu1 %7948, %v6622_v52   ;;  %3207 = vperm.xlu0 %7947, %v6621_v53   ;;  %11482 = vst [vmem:[#allocation5_spill] sm:$0xff] %v8683_v59  ;;  %v6708_v52 = vld [vmem:[%s11380_s2 + $0x2f8] sm:$0xff]  ;;  %v6707_v53 = vld [vmem:[%s11380_s2 + $0x2f0] sm:$0xff] }
  0x85   :  { %v8685_v60 = vpop.permute.xlu1 %1518  ;;  %v8703_v1 = vpop.permute.xlu0 %1508 }
  0x86   :  { %11483 = vst [vmem:[#allocation6_spill] sm:$0xff] %v8685_v60  ;;  %3222 = vperm.xlu1 %7948, %v6624_v55   ;;  %3217 = vperm.xlu0 %7947, %v6623_v56   ;;  %11484 = vst [vmem:[#allocation7_spill] sm:$0xff] %v8703_v1  ;;  %v8013_v55 = vld [vmem:[%s11379_s1 + $0xf8] sm:$0xff]  }
  0x87   :  { %7418 = vmatmul.mubr.msk.bf16.vlgmr.msra.gmra.mrb[64].mxu0 %vm284_vm0, %v7989_v57  ;;  %v8014_v57 = vld [vmem:[%s11379_s1 + $0x100] sm:$0xff]  }
  0x88   :  { %7421 = vmatprep.mubr.msk.bf16.mxu0 %vm284_vm0, %v7992_v58  ;;  %7466 = vmatpush3.bf16.msra.mxu0 %v8270_v3 }
  0x89   :  { %7515 = vmatprep.subr.bf16.mxu0 %v8270_v3  ;;  %v8705_v2 = vpop.permute.xlu1 %1528  ;;  %v6630_v3 = vld [vmem:[%s11380_s2 + $0x248] sm:$0xff]  ;;  %v8720_v7 = vpop.permute.xlu0 %1523 }
  0x8a   :  { %3232 = vperm.xlu1 %7948, %v6626_v61   ;;  %3227 = vperm.xlu0 %7947, %v6625_v62   ;;  %11485 = vst [vmem:[#allocation8_spill] sm:$0xff] %v8705_v2  ;;  %11486 = vst [vmem:[#allocation9_spill] sm:$0xff] %v8720_v7  ;;  %v6766_v61 = vld [vmem:[%s11380_s2 + $0x308] sm:$0xff]  ;;  %v6765_v62 = vld [vmem:[%s11380_s2 + $0x300] sm:$0xff] }
  0x8d   :  { %v8723_v8 = vpop.permute.xlu1 %1538  ;;  %v8737_v13 = vpop.permute.xlu0 %1533 }
  0x8e   :  { %3242 = vperm.xlu1 %7948, %v6628_v63   ;;  %3237 = vperm.xlu0 %7947, %v6627_v0   ;;  %11487 = vst [vmem:[#allocation10_spill] sm:$0xff] %v8723_v8  ;;  %11488 = vst [vmem:[#allocation11_spill] sm:$0xff] %v8737_v13 }
  0x8f   :  { %7422 = vmatmul.mubr.msk.bf16.gmra.mrb[68].mxu0 %vm284_vm0, %v7993_v4  ;;  %v6768_v4 = vld [vmem:[%s11380_s2 + $0x318] sm:$0xff] }
  0x90   :  { %7425 = vmatprep.mubr.msk.bf16.mxu0 %vm284_vm0, %v7996_v5  ;;  %v6767_v5 = vld [vmem:[%s11380_s2 + $0x310] sm:$0xff] }
  0x91   :  { %v8739_v14 = vpop.permute.xlu1 %1548  ;;  %v8761_v21 = vpop.permute.xlu0 %1543 }
  0x92   :  { %3252 = vperm.xlu1 %7948, %v6630_v3   ;;  %3247 = vperm.xlu0 %7947, %v6629_v6   ;;  %11489 = vst [vmem:[#allocation12_spill] sm:$0xff] %v8739_v14  ;;  %11490 = vst [vmem:[#allocation13_spill] sm:$0xff] %v8761_v21  ;;  %v8015_v3 = vld [vmem:[%s11379_s1 + $0x108] sm:$0xff]   ;;  %v8016_v6 = vld [vmem:[%s11379_s1 + $0x110] sm:$0xff]  }
  0x95   :  { %v8763_v22 = vpop.permute.xlu1 %1558  ;;  %v8782_v28 = vpop.permute.xlu0 %1553 }
  0x96   :  { %3262 = vperm.xlu1 %7948, %v6632_v9   ;;  %3257 = vperm.xlu0 %7947, %v6631_v10   ;;  %11491 = vst [vmem:[#allocation14_spill] sm:$0xff] %v8763_v22  ;;  %11492 = vst [vmem:[#allocation15_spill] sm:$0xff] %v8782_v28  ;;  %v6770_v9 = vld [vmem:[%s11380_s2 + $0x328] sm:$0xff] }
  0x97   :  { %7426 = vmatmul.mubr.msk.bf16.gmra.mrb[72].mxu0 %vm284_vm0, %v7997_v11  ;;  %v6769_v11 = vld [vmem:[%s11380_s2 + $0x320] sm:$0xff] }
  0x98   :  { %7429 = vmatprep.mubr.msk.bf16.mxu0 %vm284_vm0, %v8000_v12 }
  0x99   :  { %v8787_v30 = vpop.permute.xlu1 %1568  ;;  %v8796_v33 = vpop.permute.xlu0 %1563 }
  0x9a   :  { %3272 = vperm.xlu1 %7948, %v6634_v15   ;;  %3267 = vperm.xlu0 %7947, %v6633_v16   ;;  %11493 = vst [vmem:[#allocation16_spill] sm:$0xff] %v8787_v30  ;;  %11494 = vst [vmem:[#allocation17_spill] sm:$0xff] %v8796_v33  ;;  %v6772_v15 = vld [vmem:[%s11380_s2 + $0x338] sm:$0xff]  ;;  %v6771_v16 = vld [vmem:[%s11380_s2 + $0x330] sm:$0xff] }
  0x9d   :  { %v8805_v35 = vpop.permute.xlu1 %1578  ;;  %v8823_v41 = vpop.permute.xlu0 %1573 }
  0x9e   :  { %3282 = vperm.xlu1 %7948, %v6636_v17   ;;  %3277 = vperm.xlu0 %7947, %v6635_v18   ;;  %11495 = vst [vmem:[#allocation18_spill] sm:$0xff] %v8805_v35  ;;  %11496 = vst [vmem:[#allocation19_spill] sm:$0xff] %v8823_v41  ;;  %v8017_v17 = vld [vmem:[%s11379_s1 + $0x118] sm:$0xff]   ;;  %v8018_v18 = vld [vmem:[%s11379_s1 + $0x120] sm:$0xff]  }
  0x9f   :  { %7430 = vmatmul.mubr.msk.bf16.gmra.mrb[76].mxu0 %vm284_vm0, %v8001_v19 }
  0xa0   :  { %7467 = vmatprep.mubr.msk.bf16.mxu0 %vm284_vm0, %v8004_v20 }
  0xa1   :  { %v8828_v43 = vpop.permute.xlu1 %1145  ;;  %v8844_v48 = vpop.permute.xlu0 %1140 }
  0xa2   :  { %3737 = vperm.xlu1 %7948, %v6694_v23   ;;  %3732 = vperm.xlu0 %7947, %v6693_v24  }
  0xa5   :  { %v8846_v49 = vpop.permute.xlu1 %1155  ;;  %v8865_v56 = vpop.permute.xlu0 %1150 }
  0xa6   :  { %3747 = vperm.xlu1 %7948, %v6696_v25   ;;  %3742 = vperm.xlu0 %7947, %v6695_v26  }
  0xa7   :  { %7468 = vmatmul.mubr.msk.bf16.vlgmr.msra.gmra.mrb[80].mxu0 %vm284_vm0, %v8005_v27 }
  0xa8   :  { %7471 = vmatprep.mubr.msk.bf16.mxu0 %vm284_vm0, %v8008_v29  ;;  %7516 = vmatpush3.bf16.msra.mxu0 %v8802_v34 }
  0xa9   :  { %7565 = vmatprep.subr.bf16.mxu0 %v8802_v34  ;;  %v8870_v58 = vpop.permute.xlu1 %1165  ;;  %v8879_v63 = vpop.permute.xlu0 %1160 }
  0xaa   :  { %3757 = vperm.xlu1 %7948, %v6698_v31   ;;  %3752 = vperm.xlu0 %7947, %v6697_v32  }
  0xad   :  { %v8882_v0 = vpop.permute.xlu1 %1175  ;;  %v8899_v10 = vpop.permute.xlu0 %1170 }
  0xae   :  { %3767 = vperm.xlu1 %7948, %v6700_v36   ;;  %3762 = vperm.xlu0 %7947, %v6699_v37  }
  0xaf   :  { %7472 = vmatmul.mubr.msk.bf16.gmra.mrb[84].mxu0 %vm284_vm0, %v8009_v38 }
  0xb0   :  { %7475 = vmatprep.mubr.msk.bf16.mxu0 %vm284_vm0, %v8010_v39 }
  0xb1   :  { %v8904_v12 = vpop.permute.xlu1 %1185  ;;  %v8922_v19 = vpop.permute.xlu0 %1180 }
  0xb2   :  { %3777 = vperm.xlu1 %7948, %v6702_v40   ;;  %3772 = vperm.xlu0 %7947, %v6701_v42  }
  0xb5   :  { %v8924_v20 = vpop.permute.xlu1 %1195 }
  0xb6   :  { %3787 = vperm.xlu1 %7948, %v6704_v44   ;;  %3782 = vperm.xlu0 %7947, %v6703_v45  }
  0xb7   :  { %7476 = vmatmul.mubr.msk.bf16.gmra.mrb[88].mxu0 %vm284_vm0, %v8011_v46 }
  0xb8   :  { %7479 = vmatprep.mubr.msk.bf16.mxu0 %vm284_vm0, %v8012_v47 }
  0xba   :  { %3797 = vperm.xlu1 %7948, %v6706_v50   ;;  %3792 = vperm.xlu0 %7947, %v6705_v51  }
  0xbe   :  { %3807 = vperm.xlu1 %7948, %v6708_v52   ;;  %3802 = vperm.xlu0 %7947, %v6707_v53  }
  0xbf   :  { %7480 = vmatmul.mubr.msk.bf16.gmra.mrb[92].mxu0 %vm284_vm0, %v8013_v55 }
  0xc0   :  { %7517 = vmatprep.mubr.msk.bf16.mxu0 %vm284_vm0, %v8014_v57 }
  0xc2   :  { %4262 = vperm.xlu1 %7948, %v6766_v61   ;;  %4257 = vperm.xlu0 %7947, %v6765_v62  }
  0xc6   :  { %4272 = vperm.xlu1 %7948, %v6768_v4   ;;  %4267 = vperm.xlu0 %7947, %v6767_v5  }
  0xc7   :  { %7518 = vmatmul.mubr.msk.bf16.vlgmr.msra.gmra.mrb[96].mxu0 %vm284_vm0, %v8015_v3 }
  0xc8   :  { %7521 = vmatprep.mubr.msk.bf16.mxu0 %vm284_vm0, %v8016_v6  ;;  %7566 = vmatpush3.bf16.msra.mxu0 %v8802_v34 }
  0xc9   :  { %7615 = vmatprep.subr.bf16.mxu0 %v8802_v34 }
  0xca   :  { %4282 = vperm.xlu1 %7948, %v6770_v9   ;;  %4277 = vperm.xlu0 %7947, %v6769_v11  }
  0xcb   :  { %20 = vsyncpa [#allocation3], 0  ;;  %v6774_v23 = vld [vmem:[%s11380_s2 + $0x348] sm:$0xff]  ;;  %v6773_v24 = vld [vmem:[%s11380_s2 + $0x340] sm:$0xff]  ;;  %v8934_v25 = vpop.permute.xlu0 %1190  ;;  %v8936_v26 = vpop.permute.xlu1 %1205 }
  0xcc   :  { %v6776_v27 = vld [vmem:[%s11380_s2 + $0x358] sm:$0xff]  ;;  %v6775_v29 = vld [vmem:[%s11380_s2 + $0x350] sm:$0xff]  ;;  %v8019_v31 = vld [vmem:[%s11379_s1 + $0x128] sm:$0xff]  }
  0xcd   :  { %v8020_v32 = vld [vmem:[%s11379_s1 + $0x130] sm:$0xff]   ;;  %v6778_v36 = vld [vmem:[%s11380_s2 + $0x368] sm:$0xff]  ;;  %v6777_v37 = vld [vmem:[%s11380_s2 + $0x360] sm:$0xff] }
  0xce   :  { %4292 = vperm.xlu1 %7948, %v6772_v15   ;;  %4287 = vperm.xlu0 %7947, %v6771_v16   ;;  %v6780_v44 = vld [vmem:[%s11380_s2 + $0x378] sm:$0xff]  ;;  %v6779_v45 = vld [vmem:[%s11380_s2 + $0x370] sm:$0xff]  ;;  %v8022_v50 = vld [vmem:[%s11379_s1 + $0x140] sm:$0xff]  }
  0xcf   :  { %7522 = vmatmul.mubr.msk.bf16.gmra.mrb[100].mxu0 %vm284_vm0, %v8017_v17  ;;  %v8957_v38 = vpop.permute.xlu0 %1200  ;;  %v8960_v39 = vpop.permute.xlu1 %1215  ;;  %v8021_v46 = vld [vmem:[%s11379_s1 + $0x138] sm:$0xff]   ;;  %v6838_v62 = vld [vmem:[%s11380_s2 + $0x388] sm:$0xff]  ;;  %v6837_v4 = vld [vmem:[%s11380_s2 + $0x380] sm:$0xff] }
  0xd0   :  { %7525 = vmatprep.mubr.msk.bf16.mxu0 %vm284_vm0, %v8018_v18  ;;  %v6840_v18 = vld [vmem:[%s11380_s2 + $0x398] sm:$0xff]  ;;  %v6914_v30 = vld [vmem:[%s11380_s2 + $0x428] sm:$0xff]  ;;  %v6913_v35 = vld [vmem:[%s11380_s2 + $0x420] sm:$0xff] }
  0xd1   :  { %v6918_v14 = vld [vmem:[%s11380_s2 + $0x448] sm:$0xff] }
  0xd2   :  { %4302 = vperm.xlu1 %7948, %v6774_v23   ;;  %4297 = vperm.xlu0 %7947, %v6773_v24   ;;  %v6839_v23 = vld [vmem:[%s11380_s2 + $0x390] sm:$0xff]  ;;  %v8023_v24 = vld [vmem:[%s11379_s1 + $0x148] sm:$0xff]  }
  0xd3   :  { %v8974_v51 = vpop.permute.xlu0 %1210  ;;  %v8976_v53 = vpop.permute.xlu1 %2162  ;;  %v6922_v21 = vld [vmem:[%s11380_s2 + $0x468] sm:$0xff] }
  0xd6   :  { %4312 = vperm.xlu1 %7948, %v6776_v27   ;;  %4307 = vperm.xlu0 %7947, %v6775_v29  }
  0xd7   :  { %7526 = vmatmul.mubr.msk.bf16.gmra.mrb[104].mxu0 %vm284_vm0, %v8019_v31  ;;  %v8995_v27 = vpop.permute.xlu0 %2157 }
  0xd8   :  { %7529 = vmatprep.mubr.msk.bf16.mxu0 %vm284_vm0, %v8020_v32  ;;  %v8024_v32 = vld [vmem:[%s11379_s1 + $0x150] sm:$0xff]  }
  0xda   :  { %4322 = vperm.xlu1 %7948, %v6778_v36   ;;  %4317 = vperm.xlu0 %7947, %v6777_v37   ;;  %v7253_v40 = vpop.f32.mrb[0].mxu0  ;;  %v9000_v36 = vpop.permute.xlu1 %2172 }
  0xdb   :  { %v415_v42 = vpop.f32.mrb[1].mxu0  ;;  %v743_v5 = vmul.f32 %v7253_v40, %v7253_v40 }
  0xdc   :  { %v7254_v47 = vpop.f32.mrb[2].mxu0  ;;  %v741_v55 = vmul.f32 %v415_v42, %v415_v42 }
  0xdd   :  { %v418_v52 = vpop.f32.mrb[3].mxu0  ;;  %v744_v11 = vmul.f32 %v7254_v47, %v7254_v47 }
  0xde   :  { %4332 = vperm.xlu1 %7948, %v6780_v44   ;;  %4327 = vperm.xlu0 %7947, %v6779_v45   ;;  %v670_v57 = vadd.f32 %v418_v52, %v415_v42  ;;  %v742_v61 = vmul.f32 %v418_v52, %v418_v52 }
  0xdf   :  { %7530 = vmatmul.mubr.msk.bf16.gmra.mrb[108].mxu0 %vm284_vm0, %v8021_v46 }
  0xe0   :  { %7567 = vmatprep.mubr.msk.bf16.mxu0 %vm284_vm0, %v8022_v50  ;;  %v671_v3 = vadd.f32 %v7253_v40, %v670_v57  ;;  %v805_v6 = vadd.f32 %v742_v61, %v741_v55  ;;  %v6841_v50 = vld [vmem:[%s11380_s2 + $0x3a0] sm:$0xff]  ;;  %v9012_v61 = vpop.permute.xlu0 %2167 }
  0xe2   :  { %4787 = vperm.xlu1 %7948, %v6838_v62   ;;  %4782 = vperm.xlu0 %7947, %v6837_v4   ;;  %v7257_v9 = vpop.f32.mrb[4].mxu0  ;;  %v806_v15 = vadd.f32 %v805_v6, %v743_v5  ;;  %v672_v17 = vadd.f32 %v7254_v47, %v671_v3  ;;  %v6842_v47 = vld [vmem:[%s11380_s2 + $0x3a8] sm:$0xff]  ;;  %v9014_v4 = vpop.permute.xlu1 %2182 }
  0xe3   :  { %v431_v16 = vpop.f32.mrb[5].mxu0  ;;  %v747_v52 = vmul.f32 %v7257_v9, %v7257_v9  ;;  %11497 = vst [vmem:[#allocation20_spill] sm:$0xff] %v9014_v4 }
  0xe4   :  { %v745_v29 = vmul.f32 %v431_v16, %v431_v16  ;;  %v7258_v31 = vpop.f32.mrb[6].mxu0  ;;  %v673_v37 = vadd.f32 %v672_v17, %v431_v16  ;;  %v807_v40 = vadd.f32 %v806_v15, %v744_v11  ;;  %v6844_v15 = vld [vmem:[%s11380_s2 + $0x3b8] sm:$0xff]  ;;  %v9117_v33 = vpop.f32.mrb[0].mxu1 }
  0xe5   :  { %v434_v42 = vpop.f32.mrb[7].mxu0  ;;  %v748_v5 = vmul.f32 %v7258_v31, %v7258_v31  ;;  %v8025_v16 = vld [vmem:[%s11379_s1 + $0x158] sm:$0xff]  }
  0xe6   :  { %4797 = vperm.xlu1 %7948, %v6840_v18   ;;  %4792 = vperm.xlu0 %7947, %v6839_v23   ;;  %v808_v44 = vadd.f32 %v807_v40, %v745_v29  ;;  %v674_v45 = vadd.f32 %v673_v37, %v434_v42  ;;  %v746_v46 = vmul.f32 %v434_v42, %v434_v42  ;;  %v8026_v23 = vld [vmem:[%s11379_s1 + $0x160] sm:$0xff]   ;;  %v6846_v42 = vld [vmem:[%s11380_s2 + $0x3c8] sm:$0xff] }
  0xe7   :  { %7568 = vmatmul.mubr.msk.bf16.vlgmr.msra.gmra.mrb[112].mxu0 %vm284_vm0, %v8023_v24 }
  0xe8   :  { %7571 = vmatprep.mubr.msk.bf16.mxu0 %vm284_vm0, %v8024_v32  ;;  %7616 = vmatpush3.bf16.msra.mxu0 %v8802_v34  ;;  %v675_v55 = vadd.f32 %v7257_v9, %v674_v45  ;;  %v809_v57 = vadd.f32 %v808_v44, %v746_v46  ;;  %v6843_v9 = vld [vmem:[%s11380_s2 + $0x3b0] sm:$0xff]  ;;  %v6845_v44 = vld [vmem:[%s11380_s2 + $0x3c0] sm:$0xff]  ;;  %v9035_v45 = vpop.permute.xlu0 %2177  ;;  %v9038_v46 = vpop.permute.xlu1 %2192 }
  0xe9   :  { %7665 = vmatprep.subr.bf16.mxu0 %v8802_v34  ;;  %11498 = vst [vmem:[#allocation21_spill] sm:$0xff] %v9035_v45  ;;  %11499 = vst [vmem:[#allocation22_spill] sm:$0xff] %v9038_v46 }
  0xea   :  { %4807 = vperm.xlu1 %7948, %v6842_v47   ;;  %4802 = vperm.xlu0 %7947, %v6841_v50   ;;  %v7261_v62 = vpop.f32.mrb[8].mxu0  ;;  %v810_v3 = vadd.f32 %v809_v57, %v747_v52  ;;  %v676_v11 = vadd.f32 %v7258_v31, %v675_v55 }
  0xeb   :  { %v447_v6 = vpop.f32.mrb[9].mxu0  ;;  %v751_v47 = vmul.f32 %v7261_v62, %v7261_v62 }
  0xec   :  { %v749_v17 = vmul.f32 %v447_v6, %v447_v6  ;;  %v7262_v18 = vpop.f32.mrb[10].mxu0  ;;  %v677_v24 = vadd.f32 %v676_v11, %v447_v6  ;;  %v811_v29 = vadd.f32 %v810_v3, %v748_v5  ;;  %v6848_v11 = vld [vmem:[%s11380_s2 + $0x3d8] sm:$0xff] }
  0xed   :  { %v450_v31 = vpop.f32.mrb[11].mxu0  ;;  %v752_v57 = vmul.f32 %v7262_v18, %v7262_v18 }
  0xee   :  { %4817 = vperm.xlu1 %7948, %v6844_v15   ;;  %4812 = vperm.xlu0 %7947, %v6843_v9   ;;  %v812_v32 = vadd.f32 %v811_v29, %v749_v17  ;;  %v678_v37 = vadd.f32 %v677_v24, %v450_v31  ;;  %v750_v40 = vmul.f32 %v450_v31, %v450_v31  ;;  %v6847_v15 = vld [vmem:[%s11380_s2 + $0x3d0] sm:$0xff]  ;;  %v9055_v29 = vpop.permute.xlu0 %2187 }
  0xef   :  { %7572 = vmatmul.mubr.msk.bf16.gmra.mrb[116].mxu0 %vm284_vm0, %v8025_v16  ;;  %v8028_v17 = vld [vmem:[%s11379_s1 + $0x170] sm:$0xff]  }
  0xf0   :  { %7575 = vmatprep.mubr.msk.bf16.mxu0 %vm284_vm0, %v8026_v23  ;;  %v679_v50 = vadd.f32 %v7261_v62, %v678_v37  ;;  %v813_v52 = vadd.f32 %v812_v32, %v750_v40  ;;  %v8027_v62 = vld [vmem:[%s11379_s1 + $0x168] sm:$0xff]   ;;  %v9057_v32 = vpop.permute.xlu1 %2202 }
  0xf1   :  { %11500 = vst [vmem:[#allocation23_spill] sm:$0xff] %v9057_v32 }
  0xf2   :  { %4827 = vperm.xlu1 %7948, %v6846_v42   ;;  %4822 = vperm.xlu0 %7947, %v6845_v44   ;;  %v7265_v55 = vpop.f32.mrb[12].mxu0  ;;  %v814_v5 = vadd.f32 %v813_v52, %v751_v47  ;;  %v680_v6 = vadd.f32 %v7262_v18, %v679_v50  ;;  %v8054_v18 = vld [vmem:[%s11382_s4 + $0x40] sm:$0xff]   ;;  %v6850_v44 = vld [vmem:[%s11380_s2 + $0x3e8] sm:$0xff] }
  0xf3   :  { %v463_v3 = vpop.f32.mrb[13].mxu0  ;;  %v6849_v47 = vld [vmem:[%s11380_s2 + $0x3e0] sm:$0xff]  ;;  %7351 = vmatprep.subr.bf16.mxu1 %v8054_v18  ;;  %v755_v50 = vmul.f32 %v7265_v55, %v7265_v55 }
  0xf4   :  { %v753_v9 = vmul.f32 %v463_v3, %v463_v3  ;;  %v7266_v16 = vpop.f32.mrb[14].mxu0  ;;  %v681_v23 = vadd.f32 %v680_v6, %v463_v3  ;;  %v815_v24 = vadd.f32 %v814_v5, %v752_v57  ;;  %7352 = vmatpush3.bf16.msra.mxu1 %v8054_v18 }
  0xf5   :  { %v466_v31 = vpop.f32.mrb[15].mxu0  ;;  %v756_v3 = vmul.f32 %v7266_v16, %v7266_v16 }
  0xf6   :  { %4837 = vperm.xlu1 %7948, %v6848_v11   ;;  %4832 = vperm.xlu0 %7947, %v6847_v15   ;;  %v816_v37 = vadd.f32 %v815_v24, %v753_v9  ;;  %v682_v40 = vadd.f32 %v681_v23, %v466_v31  ;;  %v754_v42 = vmul.f32 %v466_v31, %v466_v31  ;;  %v6851_v9 = vld [vmem:[%s11380_s2 + $0x3f0] sm:$0xff]  ;;  %v9081_v24 = vpop.permute.xlu1 %2212 }
  0xf7   :  { %7576 = vmatmul.mubr.msk.bf16.gmra.mrb[120].mxu0 %vm284_vm0, %v8027_v62  ;;  %v6852_v62 = vld [vmem:[%s11380_s2 + $0x3f8] sm:$0xff]  ;;  %11502 = vst [vmem:[#allocation25_spill] sm:$0xff] %v9081_v24 }
  0xf8   :  { %7579 = vmatprep.mubr.msk.bf16.mxu0 %vm284_vm0, %v8028_v17  ;;  %v683_v52 = vadd.f32 %v7265_v55, %v682_v40  ;;  %v817_v57 = vadd.f32 %v816_v37, %v754_v42  ;;  %v8029_v55 = vld [vmem:[%s11379_s1 + $0x178] sm:$0xff]   ;;  %v9076_v17 = vpop.permute.xlu0 %2197 }
  0xf9   :  { %11501 = vst [vmem:[#allocation24_spill] sm:$0xff] %v9076_v17 }
  0xfa   :  { %4847 = vperm.xlu1 %7948, %v6850_v44   ;;  %4842 = vperm.xlu0 %7947, %v6849_v47   ;;  %v7269_v5 = vpop.f32.mrb[16].mxu0  ;;  %v818_v6 = vadd.f32 %v817_v57, %v755_v50  ;;  %v684_v15 = vadd.f32 %v7266_v16, %v683_v52  ;;  %v8030_v16 = vld [vmem:[%s11379_s1 + $0x180] sm:$0xff]   ;;  %v6910_v50 = vld [vmem:[%s11380_s2 + $0x408] sm:$0xff] }
  0xfb   :  { %v479_v11 = vpop.f32.mrb[17].mxu0  ;;  %v6909_v52 = vld [vmem:[%s11380_s2 + $0x400] sm:$0xff]  ;;  %v759_v57 = vmul.f32 %v7269_v5, %v7269_v5 }
  0xfc   :  { %v757_v18 = vmul.f32 %v479_v11, %v479_v11  ;;  %v7270_v23 = vpop.f32.mrb[18].mxu0  ;;  %v685_v31 = vadd.f32 %v684_v15, %v479_v11  ;;  %v819_v37 = vadd.f32 %v818_v6, %v756_v3  ;;  %v9091_v11 = vpop.permute.xlu0 %2207 }
  0xfd   :  { %v482_v40 = vpop.f32.mrb[19].mxu0  ;;  %11503 = vst [vmem:[#allocation26_spill] sm:$0xff] %v9091_v11 }
  0xfe   :  { %4857 = vperm.xlu1 %7948, %v6852_v62   ;;  %4852 = vperm.xlu0 %7947, %v6851_v9   ;;  %v820_v42 = vadd.f32 %v819_v37, %v757_v18  ;;  %v686_v44 = vadd.f32 %v685_v31, %v482_v40  ;;  %v758_v47 = vmul.f32 %v482_v40, %v482_v40  ;;  %v8055_v62 = vld [vmem:[%s11382_s4 + $0x48] sm:$0xff]   ;;  %v9096_v9 = vpop.permute.xlu1 %2222 }
  0xff   :  { %7580 = vmatmul.mubr.msk.bf16.gmra.mrb[124].mxu0 %vm284_vm0, %v8029_v55  ;;  %11504 = vst [vmem:[#allocation27_spill] sm:$0xff] %v9096_v9  ;;  %v760_v55 = vmul.f32 %v7270_v23, %v7270_v23  ;;  %v8031_v40 = vld [vmem:[%s11379_s1 + $0x188] sm:$0xff]   ;;  %7353 = vmatprep.subr.bf16.mxu1 %v8055_v62 }
 0x100   :  { %7617 = vmatprep.mubr.msk.bf16.mxu0 %vm284_vm0, %v8030_v16  ;;  %v687_v3 = vadd.f32 %v7269_v5, %v686_v44  ;;  %v821_v6 = vadd.f32 %v820_v42, %v758_v47  ;;  %v6912_v5 = vld [vmem:[%s11380_s2 + $0x418] sm:$0xff]  ;;  %v6911_v16 = vld [vmem:[%s11380_s2 + $0x410] sm:$0xff]  ;;  %7354 = vmatpush3.bf16.msra.mxu1 %v8055_v62  ;;  %v9121_v62 = vpop.f32.mrb[1].mxu1 }
 0x101   :  { %v8032_v47 = vld [vmem:[%s11379_s1 + $0x190] sm:$0xff]  }
 0x102   :  { %5312 = vperm.xlu1 %7948, %v6910_v50   ;;  %5307 = vperm.xlu0 %7947, %v6909_v52   ;;  %v7273_v15 = vpop.f32.mrb[20].mxu0  ;;  %v822_v18 = vadd.f32 %v821_v6, %v759_v57  ;;  %v688_v37 = vadd.f32 %v7270_v23, %v687_v3 }
 0x103   :  { %v495_v31 = vpop.f32.mrb[21].mxu0 }
 0x104   :  { %v761_v42 = vmul.f32 %v495_v31, %v495_v31  ;;  %v7274_v44 = vpop.f32.mrb[22].mxu0  ;;  %v689_v23 = vadd.f32 %v688_v37, %v495_v31  ;;  %v823_v50 = vadd.f32 %v822_v18, %v760_v55  ;;  %v9123_v55 = vpop.permute.xlu0 %2217  ;;  %v763_v31 = vmul.f32 %v7273_v15, %v7273_v15 }
 0x105   :  { %v498_v52 = vpop.f32.mrb[23].mxu0  ;;  %11505 = vst [vmem:[#allocation28_spill] sm:$0xff] %v9123_v55  ;;  %v9125_v18 = vpop.permute.xlu1 %2232  ;;  %v6920_v55 = vld [vmem:[%s11380_s2 + $0x458] sm:$0xff] }
 0x106   :  { %5322 = vperm.xlu1 %7948, %v6912_v5   ;;  %5317 = vperm.xlu0 %7947, %v6911_v16   ;;  %v824_v57 = vadd.f32 %v823_v50, %v761_v42  ;;  %v690_v3 = vadd.f32 %v689_v23, %v498_v52  ;;  %v762_v6 = vmul.f32 %v498_v52, %v498_v52  ;;  %v6916_v52 = vld [vmem:[%s11380_s2 + $0x438] sm:$0xff] }
 0x107   :  { %7618 = vmatmul.mubr.msk.bf16.vlgmr.msra.gmra.mrb[128].mxu0 %vm284_vm0, %v8031_v40  ;;  %11506 = vst [vmem:[#allocation29_spill] sm:$0xff] %v9125_v18  ;;  %v9128_v40 = vpop.f32.mrb[2].mxu1  ;;  %v764_v42 = vmul.f32 %v7274_v44, %v7274_v44 }
 0x108   :  { %7621 = vmatprep.mubr.msk.bf16.mxu0 %vm284_vm0, %v8032_v47  ;;  %7666 = vmatpush3.bf16.msra.mxu0 %v8802_v34  ;;  %v691_v37 = vadd.f32 %v7273_v15, %v690_v3  ;;  %v825_v5 = vadd.f32 %v824_v57, %v762_v6  ;;  %v6915_v15 = vld [vmem:[%s11380_s2 + $0x430] sm:$0xff] }
 0x109   :  { %7715 = vmatprep.subr.bf16.mxu0 %v8802_v34  ;;  %v9139_v34 = vpop.f32.mrb[3].mxu1 }
 0x10a   :  { %5332 = vperm.xlu1 %7948, %v6914_v30   ;;  %5327 = vperm.xlu0 %7947, %v6913_v35   ;;  %v7277_v16 = vpop.f32.mrb[24].mxu0  ;;  %v826_v47 = vadd.f32 %v825_v5, %v763_v31  ;;  %v692_v50 = vadd.f32 %v7274_v44, %v691_v37  ;;  %v8033_v30 = vld [vmem:[%s11379_s1 + $0x198] sm:$0xff]   ;;  %v8034_v44 = vld [vmem:[%s11379_s1 + $0x1a0] sm:$0xff]   ;;  %v8056_v37 = vld [vmem:[%s11382_s4 + $0x50] sm:$0xff]  }
 0x10b   :  { %v511_v23 = vpop.f32.mrb[25].mxu0  ;;  %7355 = vmatprep.subr.bf16.mxu1 %v8056_v37 }
 0x10c   :  { %v765_v35 = vmul.f32 %v511_v23, %v511_v23  ;;  %v7278_v57 = vpop.f32.mrb[26].mxu0  ;;  %v693_v3 = vadd.f32 %v692_v50, %v511_v23  ;;  %v827_v6 = vadd.f32 %v826_v47, %v764_v42  ;;  %v6917_v42 = vld [vmem:[%s11380_s2 + $0x440] sm:$0xff]  ;;  %v9154_v47 = vpop.f32.mrb[4].mxu1  ;;  %7356 = vmatpush3.bf16.msra.mxu1 %v8056_v37 }
 0x10d   :  { %v514_v31 = vpop.f32.mrb[27].mxu0  ;;  %v9157_v23 = vpop.f32.mrb[5].mxu1 }
 0x10e   :  { %5342 = vperm.xlu1 %7948, %v6916_v52   ;;  %5337 = vperm.xlu0 %7947, %v6915_v15   ;;  %v828_v5 = vadd.f32 %v827_v6, %v765_v35  ;;  %v694_v41 = vadd.f32 %v693_v3, %v514_v31  ;;  %v766_v9 = vmul.f32 %v514_v31, %v514_v31  ;;  %v9159_v50 = vpop.permute.xlu0 %2227  ;;  %v9161_v52 = vpop.permute.xlu1 %2687 }
 0x10f   :  { %7622 = vmatmul.mubr.msk.bf16.gmra.mrb[132].mxu0 %vm284_vm0, %v8033_v30  ;;  %11507 = vst [vmem:[#allocation30_spill] sm:$0xff] %v9159_v50  ;;  %11508 = vst [vmem:[#allocation31_spill] sm:$0xff] %v9161_v52  ;;  %v767_v15 = vmul.f32 %v7277_v16, %v7277_v16  ;;  %v9163_v6 = vpop.f32.mrb[6].mxu1  ;;  %v768_v31 = vmul.f32 %v7278_v57, %v7278_v57  ;;  %v6919_v52 = vld [vmem:[%s11380_s2 + $0x450] sm:$0xff]  ;;  %v6921_v50 = vld [vmem:[%s11380_s2 + $0x460] sm:$0xff] }
 0x110   :  { %7625 = vmatprep.mubr.msk.bf16.mxu0 %vm284_vm0, %v8034_v44  ;;  %v695_v30 = vadd.f32 %v7277_v16, %v694_v41  ;;  %v829_v35 = vadd.f32 %v828_v5, %v766_v9  ;;  %v9174_v41 = vpop.f32.mrb[7].mxu1 }
 0x111   :  { %v9186_v28 = vpop.f32.mrb[8].mxu1 }
 0x112   :  { %5352 = vperm.xlu1 %7948, %v6918_v14   ;;  %5347 = vperm.xlu0 %7947, %v6917_v42   ;;  %v7281_v3 = vpop.f32.mrb[28].mxu0  ;;  %v830_v18 = vadd.f32 %v829_v35, %v767_v15  ;;  %v696_v44 = vadd.f32 %v7278_v57, %v695_v30  ;;  %v8035_v14 = vld [vmem:[%s11379_s1 + $0x1a8] sm:$0xff]   ;;  %v8036_v57 = vld [vmem:[%s11379_s1 + $0x1b0] sm:$0xff]  }
 0x113   :  { %v527_v22 = vpop.f32.mrb[29].mxu0 }
 0x114   :  { %v769_v9 = vmul.f32 %v527_v22, %v527_v22  ;;  %v7282_v16 = vpop.f32.mrb[30].mxu0  ;;  %v697_v37 = vadd.f32 %v696_v44, %v527_v22  ;;  %v831_v5 = vadd.f32 %v830_v18, %v768_v31  ;;  %v9189_v22 = vpop.f32.mrb[9].mxu1 }
 0x115   :  { %v530_v42 = vpop.f32.mrb[31].mxu0  ;;  %v9193_v18 = vpop.permute.xlu1 %2697 }
 0x116   :  { %5362 = vperm.xlu1 %7948, %v6920_v55   ;;  %5357 = vperm.xlu0 %7947, %v6919_v52   ;;  %v832_v15 = vadd.f32 %v831_v5, %v769_v9  ;;  %v698_v30 = vadd.f32 %v697_v37, %v530_v42  ;;  %v770_v35 = vmul.f32 %v530_v42, %v530_v42  ;;  %v9191_v55 = vpop.permute.xlu0 %2682  ;;  %v8037_v9 = vld [vmem:[%s11379_s1 + $0x1b8] sm:$0xff]   ;;  %v9198_v37 = vpop.f32.mrb[10].mxu1 }
 0x117   :  { %7626 = vmatmul.mubr.msk.bf16.gmra.mrb[136].mxu0 %vm284_vm0, %v8035_v14  ;;  %11509 = vst [vmem:[#allocation32_spill] sm:$0xff] %v9191_v55  ;;  %11510 = vst [vmem:[#allocation33_spill] sm:$0xff] %v9193_v18  ;;  %v771_v52 = vmul.f32 %v7281_v3, %v7281_v3  ;;  %v772_v5 = vmul.f32 %v7282_v16, %v7282_v16  ;;  %v6924_v18 = vld [vmem:[%s11380_s2 + $0x478] sm:$0xff] }
 0x118   :  { %7629 = vmatprep.mubr.msk.bf16.mxu0 %vm284_vm0, %v8036_v57  ;;  %v699_v31 = vadd.f32 %v7281_v3, %v698_v30  ;;  %v833_v44 = vadd.f32 %v832_v15, %v770_v35  ;;  %v8057_v3 = vld [vmem:[%s11382_s4 + $0x58] sm:$0xff]  }
 0x119   :  { %7357 = vmatprep.subr.bf16.mxu1 %v8057_v3 }
 0x11a   :  { %5372 = vperm.xlu1 %7948, %v6922_v21   ;;  %5367 = vperm.xlu0 %7947, %v6921_v50   ;;  %v7285_v14 = vpop.f32.mrb[32].mxu0  ;;  %v834_v57 = vadd.f32 %v833_v44, %v771_v52  ;;  %v700_v32 = vadd.f32 %v7282_v16, %v699_v31  ;;  %v6923_v21 = vld [vmem:[%s11380_s2 + $0x470] sm:$0xff]  ;;  %v9206_v50 = vpop.f32.mrb[11].mxu1  ;;  %v8038_v16 = vld [vmem:[%s11379_s1 + $0x1c0] sm:$0xff]  }
 0x11b   :  { %v543_v42 = vpop.f32.mrb[33].mxu0  ;;  %v9215_v24 = vpop.f32.mrb[12].mxu1  ;;  %7358 = vmatpush3.bf16.msra.mxu1 %v8057_v3  ;;  %v8039_v3 = vld [vmem:[%s11379_s1 + $0x1c8] sm:$0xff]  }
 0x11c   :  { %v773_v15 = vmul.f32 %v543_v42, %v543_v42  ;;  %v7286_v30 = vpop.f32.mrb[34].mxu0  ;;  %v701_v35 = vadd.f32 %v700_v32, %v543_v42  ;;  %v835_v52 = vadd.f32 %v834_v57, %v772_v5  ;;  %v9218_v8 = vpop.f32.mrb[13].mxu1  ;;  %v775_v5 = vmul.f32 %v7285_v14, %v7285_v14 }
 0x11d   :  { %v546_v31 = vpop.f32.mrb[35].mxu0  ;;  %v9220_v17 = vpop.permute.xlu0 %2692 }
 0x11e   :  { %5382 = vperm.xlu1 %7948, %v6924_v18   ;;  %5377 = vperm.xlu0 %7947, %v6923_v21   ;;  %v836_v44 = vadd.f32 %v835_v52, %v773_v15  ;;  %v702_v55 = vadd.f32 %v701_v35, %v546_v31  ;;  %v774_v2 = vmul.f32 %v546_v31, %v546_v31  ;;  %v9222_v32 = vpop.permute.xlu1 %2707  ;;  %v9224_v21 = vpop.f32.mrb[14].mxu1 }
 0x11f   :  { %7630 = vmatmul.mubr.msk.bf16.gmra.mrb[140].mxu0 %vm284_vm0, %v8037_v9  ;;  %11511 = vst [vmem:[#allocation34_spill] sm:$0xff] %v9220_v17  ;;  %11512 = vst [vmem:[#allocation35_spill] sm:$0xff] %v9222_v32  ;;  %v776_v15 = vmul.f32 %v7286_v30, %v7286_v30 }
 0x120   :  { %7667 = vmatprep.mubr.msk.bf16.mxu0 %vm284_vm0, %v8038_v16  ;;  %v703_v57 = vadd.f32 %v7285_v14, %v702_v55  ;;  %v837_v18 = vadd.f32 %v836_v44, %v774_v2  ;;  %v9229_v16 = vpop.f32.mrb[15].mxu1  ;;  %v8040_v55 = vld [vmem:[%s11379_s1 + $0x1d0] sm:$0xff]  }
 0x122   :  { %v7289_v42 = vpop.f32.mrb[36].mxu0  ;;  %v838_v35 = vadd.f32 %v837_v18, %v775_v5  ;;  %v704_v52 = vadd.f32 %v7286_v30, %v703_v57  ;;  %v9235_v30 = vpop.f32.mrb[16].mxu1  ;;  %v8058_v57 = vld [vmem:[%s11382_s4 + $0x60] sm:$0xff]  }
 0x123   :  { %v559_v9 = vpop.f32.mrb[37].mxu0  ;;  %v8144_v18 = vld [vmem:[%s11381_s3] sm:$0xff]   ;;  %7359 = vmatprep.subr.bf16.mxu1 %v8058_v57 }
 0x124   :  { %v777_v31 = vmul.f32 %v559_v9, %v559_v9  ;;  %v7290_v17 = vpop.f32.mrb[38].mxu0  ;;  %v705_v2 = vadd.f32 %v704_v52, %v559_v9  ;;  %v839_v14 = vadd.f32 %v838_v35, %v776_v15  ;;  %v9244_v15 = vpop.f32.mrb[17].mxu1  ;;  %v779_v52 = vmul.f32 %v7289_v42, %v7289_v42  ;;  %7360 = vmatpush3.bf16.msra.mxu1 %v8058_v57 }
 0x125   :  { %v562_v44 = vpop.f32.mrb[39].mxu0  ;;  %v9246_v35 = vpop.permute.xlu0 %2702 }
 0x126   :  { %v840_v32 = vadd.f32 %v839_v14, %v777_v31  ;;  %v706_v7 = vadd.f32 %v705_v2, %v562_v44  ;;  %v778_v5 = vmul.f32 %v562_v44, %v562_v44  ;;  %11513 = vst [vmem:[#allocation36_spill] sm:$0xff] %v9246_v35  ;;  %v9248_v9 = vpop.permute.xlu1 %2717  ;;  %v9250_v14 = vpop.f32.mrb[18].mxu1 }
 0x127   :  { %7668 = vmatmul.mubr.msk.bf16.vlgmr.msra.gmra.mrb[144].mxu0 %vm284_vm0, %v8039_v3  ;;  %11514 = vst [vmem:[#allocation37_spill] sm:$0xff] %v9248_v9  ;;  %11515 = vst [vmem:[#allocation38_spill] sm:$0xff] %v9250_v14  ;;  %v9255_v4 = vpop.f32.mrb[19].mxu1 }
 0x128   :  { %7671 = vmatprep.mubr.msk.bf16.mxu0 %vm284_vm0, %v8040_v55  ;;  %7716 = vmatpush3.bf16.msra.mxu0 %v8144_v18  ;;  %v707_v3 = vadd.f32 %v7289_v42, %v706_v7  ;;  %v841_v31 = vadd.f32 %v840_v32, %v778_v5  ;;  %v780_v55 = vmul.f32 %v7290_v17, %v7290_v17  ;;  %v8041_v18 = vld [vmem:[%s11379_s1 + $0x1d8] sm:$0xff]   ;;  %v8042_v7 = vld [vmem:[%s11379_s1 + $0x1e0] sm:$0xff]  }
 0x129   :  { %11516 = vst [vmem:[#allocation39_spill] sm:$0xff] %v9255_v4 }
 0x12a   :  { %v7293_v2 = vpop.f32.mrb[40].mxu0  ;;  %v842_v44 = vadd.f32 %v841_v31, %v779_v52  ;;  %v708_v13 = vadd.f32 %v7290_v17, %v707_v3  ;;  %v9261_v17 = vpop.f32.mrb[20].mxu1 }
 0x12b   :  { %v575_v11 = vpop.f32.mrb[41].mxu0  ;;  %11517 = vst [vmem:[#allocation40_spill] sm:$0xff] %v9261_v17  ;;  %v9264_v3 = vpop.f32.mrb[21].mxu1  ;;  %v783_v60 = vmul.f32 %v7293_v2, %v7293_v2 }
 0x12c   :  { %v781_v35 = vmul.f32 %v575_v11, %v575_v11  ;;  %v7294_v9 = vpop.f32.mrb[42].mxu0  ;;  %v709_v32 = vadd.f32 %v708_v13, %v575_v11  ;;  %v843_v42 = vadd.f32 %v842_v44, %v780_v55  ;;  %11518 = vst [vmem:[#allocation41_spill] sm:$0xff] %v9264_v3  ;;  %v9266_v31 = vpop.permute.xlu0 %2712 }
 0x12d   :  { %v578_v5 = vpop.f32.mrb[43].mxu0  ;;  %11519 = vst [vmem:[#allocation42_spill] sm:$0xff] %v9266_v31  ;;  %v9268_v46 = vpop.permute.xlu1 %2727  ;;  %v784_v44 = vmul.f32 %v7294_v9, %v7294_v9 }
 0x12e   :  { %v844_v57 = vadd.f32 %v843_v42, %v781_v35  ;;  %v710_v1 = vadd.f32 %v709_v32, %v578_v5  ;;  %v782_v52 = vmul.f32 %v578_v5, %v578_v5  ;;  %11520 = vst [vmem:[#allocation43_spill] sm:$0xff] %v9268_v46  ;;  %v9270_v55 = vpop.f32.mrb[22].mxu1  ;;  %v8059_v35 = vld [vmem:[%s11382_s4 + $0x68] sm:$0xff]  }
 0x12f   :  { %7672 = vmatmul.mubr.msk.bf16.gmra.mrb[148].mxu0 %vm284_vm0, %v8041_v18  ;;  %11521 = vst [vmem:[#allocation44_spill] sm:$0xff] %v9270_v55  ;;  %v8043_v42 = vld [vmem:[%s11379_s1 + $0x1e8] sm:$0xff]   ;;  %v9278_v5 = vpop.f32.mrb[23].mxu1  ;;  %7361 = vmatprep.subr.bf16.mxu1 %v8059_v35 }
 0x130   :  { %7675 = vmatprep.mubr.msk.bf16.mxu0 %vm284_vm0, %v8042_v7  ;;  %v711_v45 = vadd.f32 %v7293_v2, %v710_v1  ;;  %v845_v13 = vadd.f32 %v844_v57, %v782_v52  ;;  %11522 = vst [vmem:[#allocation45_spill] sm:$0xff] %v9278_v5  ;;  %v8044_v2 = vld [vmem:[%s11379_s1 + $0x1f0] sm:$0xff]   ;;  %7362 = vmatpush3.bf16.msra.mxu1 %v8059_v35  ;;  %v9287_v5 = vpop.f32.mrb[24].mxu1  ;;  %v9289_v55 = vpop.permute.xlu0 %2722 }
 0x131   :  { %11523 = vst [vmem:[#allocation46_spill] sm:$0xff] %v9287_v5  ;;  %11524 = vst [vmem:[#allocation47_spill] sm:$0xff] %v9289_v55  ;;  %v9292_v3 = vpop.f32.mrb[25].mxu1  ;;  %v9294_v35 = vpop.permute.xlu1 %2737  ;;  %v8045_v55 = vld [vmem:[%s11379_s1 + $0x1f8] sm:$0xff]  }
 0x132   :  { %v7297_v11 = vpop.f32.mrb[44].mxu0  ;;  %v846_v18 = vadd.f32 %v845_v13, %v783_v60  ;;  %v712_v7 = vadd.f32 %v7294_v9, %v711_v45  ;;  %v8060_v60 = vld [vmem:[%s11382_s4 + $0x70] sm:$0xff]   ;;  %11525 = vst [vmem:[#allocation48_spill] sm:$0xff] %v9292_v3  ;;  %11526 = vst [vmem:[#allocation49_spill] sm:$0xff] %v9294_v35 }
 0x133   :  { %v591_v32 = vpop.f32.mrb[45].mxu0  ;;  %7363 = vmatprep.subr.bf16.mxu1 %v8060_v60 }
 0x134   :  { %v785_v46 = vmul.f32 %v591_v32, %v591_v32  ;;  %v7298_v1 = vpop.f32.mrb[46].mxu0  ;;  %v713_v57 = vadd.f32 %v712_v7, %v591_v32  ;;  %v847_v52 = vadd.f32 %v846_v18, %v784_v44  ;;  %v787_v44 = vmul.f32 %v7297_v11, %v7297_v11  ;;  %7364 = vmatpush3.bf16.msra.mxu1 %v8060_v60  ;;  %v9296_v7 = vpop.f32.mrb[26].mxu1  ;;  %v8046_v60 = vld [vmem:[%s11379_s1 + $0x200] sm:$0xff]  }
 0x135   :  { %v594_v31 = vpop.f32.mrb[47].mxu0  ;;  %11527 = vst [vmem:[#allocation50_spill] sm:$0xff] %v9296_v7  ;;  %v9304_v35 = vpop.f32.mrb[27].mxu1 }
 0x136   :  { %v848_v45 = vadd.f32 %v847_v52, %v785_v46  ;;  %v714_v9 = vadd.f32 %v713_v57, %v594_v31  ;;  %v786_v13 = vmul.f32 %v594_v31, %v594_v31  ;;  %v8061_v31 = vld [vmem:[%s11382_s4 + $0x78] sm:$0xff]   ;;  %11528 = vst [vmem:[#allocation51_spill] sm:$0xff] %v9304_v35  ;;  %v9309_v7 = vpop.permute.xlu0 %2732  ;;  %v9317_v3 = vpop.f32.mrb[28].mxu1 }
 0x137   :  { %7676 = vmatmul.mubr.msk.bf16.gmra.mrb[152].mxu0 %vm284_vm0, %v8043_v42  ;;  %v788_v42 = vmul.f32 %v7298_v1, %v7298_v1  ;;  %7365 = vmatprep.subr.bf16.mxu1 %v8061_v31  ;;  %11529 = vst [vmem:[#allocation52_spill] sm:$0xff] %v9309_v7  ;;  %11531 = vst [vmem:[#allocation54_spill] sm:$0xff] %v9317_v3 }
 0x138   :  { %7679 = vmatprep.mubr.msk.bf16.mxu0 %vm284_vm0, %v8044_v2  ;;  %v715_v18 = vadd.f32 %v7297_v11, %v714_v9  ;;  %v849_v32 = vadd.f32 %v848_v45, %v786_v13  ;;  %7366 = vmatpush3.bf16.msra.mxu1 %v8061_v31  ;;  %v9323_v31 = vpop.permute.xlu1 %2747 }
 0x139   :  { %11533 = vst [vmem:[#allocation56_spill] sm:$0xff] %v9323_v31 }
 0x13a   :  { %v7301_v46 = vpop.f32.mrb[48].mxu0  ;;  %v850_v57 = vadd.f32 %v849_v32, %v787_v44  ;;  %v716_v2 = vadd.f32 %v7298_v1, %v715_v18  ;;  %v9314_v1 = vld [vmem:[%s11382_s4] sm:$0xff]  }
 0x13b   :  { %v607_v52 = vpop.f32.mrb[49].mxu0  ;;  %11530 = vst [vmem:[#allocation53_spill] sm:$0xff] %v9314_v1  ;;  %7383 = vmatprep.subr.bf16.mxu1 %v9314_v1 }
 0x13c   :  { %v789_v11 = vmul.f32 %v607_v52, %v607_v52  ;;  %v7302_v45 = vpop.f32.mrb[50].mxu0  ;;  %v717_v9 = vadd.f32 %v716_v2, %v607_v52  ;;  %v851_v13 = vadd.f32 %v850_v57, %v788_v42  ;;  %v9320_v52 = vpop.f32.mrb[29].mxu1  ;;  %v791_v42 = vmul.f32 %v7301_v46, %v7301_v46 }
 0x13d   :  { %v610_v44 = vpop.f32.mrb[51].mxu0  ;;  %11532 = vst [vmem:[#allocation55_spill] sm:$0xff] %v9320_v52  ;;  %v9325_v5 = vpop.f32.mrb[30].mxu1 }
 0x13e   :  { %v852_v18 = vadd.f32 %v851_v13, %v789_v11  ;;  %v718_v32 = vadd.f32 %v717_v9, %v610_v44  ;;  %v790_v35 = vmul.f32 %v610_v44, %v610_v44  ;;  %11534 = vst [vmem:[#allocation57_spill] sm:$0xff] %v9325_v5  ;;  %v792_v11 = vmul.f32 %v7302_v45, %v7302_v45  ;;  %v9330_v44 = vpop.f32.mrb[31].mxu1  ;;  %v9332_v52 = vpop.permute.xlu0 %2742 }
 0x13f   :  { %7680 = vmatmul.mubr.msk.bf16.gmra.mrb[156].mxu0 %vm284_vm0, %v8045_v55  ;;  %11535 = vst [vmem:[#allocation58_spill] sm:$0xff] %v9330_v44  ;;  %11536 = vst [vmem:[#allocation59_spill] sm:$0xff] %v9332_v52 }
 0x140   :  { %7717 = vmatprep.mubr.msk.bf16.mxu0 %vm284_vm0, %v8046_v60  ;;  %v719_v57 = vadd.f32 %v7301_v46, %v718_v32  ;;  %v853_v2 = vadd.f32 %v852_v18, %v790_v35  ;;  %v8047_v60 = vld [vmem:[%s11379_s1 + $0x208] sm:$0xff]   ;;  %v8048_v35 = vld [vmem:[%s11379_s1 + $0x210] sm:$0xff]  }
 0x142   :  { %v7305_v7 = vpop.f32.mrb[52].mxu0  ;;  %v854_v9 = vadd.f32 %v853_v2, %v791_v42  ;;  %v720_v55 = vadd.f32 %v7302_v45, %v719_v57  ;;  %v9339_v57 = vpop.permute.xlu1 %2757 }
 0x143   :  { %v623_v13 = vpop.f32.mrb[53].mxu0  ;;  %11537 = vst [vmem:[#allocation60_spill] sm:$0xff] %v9339_v57  ;;  %v795_v44 = vmul.f32 %v7305_v7, %v7305_v7  ;;  %v9341_v3 = vpop.permute.xlu0 %2752 }
 0x144   :  { %v793_v1 = vmul.f32 %v623_v13, %v623_v13  ;;  %v7306_v31 = vpop.f32.mrb[54].mxu0  ;;  %v721_v46 = vadd.f32 %v720_v55, %v623_v13  ;;  %v855_v18 = vadd.f32 %v854_v9, %v792_v11  ;;  %11538 = vst [vmem:[#allocation61_spill] sm:$0xff] %v9341_v3 }
 0x145   :  { %v626_v32 = vpop.f32.mrb[55].mxu0  ;;  %v796_v4 = vmul.f32 %v7306_v31, %v7306_v31 }
 0x146   :  { %v856_v42 = vadd.f32 %v855_v18, %v793_v1  ;;  %v722_v2 = vadd.f32 %v721_v46, %v626_v32  ;;  %v794_v45 = vmul.f32 %v626_v32, %v626_v32  ;;  %v8049_v1 = vld [vmem:[%s11379_s1 + $0x218] sm:$0xff]   ;;  %v9349_v18 = vpop.permute.xlu1 %3212 }
 0x147   :  { %7718 = vmatmul.mubr.msk.bf16.vlgmr.msra.gmra.mrb[160].mxu0 %vm284_vm0, %v8047_v60  ;;  %v8050_v60 = vld [vmem:[%s11379_s1 + $0x220] sm:$0xff]   ;;  %11539 = vst [vmem:[#allocation62_spill] sm:$0xff] %v9349_v18 }
 0x148   :  { %7721 = vmatprep.mubr.msk.bf16.mxu0 %vm284_vm0, %v8048_v35  ;;  %v723_v52 = vadd.f32 %v7305_v7, %v722_v2  ;;  %v857_v5 = vadd.f32 %v856_v42, %v794_v45 }
 0x14a   :  { %v7309_v17 = vpop.f32.mrb[56].mxu0  ;;  %v858_v59 = vadd.f32 %v857_v5, %v795_v44  ;;  %v724_v11 = vadd.f32 %v7306_v31, %v723_v52  ;;  %v9352_v52 = vpop.permute.xlu0 %3207 }
 0x14b   :  { %v639_v13 = vpop.f32.mrb[57].mxu0  ;;  %11540 = vst [vmem:[#allocation63_spill] sm:$0xff] %v9352_v52  ;;  %v799_v31 = vmul.f32 %v7309_v17, %v7309_v17 }
 0x14c   :  { %v797_v9 = vmul.f32 %v639_v13, %v639_v13  ;;  %v7310_v55 = vpop.f32.mrb[58].mxu0  ;;  %v725_v35 = vadd.f32 %v724_v11, %v639_v13  ;;  %v859_v7 = vadd.f32 %v858_v59, %v796_v4  ;;  %v8051_v4 = vld [vmem:[%s11379_s1 + $0x228] sm:$0xff]  }
 0x14d   :  { %v642_v46 = vpop.f32.mrb[59].mxu0  ;;  %v800_v57 = vmul.f32 %v7310_v55, %v7310_v55 }
 0x14e   :  { %v860_v32 = vadd.f32 %v859_v7, %v797_v9  ;;  %v726_v42 = vadd.f32 %v725_v35, %v642_v46  ;;  %v798_v5 = vmul.f32 %v642_v46, %v642_v46  ;;  %v9361_v35 = vpop.permute.xlu1 %3222  ;;  %v9363_v7 = vpop.permute.xlu0 %3217 }
 0x14f   :  { %7722 = vmatmul.mubr.msk.bf16.gmra.mrb[164].mxu0 %vm284_vm0, %v8049_v1  ;;  %v8052_v1 = vld [vmem:[%s11379_s1 + $0x230] sm:$0xff]   ;;  %11541 = vst [vmem:[#allocation64_spill] sm:$0xff] %v9361_v35  ;;  %11542 = vst [vmem:[#allocation65_spill] sm:$0xff] %v9363_v7 }
 0x150   :  { %7725 = vmatprep.mubr.msk.bf16.mxu0 %vm284_vm0, %v8050_v60  ;;  %v727_v44 = vadd.f32 %v7309_v17, %v726_v42  ;;  %v861_v2 = vadd.f32 %v860_v32, %v798_v5 }
 0x152   :  { %v7313_v45 = vpop.f32.mrb[60].mxu0  ;;  %v862_v3 = vadd.f32 %v861_v2, %v799_v31  ;;  %v728_v59 = vadd.f32 %v7310_v55, %v727_v44  ;;  %v9369_v18 = vpop.permute.xlu1 %3232 }
 0x153   :  { %v655_v13 = vpop.f32.mrb[61].mxu0  ;;  %v803_v5 = vmul.f32 %v7313_v45, %v7313_v45  ;;  %11543 = vst [vmem:[#allocation66_spill] sm:$0xff] %v9369_v18 }
 0x154   :  { %v801_v11 = vmul.f32 %v655_v13, %v655_v13  ;;  %v7314_v9 = vpop.f32.mrb[62].mxu0  ;;  %v729_v60 = vadd.f32 %v728_v59, %v655_v13  ;;  %v863_v17 = vadd.f32 %v862_v3, %v800_v57  ;;  %v8053_v57 = vld [vmem:[%s11379_s1 + $0x238] sm:$0xff]  }
 0x155   :  { %v658_v46 = vpop.f32.mrb[63].mxu0  ;;  %v804_v35 = vmul.f32 %v7314_v9, %v7314_v9 }
 0x156   :  { %v864_v32 = vadd.f32 %v863_v17, %v801_v11  ;;  %v730_v42 = vadd.f32 %v729_v60, %v658_v46  ;;  %v802_v55 = vmul.f32 %v658_v46, %v658_v46  ;;  %v9376_v11 = vpop.permute.xlu0 %3227 }
 0x157   :  { %7726 = vmatmul.mubr.msk.bf16.gmra.mrb[168].mxu0 %vm284_vm0, %v8051_v4  ;;  %11544 = vst [vmem:[#allocation67_spill] sm:$0xff] %v9376_v11 }
 0x158   :  { %7729 = vmatprep.mubr.msk.bf16.mxu0 %vm284_vm0, %v8052_v1  ;;  %v731_v31 = vadd.f32 %v7313_v45, %v730_v42  ;;  %v865_v44 = vadd.f32 %v864_v32, %v802_v55 }
 0x15a   :  { %v9367_v2 = vpop.f32.mrb[64].mxu0  ;;  %v732_v13 = vadd.f32 %v7314_v9, %v731_v31  ;;  %v866_v3 = vadd.f32 %v865_v44, %v803_v5  ;;  %v9383_v9 = vpop.permute.xlu1 %3242 }
 0x15b   :  { %v9374_v59 = vpop.f32.mrb[65].mxu0  ;;  %11545 = vst [vmem:[#allocation68_spill] sm:$0xff] %v9383_v9  ;;  %v9385_v55 = vpop.permute.xlu0 %3237 }
 0x15c   :  { %v9378_v4 = vpop.f32.mrb[66].mxu0  ;;  %v733_v1 = vrot.slane %v732_v13, 4  ;;  %v867_v45 = vadd.f32 %v866_v3, %v804_v35  ;;  %11546 = vst [vmem:[#allocation69_spill] sm:$0xff] %v9385_v55 }
 0x15d   :  { %v9380_v60 = vpop.f32.mrb[67].mxu0 }
 0x15e   :  { %v734_v17 = vadd.f32 %v733_v1, %v732_v13  ;;  %v868_v46 = vrot.slane %v867_v45, 4  ;;  %v9395_v1 = vpop.permute.xlu1 %3252 }
 0x15f   :  { %7730 = vmatmul.mubr.msk.bf16.gmra.mrb[172].mxu0 %vm284_vm0, %v8053_v57  ;;  %11548 = vst [vmem:[#allocation71_spill] sm:$0xff] %v9395_v1  ;;  %v9397_v52 = vpop.permute.xlu0 %3247 }
 0x160   :  { %v735_v32 = vrot.slane %v734_v17, 2  ;;  %v869_v42 = vadd.f32 %v868_v46, %v867_v45  ;;  %11549 = vst [vmem:[#allocation72_spill] sm:$0xff] %v9397_v52 }
 0x162   :  { %v9387_v5 = vpop.f32.mrb[68].mxu0  ;;  %v736_v31 = vadd.f32 %v735_v32, %v734_v17  ;;  %v870_v44 = vrot.slane %v869_v42, 2 }
 0x163   :  { %v9389_v18 = vpop.f32.mrb[69].mxu0 }
 0x164   :  { %v9391_v11 = vpop.f32.mrb[70].mxu0  ;;  %v737_v35 = vrot.slane %v736_v31, 1  ;;  %v871_v3 = vadd.f32 %v870_v44, %v869_v42  ;;  %v9407_v44 = vpop.permute.xlu0 %3257 }
 0x165   :  { %11547 = vst [vmem:[#allocation70_spill] sm:$0xff] %v9391_v11  ;;  %v9393_v13 = vpop.f32.mrb[71].mxu0  ;;  %v9405_v11 = vpop.permute.xlu1 %3262  ;;  %11553 = vst [vmem:[#allocation76_spill] sm:$0xff] %v9407_v44 }
 0x166   :  { %v738_v57 = vadd.f32 %v737_v35, %v736_v31  ;;  %v872_v9 = vrot.slane %v871_v3, 1  ;;  %11552 = vst [vmem:[#allocation75_spill] sm:$0xff] %v9405_v11 }
 0x168   :  { %v740_v45 = vmul.f32 0.001953125, %v738_v57  ;;  %v873_v46 = vadd.f32 %v872_v9, %v871_v3  ;;  %v9417_v57 = vpop.permute.xlu0 %3267 }
 0x169   :  { %v9413_v9 = vpop.permute.xlu1 %3272  ;;  %11558 = vst [vmem:[#allocation81_spill] sm:$0xff] %v9417_v57 }
 0x16a   :  { %v9399_v55 = vpop.f32.mrb[72].mxu0  ;;  %v874_v17 = vmul.f32 0.001953125, %v873_v46  ;;  %v875_v32 = vmul.f32 %v740_v45, %v740_v45  ;;  %11556 = vst [vmem:[#allocation79_spill] sm:$0xff] %v9413_v9  ;;  %v1063_v46 = vlaneseq }
 0x16b   :  { %v9401_v7 = vpop.f32.mrb[73].mxu0 }
 0x16c   :  { %11550 = vst [vmem:[#allocation73_spill] sm:$0xff] %v9401_v7  ;;  %v9403_v14 = vpop.f32.mrb[74].mxu0  ;;  %v876_v42 = vsub.f32 %v874_v17, %v875_v32  ;;  %v1064_v17 = vshrl.u32 %v1063_v46, 7  ;;  %v9425_v44 = vpop.permute.xlu0 %3277 }
 0x16d   :  { %11551 = vst [vmem:[#allocation74_spill] sm:$0xff] %v9403_v14  ;;  %v9409_v1 = vpop.f32.mrb[75].mxu0  ;;  %v9423_v32 = vpop.permute.xlu1 %3282  ;;  %11562 = vst [vmem:[#allocation85_spill] sm:$0xff] %v9425_v44 }
 0x16e   :  { %11554 = vst [vmem:[#allocation77_spill] sm:$0xff] %v9409_v1  ;;  %v877_v31 = vmax.f32 %v876_v42, 0.0  ;;  %11561 = vst [vmem:[#allocation84_spill] sm:$0xff] %v9423_v32  ;;  %v9434_v9 = vsub.s32 0, %v1064_v17  ;;  %v882_v32 = vld [vmem:[%s11386_s8] sm:$0x1] }
 0x170   :  { %v879_v35 = vadd.f32 1e-05, %v877_v31  ;;  %v878_v31 = vld [vmem:[%s11385_s7] sm:$0x1]  ;;  %11565 = vst [vmem:[#allocation88_spill] sm:$0xff] %v9434_v9  ;;  %v9445_v44 = vpop.permute.xlu0 %3732 }
 0x171   :  { %v9440_v46 = vpop.permute.xlu1 %3737  ;;  %11569 = vst [vmem:[#allocation92_spill] sm:$0xff] %v9445_v44 }
 0x172   :  { %v9411_v52 = vpop.f32.mrb[76].mxu0  ;;  %8135 = vrsqrt.f32 %v879_v35  ;;  %11568 = vst [vmem:[#allocation91_spill] sm:$0xff] %v9440_v46 }
 0x173   :  { %11555 = vst [vmem:[#allocation78_spill] sm:$0xff] %v9411_v52  ;;  %v9415_v3 = vpop.f32.mrb[77].mxu0 }
 0x174   :  { %11557 = vst [vmem:[#allocation80_spill] sm:$0xff] %v9415_v3  ;;  %v9419_v14 = vpop.f32.mrb[78].mxu0 }
 0x175   :  { %11559 = vst [vmem:[#allocation82_spill] sm:$0xff] %v9419_v14  ;;  %v9421_v11 = vpop.f32.mrb[79].mxu0 }
 0x176   :  { %11560 = vst [vmem:[#allocation83_spill] sm:$0xff] %v9421_v11 }
 0x17a   :  { %v9427_v42 = vpop.f32.mrb[80].mxu0 }
 0x17b   :  { %11563 = vst [vmem:[#allocation86_spill] sm:$0xff] %v9427_v42  ;;  %v9432_v35 = vpop.f32.mrb[81].mxu0 }
 0x17c   :  { %11564 = vst [vmem:[#allocation87_spill] sm:$0xff] %v9432_v35  ;;  %v9436_v57 = vpop.f32.mrb[82].mxu0  ;;  %v8136_v14 = vpop.eup %8135 }
 0x17d   :  { %11566 = vst [vmem:[#allocation89_spill] sm:$0xff] %v9436_v57  ;;  %v881_v3 = vmul.f32 %v8136_v14, %v878_v31  ;;  %v9438_v11 = vpop.f32.mrb[83].mxu0 }
 0x17e   :  { %11567 = vst [vmem:[#allocation90_spill] sm:$0xff] %v9438_v11 }
 0x17f   :  { %v883_v42 = vmul.f32 %v881_v3, %v740_v45  ;;  %v9448_v52 = vrot.slane %v881_v3, %v9434_v9 }
 0x181   :  { %v884_v17 = vsub.f32 %v882_v32, %v883_v42  ;;  %v1070_v57 = vmul.f32 %v9117_v33, %v9448_v52  ;;  %v1068_v14 = vmul.f32 %v9448_v52, %v9121_v62  ;;  %v1071_v31 = vmul.f32 %v9128_v40, %v9448_v52 }
 0x182   :  { %v9456_v46 = vpop.f32.mrb[84].mxu0  ;;  %v1069_v11 = vmul.f32 %v9448_v52, %v9139_v34  ;;  %v1074_v45 = vmul.f32 %v9154_v47, %v9448_v52  ;;  %v1072_v3 = vmul.f32 %v9448_v52, %v9157_v23  ;;  %v1075_v33 = vmul.f32 %v9163_v6, %v9448_v52  ;;  %v9479_v23 = vpop.permute.xlu1 %3747 }
 0x183   :  { %11570 = vst [vmem:[#allocation93_spill] sm:$0xff] %v9456_v46  ;;  %v9466_v32 = vpop.f32.mrb[85].mxu0  ;;  %v9469_v62 = vrot.slane %v884_v17, %v9434_v9  ;;  %v1073_v40 = vmul.f32 %v9448_v52, %v9174_v41  ;;  %v1078_v34 = vmul.f32 %v9186_v28, %v9448_v52  ;;  %v1076_v47 = vmul.f32 %v9448_v52, %v9189_v22  ;;  %v9489_v28 = vpop.permute.xlu0 %3742 }
 0x184   :  { %11571 = vst [vmem:[#allocation94_spill] sm:$0xff] %v9466_v32  ;;  %v9477_v42 = vpop.f32.mrb[86].mxu0  ;;  %11573 = vst [vmem:[#allocation96_spill] sm:$0xff] %v9479_v23  ;;  %v1079_v6 = vmul.f32 %v9198_v37, %v9448_v52  ;;  %v1077_v17 = vmul.f32 %v9448_v52, %v9206_v50  ;;  %v1082_v9 = vmul.f32 %v9215_v24, %v9448_v52 }
 0x185   :  { %11572 = vst [vmem:[#allocation95_spill] sm:$0xff] %v9477_v42  ;;  %v2092_v41 = vmul.f32 %v9367_v2, %v9448_v52  ;;  %11574 = vst [vmem:[#allocation97_spill] sm:$0xff] %v9489_v28  ;;  %v1092_v22 = vadd.f32 %v9469_v62, %v1070_v57  ;;  %v1090_v44 = vadd.f32 %v9469_v62, %v1068_v14  ;;  %v9495_v37 = vpop.f32.mrb[87].mxu0 }
 0x186   :  { %v1093_v23 = vadd.f32 %v9469_v62, %v1071_v31  ;;  %v1091_v42 = vadd.f32 %v9469_v62, %v1069_v11  ;;  %11575 = vst [vmem:[#allocation98_spill] sm:$0xff] %v9495_v37  ;;  %v1096_v50 = vadd.f32 %v9469_v62, %v1074_v45  ;;  %v1094_v32 = vadd.f32 %v9469_v62, %v1072_v3 }
 0x187   :  { %v1097_v24 = vadd.f32 %v9469_v62, %v1075_v33  ;;  %v1095_v2 = vadd.f32 %v9469_v62, %v1073_v40  ;;  %v1108_v46 = vmax.f32 %v1092_v22, 0.0  ;;  %v1106_v28 = vmax.f32 %v1090_v44, 0.0  ;;  %v9515_v44 = vpop.permute.xlu1 %3757 }
 0x188   :  { %v1109_v35 = vmax.f32 %v1093_v23, 0.0  ;;  %v1107_v57 = vmax.f32 %v1091_v42, 0.0  ;;  %v1112_v1 = vmax.f32 %v1096_v50, 0.0  ;;  %v1110_v14 = vmax.f32 %v1094_v32, 0.0  ;;  %11578 = vst [vmem:[#allocation101_spill] sm:$0xff] %v9515_v44  ;;  %v11632_v44 = vld [vmem:[#allocation10_spill] sm:$0xff] }
 0x189   :  { %v1113_v7 = vmax.f32 %v1097_v24, 0.0  ;;  %v1111_v31 = vmax.f32 %v1095_v2, 0.0  ;;  %v9502_v11 = vmul.f32 %v8865_v56, %v1108_v46  ;;  %v9505_v37 = vmul.f32 %v8844_v48, %v1106_v28 }
 0x18a   :  { %v9508_v45 = vmul.f32 %v8846_v49, %v1109_v35  ;;  %v9511_v3 = vmul.f32 %v8828_v43, %v1107_v57  ;;  %v9513_v33 = vpop.f32.mrb[88].mxu0  ;;  %v9518_v32 = vmul.f32 %v8899_v10, %v1112_v1  ;;  %v9521_v40 = vmul.f32 %v8879_v63, %v1110_v14  ;;  %v9531_v43 = vpop.permute.xlu0 %3752 }
 0x18b   :  { %11576 = vst [vmem:[#allocation99_spill] sm:$0xff] %v9502_v11  ;;  %v9524_v56 = vmul.f32 %v8882_v0, %v1113_v7  ;;  %v9527_v48 = vmul.f32 %v8870_v58, %v1111_v31  ;;  %v9529_v49 = vpop.f32.mrb[89].mxu0  ;;  %11581 = vst [vmem:[#allocation104_spill] sm:$0xff] %v9531_v43  ;;  %v1100_v46 = vadd.f32 %v9469_v62, %v1078_v34  ;;  %v9560_v57 = vpop.permute.xlu1 %3767 }
 0x18c   :  { %11577 = vst [vmem:[#allocation100_spill] sm:$0xff] %v9508_v45  ;;  %11579 = vst [vmem:[#allocation102_spill] sm:$0xff] %v9518_v32  ;;  %v1098_v10 = vadd.f32 %v9469_v62, %v1076_v47  ;;  %v1101_v63 = vadd.f32 %v9469_v62, %v1079_v6  ;;  %v9538_v1 = vpop.f32.mrb[90].mxu0  ;;  %v1099_v0 = vadd.f32 %v9469_v62, %v1077_v17  ;;  %v11682_v32 = vld [vmem:[#allocation18_spill] sm:$0xff] }
 0x18d   :  { %11580 = vst [vmem:[#allocation103_spill] sm:$0xff] %v9524_v56  ;;  %v1104_v58 = vadd.f32 %v9469_v62, %v1082_v9  ;;  %v2108_v7 = vadd.f32 %v2092_v41, %v9469_v62  ;;  %v1080_v42 = vmul.f32 %v9448_v52, %v9218_v8  ;;  %v1116_v23 = vmax.f32 %v1100_v46, 0.0  ;;  %v9547_v47 = vpop.f32.mrb[91].mxu0  ;;  %11585 = vst [vmem:[#allocation108_spill] sm:$0xff] %v9560_v57 }
 0x18e   :  { %v1114_v28 = vmax.f32 %v1098_v10, 0.0  ;;  %v1117_v22 = vmax.f32 %v1101_v63, 0.0  ;;  %v2090_v34 = vmul.f32 %v9374_v59, %v9448_v52  ;;  %v1115_v6 = vmax.f32 %v1099_v0, 0.0  ;;  %v9571_v46 = vpop.permute.xlu0 %3762 }
 0x18f   :  { %v1120_v50 = vmax.f32 %v1104_v58, 0.0  ;;  %v2124_v24 = vmax.f32 %v2108_v7, 0.0  ;;  %v1102_v17 = vadd.f32 %v9469_v62, %v1080_v42  ;;  %v9551_v9 = vmul.f32 %v8934_v25, %v1116_v23  ;;  %11589 = vst [vmem:[#allocation112_spill] sm:$0xff] %v9571_v46 }
 0x190   :  { %v9554_v41 = vmul.f32 %v8922_v19, %v1114_v28  ;;  %v9557_v8 = vmul.f32 %v8924_v20, %v1117_v22  ;;  %v2106_v2 = vadd.f32 %v2090_v34, %v9469_v62  ;;  %v9563_v59 = vmul.f32 %v8904_v12, %v1115_v6 }
 0x191   :  { %11582 = vst [vmem:[#allocation105_spill] sm:$0xff] %v9551_v9  ;;  %v9566_v14 = vmul.f32 %v8974_v51, %v1120_v50  ;;  %v9569_v31 = vmul.f32 %v9012_v61, %v2124_v24  ;;  %v1118_v25 = vmax.f32 %v1102_v17, 0.0  ;;  %v1083_v20 = vmul.f32 %v9224_v21, %v9448_v52  ;;  %v9609_v50 = vpop.permute.xlu1 %3777 }
 0x192   :  { %11583 = vst [vmem:[#allocation106_spill] sm:$0xff] %v9554_v41  ;;  %11584 = vst [vmem:[#allocation107_spill] sm:$0xff] %v9557_v8  ;;  %v2122_v19 = vmax.f32 %v2106_v2, 0.0  ;;  %v2093_v10 = vmul.f32 %v9378_v4, %v9448_v52  ;;  %v1081_v12 = vmul.f32 %v9448_v52, %v9229_v16  ;;  %v9579_v63 = vpop.f32.mrb[92].mxu0  ;;  %v2091_v61 = vmul.f32 %v9380_v60, %v9448_v52 }
 0x193   :  { %11586 = vst [vmem:[#allocation109_spill] sm:$0xff] %v9563_v59  ;;  %11587 = vst [vmem:[#allocation110_spill] sm:$0xff] %v9566_v14  ;;  %v9582_v51 = vmul.f32 %v8957_v38, %v1118_v25  ;;  %v1438_v0 = vmul.f32 %v9235_v30, %v9448_v52  ;;  %v2096_v21 = vmul.f32 %v9387_v5, %v9448_v52  ;;  %v9590_v58 = vpop.f32.mrb[93].mxu0 }
 0x194   :  { %11588 = vst [vmem:[#allocation111_spill] sm:$0xff] %v9569_v31  ;;  %v9593_v4 = vmul.f32 %v8995_v27, %v2122_v19  ;;  %v1105_v16 = vadd.f32 %v9469_v62, %v1083_v20  ;;  %v2109_v7 = vadd.f32 %v2093_v10, %v9469_v62  ;;  %v1103_v38 = vadd.f32 %v9469_v62, %v1081_v12  ;;  %v9598_v42 = vpop.f32.mrb[94].mxu0  ;;  %v9612_v19 = vpop.permute.xlu0 %3772 }
 0x195   :  { %11590 = vst [vmem:[#allocation113_spill] sm:$0xff] %v9582_v51  ;;  %v2107_v60 = vadd.f32 %v2091_v61, %v9469_v62  ;;  %v1454_v30 = vadd.f32 %v1438_v0, %v9469_v62  ;;  %v2112_v23 = vadd.f32 %v2096_v21, %v9469_v62  ;;  %v1436_v5 = vmul.f32 %v9244_v15, %v9448_v52  ;;  %v9607_v6 = vpop.f32.mrb[95].mxu0 }
 0x196   :  { %11591 = vst [vmem:[#allocation114_spill] sm:$0xff] %v9593_v4  ;;  %v1121_v28 = vmax.f32 %v1105_v16, 0.0  ;;  %v2125_v27 = vmax.f32 %v2109_v7, 0.0  ;;  %v1119_v22 = vmax.f32 %v1103_v38, 0.0  ;;  %v2094_v34 = vmul.f32 %v9389_v18, %v9448_v52  ;;  %11592 = vst [vmem:[#allocation115_spill] sm:$0xff] %v9609_v50  ;;  %v11599_v16 = vld [vmem:[#allocation38_spill] sm:$0xff] }
 0x197   :  { %v2123_v24 = vmax.f32 %v2107_v60, 0.0  ;;  %v1470_v17 = vmax.f32 %v1454_v30, 0.0  ;;  %v2128_v2 = vmax.f32 %v2112_v23, 0.0  ;;  %v1452_v25 = vadd.f32 %v1436_v5, %v9469_v62  ;;  %11593 = vst [vmem:[#allocation116_spill] sm:$0xff] %v9612_v19  ;;  %v11600_v7 = vld [vmem:[#allocation70_spill] sm:$0xff]  ;;  %v11603_v5 = vld [vmem:[#allocation40_spill] sm:$0xff] }
 0x198   :  { %v9615_v20 = vmul.f32 %v8960_v39, %v1121_v28  ;;  %v9618_v15 = vmul.f32 %v9000_v36, %v2125_v27  ;;  %v9621_v10 = vmul.f32 %v8936_v26, %v1119_v22  ;;  %v2110_v18 = vadd.f32 %v2094_v34, %v9469_v62  ;;  %v11604_v22 = vld [vmem:[#allocation21_spill] sm:$0xff] }
 0x199   :  { %v9625_v12 = vmul.f32 %v8976_v53, %v2123_v24  ;;  %v9628_v61 = vmul.f32 %v8669_v54, %v1470_v17  ;;  %v9631_v0 = vmul.f32 %v9055_v29, %v2128_v2  ;;  %v1468_v21 = vmax.f32 %v1452_v25, 0.0  ;;  %v11601_v53 = vld [vmem:[#allocation5_spill] sm:$0xff]  ;;  %v11602_v54 = vld [vmem:[#allocation39_spill] sm:$0xff] }
 0x19a   :  { %11594 = vst [vmem:[#allocation117_spill] sm:$0xff] %v9615_v20  ;;  %11595 = vst [vmem:[#allocation118_spill] sm:$0xff] %v9618_v15  ;;  %v2126_v36 = vmax.f32 %v2110_v18, 0.0  ;;  %v1439_v26 = vmul.f32 %v11599_v16, %v9448_v52  ;;  %v2097_v38 = vmul.f32 %v11600_v7, %v9448_v52  ;;  %v9639_v60 = vpop.f32.mrb[96].mxu0  ;;  %v1437_v29 = vmul.f32 %v11602_v54, %v9448_v52  ;;  %v9661_v18 = vpop.permute.xlu1 %3787 }
 0x19b   :  { %11596 = vst [vmem:[#allocation119_spill] sm:$0xff] %v9621_v10  ;;  %11597 = vst [vmem:[#allocation120_spill] sm:$0xff] %v9625_v12  ;;  %v9642_v30 = vmul.f32 %v11601_v53, %v1468_v21  ;;  %v2095_v23 = vmul.f32 %v9393_v13, %v9448_v52  ;;  %v1442_v28 = vmul.f32 %v11603_v5, %v9448_v52  ;;  %v9650_v27 = vpop.f32.mrb[97].mxu0  ;;  %v9668_v53 = vpop.permute.xlu0 %3782 }
 0x19c   :  { %11598 = vst [vmem:[#allocation121_spill] sm:$0xff] %v9631_v0  ;;  %v9653_v34 = vmul.f32 %v11604_v22, %v2126_v36  ;;  %v1455_v24 = vadd.f32 %v1439_v26, %v9469_v62  ;;  %v2113_v17 = vadd.f32 %v2097_v38, %v9469_v62  ;;  %v2100_v2 = vmul.f32 %v9399_v55, %v9448_v52  ;;  %v9659_v25 = vpop.f32.mrb[98].mxu0  ;;  %v11607_v36 = vld [vmem:[#allocation41_spill] sm:$0xff] }
 0x19d   :  { %11606 = vst [vmem:[#allocation70_spill] sm:$0xff] %v9661_v18  ;;  %v1453_v13 = vadd.f32 %v1437_v29, %v9469_v62  ;;  %v2111_v21 = vadd.f32 %v2095_v23, %v9469_v62  ;;  %v1458_v16 = vadd.f32 %v1442_v28, %v9469_v62  ;;  %v1440_v7 = vmul.f32 %v11607_v36, %v9448_v52  ;;  %v11609_v55 = vld [vmem:[#allocation73_spill] sm:$0xff]  ;;  %v9673_v22 = vpop.f32.mrb[99].mxu0  ;;  %v11610_v28 = vld [vmem:[#allocation6_spill] sm:$0xff] }
 0x19e   :  { %11605 = vst [vmem:[#allocation38_spill] sm:$0xff] %v9653_v34  ;;  %11608 = vst [vmem:[#allocation5_spill] sm:$0xff] %v9668_v53  ;;  %v1471_v26 = vmax.f32 %v1455_v24, 0.0  ;;  %v2129_v38 = vmax.f32 %v2113_v17, 0.0  ;;  %v2116_v54 = vadd.f32 %v2100_v2, %v9469_v62  ;;  %v2098_v5 = vmul.f32 %v11609_v55, %v9448_v52  ;;  %v11611_v36 = vld [vmem:[#allocation22_spill] sm:$0xff]  ;;  %v11613_v2 = vld [vmem:[#allocation7_spill] sm:$0xff] }
 0x19f   :  { %v1469_v39 = vmax.f32 %v1453_v13, 0.0  ;;  %v2127_v29 = vmax.f32 %v2111_v21, 0.0  ;;  %v1474_v35 = vmax.f32 %v1458_v16, 0.0  ;;  %v1456_v23 = vadd.f32 %v1440_v7, %v9469_v62  ;;  %v11614_v55 = vld [vmem:[#allocation20_spill] sm:$0xff]  ;;  %v11616_v13 = vld [vmem:[#allocation11_spill] sm:$0xff]  ;;  %v9714_v7 = vpop.permute.xlu0 %3792 }
 0x1a0   :  { %v9677_v31 = vmul.f32 %v11610_v28, %v1471_v26  ;;  %v9680_v15 = vmul.f32 %v11611_v36, %v2129_v38  ;;  %v2132_v24 = vmax.f32 %v2116_v54, 0.0  ;;  %v2114_v17 = vadd.f32 %v2098_v5, %v9469_v62  ;;  %v11617_v26 = vld [vmem:[#allocation26_spill] sm:$0xff]  ;;  %v11619_v54 = vld [vmem:[#allocation44_spill] sm:$0xff]  ;;  %11625 = vst [vmem:[#allocation73_spill] sm:$0xff] %v9714_v7 }
 0x1a1   :  { %v9684_v0 = vmul.f32 %v11613_v2, %v1469_v39  ;;  %v9687_v50 = vmul.f32 %v11614_v55, %v2127_v29  ;;  %v9690_v21 = vmul.f32 %v11616_v13, %v1474_v35  ;;  %v1472_v16 = vmax.f32 %v1456_v23, 0.0  ;;  %v9701_v39 = vpop.permute.xlu1 %3797  ;;  %v11621_v29 = vld [vmem:[#allocation9_spill] sm:$0xff]  ;;  %v11622_v35 = vld [vmem:[#allocation74_spill] sm:$0xff]  ;;  %v11630_v7 = vld [vmem:[#allocation48_spill] sm:$0xff] }
 0x1a2   :  { %11612 = vst [vmem:[#allocation39_spill] sm:$0xff] %v9680_v15  ;;  %v9695_v28 = vmul.f32 %v11617_v26, %v2132_v24  ;;  %v2130_v38 = vmax.f32 %v2114_v17, 0.0  ;;  %v1443_v5 = vmul.f32 %v11619_v54, %v9448_v52  ;;  %v9699_v36 = vpop.f32.mrb[100].mxu0  ;;  %11620 = vst [vmem:[#allocation41_spill] sm:$0xff] %v9701_v39  ;;  %v2101_v23 = vmul.f32 %v11622_v35, %v9448_v52  ;;  %v11623_v55 = vld [vmem:[#allocation45_spill] sm:$0xff]  ;;  %v11626_v54 = vld [vmem:[#allocation24_spill] sm:$0xff] }
 0x1a3   :  { %11615 = vst [vmem:[#allocation40_spill] sm:$0xff] %v9687_v50  ;;  %v9704_v2 = vmul.f32 %v11621_v29, %v1472_v16  ;;  %v1441_v13 = vmul.f32 %v11623_v55, %v9448_v52  ;;  %v11624_v24 = vld [vmem:[#allocation77_spill] sm:$0xff]  ;;  %v9712_v17 = vpop.f32.mrb[101].mxu0  ;;  %v11628_v16 = vld [vmem:[#allocation46_spill] sm:$0xff] }
 0x1a4   :  { %11618 = vst [vmem:[#allocation21_spill] sm:$0xff] %v9695_v28  ;;  %v2099_v26 = vmul.f32 %v11624_v24, %v9448_v52  ;;  %v9717_v28 = vmul.f32 %v11626_v54, %v2130_v38  ;;  %v1459_v39 = vadd.f32 %v1443_v5, %v9469_v62  ;;  %v1446_v29 = vmul.f32 %v11628_v16, %v9448_v52  ;;  %v11629_v35 = vld [vmem:[#allocation78_spill] sm:$0xff]  ;;  %v9724_v18 = vpop.f32.mrb[102].mxu0 }
 0x1a5   :  { %v2104_v15 = vmul.f32 %v11629_v35, %v9448_v52  ;;  %v2117_v55 = vadd.f32 %v2101_v23, %v9469_v62  ;;  %v1457_v24 = vadd.f32 %v1441_v13, %v9469_v62  ;;  %v1444_v38 = vmul.f32 %v11630_v7, %v9448_v52  ;;  %v9731_v54 = vpop.f32.mrb[103].mxu0  ;;  %v11631_v35 = vld [vmem:[#allocation80_spill] sm:$0xff] }
 0x1a6   :  { %11627 = vst [vmem:[#allocation6_spill] sm:$0xff] %v9717_v28  ;;  %v2115_v19 = vadd.f32 %v2099_v26, %v9469_v62  ;;  %v1475_v5 = vmax.f32 %v1459_v39, 0.0  ;;  %v1462_v28 = vadd.f32 %v1446_v29, %v9469_v62  ;;  %v2102_v53 = vmul.f32 %v11631_v35, %v9448_v52  ;;  %v9742_v39 = vpop.permute.xlu1 %3807  ;;  %v11634_v29 = vld [vmem:[#allocation25_spill] sm:$0xff]  ;;  %v11643_v35 = vld [vmem:[#allocation50_spill] sm:$0xff] }
 0x1a7   :  { %v2120_v16 = vadd.f32 %v2104_v15, %v9469_v62  ;;  %v2133_v50 = vmax.f32 %v2117_v55, 0.0  ;;  %v1473_v34 = vmax.f32 %v1457_v24, 0.0  ;;  %v1460_v13 = vadd.f32 %v1444_v38, %v9469_v62  ;;  %11633 = vst [vmem:[#allocation22_spill] sm:$0xff] %v9742_v39  ;;  %v11636_v15 = vld [vmem:[#allocation8_spill] sm:$0xff]  ;;  %v11637_v55 = vld [vmem:[#allocation23_spill] sm:$0xff]  ;;  %v9753_v38 = vpop.permute.xlu0 %3802 }
 0x1a8   :  { %v2131_v23 = vmax.f32 %v2115_v19, 0.0  ;;  %v9739_v26 = vmul.f32 %v11632_v44, %v1475_v5  ;;  %v1478_v57 = vmax.f32 %v1462_v28, 0.0  ;;  %v2118_v43 = vadd.f32 %v2102_v53, %v9469_v62  ;;  %11639 = vst [vmem:[#allocation11_spill] sm:$0xff] %v9753_v38  ;;  %v11640_v44 = vld [vmem:[#allocation15_spill] sm:$0xff]  ;;  %v11641_v28 = vld [vmem:[#allocation30_spill] sm:$0xff] }
 0x1a9   :  { %v2136_v7 = vmax.f32 %v2120_v16, 0.0  ;;  %v9745_v46 = vmul.f32 %v11634_v29, %v2133_v50  ;;  %v9748_v11 = vmul.f32 %v11636_v15, %v1473_v34  ;;  %v1476_v19 = vmax.f32 %v1460_v13, 0.0  ;;  %v11644_v34 = vld [vmem:[#allocation13_spill] sm:$0xff]  ;;  %v11652_v38 = vld [vmem:[#allocation55_spill] sm:$0xff] }
 0x1aa   :  { %v9751_v24 = vmul.f32 %v11637_v55, %v2131_v23  ;;  %v9756_v5 = vmul.f32 %v11640_v44, %v1478_v57  ;;  %v2134_v53 = vmax.f32 %v2118_v43, 0.0  ;;  %v1447_v50 = vmul.f32 %v11643_v35, %v9448_v52  ;;  %v9763_v29 = vpop.f32.mrb[104].mxu0  ;;  %v11645_v23 = vld [vmem:[#allocation82_spill] sm:$0xff]  ;;  %v11646_v55 = vld [vmem:[#allocation51_spill] sm:$0xff]  ;;  %v11648_v43 = vld [vmem:[#allocation28_spill] sm:$0xff]  ;;  %v9797_v12 = vpop.permute.xlu1 %4262 }
 0x1ab   :  { %11635 = vst [vmem:[#allocation7_spill] sm:$0xff] %v9745_v46  ;;  %v9759_v16 = vmul.f32 %v11641_v28, %v2136_v7  ;;  %v9766_v15 = vmul.f32 %v11644_v34, %v1476_v19  ;;  %v2105_v13 = vmul.f32 %v11645_v23, %v9448_v52  ;;  %v1445_v46 = vmul.f32 %v11646_v55, %v9448_v52  ;;  %v11647_v57 = vld [vmem:[#allocation83_spill] sm:$0xff]  ;;  %v9774_v7 = vpop.f32.mrb[105].mxu0  ;;  %v11651_v34 = vld [vmem:[#allocation86_spill] sm:$0xff]  ;;  %v9800_v20 = vpop.permute.xlu0 %4257 }
 0x1ac   :  { %11638 = vst [vmem:[#allocation20_spill] sm:$0xff] %v9751_v24  ;;  %v2103_v44 = vmul.f32 %v11647_v57, %v9448_v52  ;;  %v9777_v28 = vmul.f32 %v11648_v43, %v2134_v53  ;;  %v1463_v35 = vadd.f32 %v1447_v50, %v9469_v62  ;;  %v2617_v24 = vmul.f32 %v11651_v34, %v9448_v52  ;;  %v9784_v23 = vpop.f32.mrb[106].mxu0  ;;  %v11653_v34 = vld [vmem:[#allocation87_spill] sm:$0xff] }
 0x1ad   :  { %11642 = vst [vmem:[#allocation26_spill] sm:$0xff] %v9759_v16  ;;  %v11650_v16 = vld [vmem:[#allocation54_spill] sm:$0xff]  ;;  %v2121_v55 = vadd.f32 %v2105_v13, %v9469_v62  ;;  %v1461_v39 = vadd.f32 %v1445_v46, %v9469_v62  ;;  %v1448_v53 = vmul.f32 %v11652_v38, %v9448_v52  ;;  %v9791_v43 = vpop.f32.mrb[107].mxu0  ;;  %v2615_v45 = vmul.f32 %v11653_v34, %v9448_v52  ;;  %v11659_v34 = vld [vmem:[#allocation12_spill] sm:$0xff] }
 0x1ae   :  { %11649 = vst [vmem:[#allocation44_spill] sm:$0xff] %v9777_v28  ;;  %v1450_v19 = vmul.f32 %v11650_v16, %v9448_v52  ;;  %v2119_v57 = vadd.f32 %v2103_v44, %v9469_v62  ;;  %v1479_v50 = vmax.f32 %v1463_v35, 0.0  ;;  %v2633_v16 = vadd.f32 %v2617_v24, %v9469_v62  ;;  %11654 = vst [vmem:[#allocation9_spill] sm:$0xff] %v9797_v12  ;;  %v11656_v38 = vld [vmem:[#allocation14_spill] sm:$0xff]  ;;  %v11657_v24 = vld [vmem:[#allocation29_spill] sm:$0xff] }
 0x1af   :  { %v2137_v13 = vmax.f32 %v2121_v55, 0.0  ;;  %v1477_v4 = vmax.f32 %v1461_v39, 0.0  ;;  %v1464_v44 = vadd.f32 %v1448_v53, %v9469_v62  ;;  %11655 = vst [vmem:[#allocation74_spill] sm:$0xff] %v9800_v20  ;;  %v11660_v55 = vld [vmem:[#allocation27_spill] sm:$0xff]  ;;  %v11663_v20 = vld [vmem:[#allocation34_spill] sm:$0xff] }
 0x1b0   :  { %v1466_v28 = vadd.f32 %v1450_v19, %v9469_v62  ;;  %v2135_v46 = vmax.f32 %v2119_v57, 0.0  ;;  %v9803_v14 = vmul.f32 %v11656_v38, %v1479_v50  ;;  %v2649_v10 = vmax.f32 %v2633_v16, 0.0  ;;  %v11662_v53 = vld [vmem:[#allocation19_spill] sm:$0xff]  ;;  %v11665_v16 = vld [vmem:[#allocation57_spill] sm:$0xff] }
 0x1b1   :  { %v2631_v19 = vadd.f32 %v2615_v45, %v9469_v62  ;;  %v9807_v51 = vmul.f32 %v11657_v24, %v2137_v13  ;;  %v9810_v8 = vmul.f32 %v11659_v34, %v1477_v4  ;;  %v1480_v57 = vmax.f32 %v1464_v44, 0.0  ;;  %v11667_v13 = vld [vmem:[#allocation17_spill] sm:$0xff]  ;;  %v11669_v44 = vld [vmem:[#allocation58_spill] sm:$0xff] }
 0x1b2   :  { %v1482_v35 = vmax.f32 %v1466_v28, 0.0  ;;  %v9813_v39 = vmul.f32 %v11660_v55, %v2135_v46  ;;  %v9819_v50 = vmul.f32 %v11663_v20, %v2649_v10  ;;  %v1451_v45 = vmul.f32 %v11665_v16, %v9448_v52  ;;  %v9823_v38 = vpop.f32.mrb[108].mxu0  ;;  %v11668_v4 = vld [vmem:[#allocation89_spill] sm:$0xff]  ;;  %v11672_v10 = vld [vmem:[#allocation32_spill] sm:$0xff] }
 0x1b3   :  { %11658 = vst [vmem:[#allocation45_spill] sm:$0xff] %v9807_v51  ;;  %v2647_v28 = vmax.f32 %v2631_v19, 0.0  ;;  %11666 = vst [vmem:[#allocation46_spill] sm:$0xff] %v9823_v38  ;;  %v9826_v24 = vmul.f32 %v11667_v13, %v1480_v57  ;;  %v2618_v46 = vmul.f32 %v11668_v4, %v9448_v52  ;;  %v1449_v34 = vmul.f32 %v11669_v44, %v9448_v52  ;;  %v9834_v20 = vpop.f32.mrb[109].mxu0  ;;  %v11674_v16 = vld [vmem:[#allocation93_spill] sm:$0xff]  ;;  %v11675_v13 = vld [vmem:[#allocation94_spill] sm:$0xff] }
 0x1b4   :  { %11661 = vst [vmem:[#allocation77_spill] sm:$0xff] %v9813_v39  ;;  %v9816_v12 = vmul.f32 %v11662_v53, %v1482_v35  ;;  %11664 = vst [vmem:[#allocation24_spill] sm:$0xff] %v9819_v50  ;;  %v11670_v35 = vld [vmem:[#allocation90_spill] sm:$0xff]  ;;  %v1467_v53 = vadd.f32 %v1451_v45, %v9469_v62  ;;  %v2621_v57 = vmul.f32 %v11674_v16, %v9448_v52  ;;  %v9844_v4 = vpop.f32.mrb[110].mxu0  ;;  %v9846_v39 = vpop.permute.xlu1 %4272  ;;  %v11686_v38 = vld [vmem:[#allocation31_spill] sm:$0xff] }
 0x1b5   :  { %v2616_v55 = vmul.f32 %v11670_v35, %v9448_v52  ;;  %11671 = vst [vmem:[#allocation78_spill] sm:$0xff] %v9834_v20  ;;  %v9837_v19 = vmul.f32 %v11672_v10, %v2647_v28  ;;  %v2619_v51 = vmul.f32 %v11675_v13, %v9448_v52  ;;  %11676 = vst [vmem:[#allocation80_spill] sm:$0xff] %v9844_v4  ;;  %v11678_v28 = vld [vmem:[#allocation95_spill] sm:$0xff]  ;;  %v9853_v45 = vpop.f32.mrb[111].mxu0 }
 0x1b6   :  { %11677 = vst [vmem:[#allocation10_spill] sm:$0xff] %v9846_v39  ;;  %v2634_v44 = vadd.f32 %v2618_v46, %v9469_v62  ;;  %v1465_v35 = vadd.f32 %v1449_v34, %v9469_v62  ;;  %v2622_v10 = vmul.f32 %v11678_v28, %v9448_v52  ;;  %11679 = vst [vmem:[#allocation25_spill] sm:$0xff] %v9853_v45  ;;  %v1483_v16 = vmax.f32 %v1467_v53, 0.0  ;;  %v11681_v39 = vld [vmem:[#allocation98_spill] sm:$0xff]  ;;  %v11683_v53 = vld [vmem:[#allocation33_spill] sm:$0xff] }
 0x1b7   :  { %11673 = vst [vmem:[#allocation48_spill] sm:$0xff] %v9837_v19  ;;  %v2632_v9 = vadd.f32 %v2616_v55, %v9469_v62  ;;  %v9855_v19 = vpop.permute.xlu0 %4267  ;;  %v2637_v13 = vadd.f32 %v2621_v57, %v9469_v62  ;;  %v2635_v59 = vadd.f32 %v2619_v51, %v9469_v62  ;;  %v2620_v41 = vmul.f32 %v11681_v39, %v9448_v52  ;;  %v11685_v57 = vld [vmem:[#allocation16_spill] sm:$0xff] }
 0x1b8   :  { %11680 = vst [vmem:[#allocation8_spill] sm:$0xff] %v9855_v19  ;;  %v2650_v46 = vmax.f32 %v2634_v44, 0.0  ;;  %v1481_v56 = vmax.f32 %v1465_v35, 0.0  ;;  %v2638_v55 = vadd.f32 %v2622_v10, %v9469_v62  ;;  %v9863_v4 = vmul.f32 %v11682_v32, %v1483_v16  ;;  %v11689_v10 = vld [vmem:[#allocation36_spill] sm:$0xff] }
 0x1b9   :  { %v2648_v34 = vmax.f32 %v2632_v9, 0.0  ;;  %v2653_v28 = vmax.f32 %v2637_v13, 0.0  ;;  %v2651_v45 = vmax.f32 %v2635_v59, 0.0  ;;  %v2636_v19 = vadd.f32 %v2620_v41, %v9469_v62  ;;  %v11687_v9 = vld [vmem:[#allocation42_spill] sm:$0xff]  ;;  %v9885_v13 = vpop.permute.xlu1 %4282 }
 0x1ba   :  { %v9867_v20 = vmul.f32 %v11683_v53, %v2650_v46  ;;  %v9870_v51 = vmul.f32 %v11685_v57, %v1481_v56  ;;  %v2654_v44 = vmax.f32 %v2638_v55, 0.0  ;;  %v2625_v41 = vmul.f32 %v9513_v33, %v9448_v52  ;;  %v9883_v59 = vpop.f32.mrb[112].mxu0  ;;  %v11693_v33 = vld [vmem:[#allocation35_spill] sm:$0xff]  ;;  %v11697_v56 = vld [vmem:[#allocation53_spill] sm:$0xff] }
 0x1bb   :  { %v9873_v39 = vmul.f32 %v11686_v38, %v2648_v34  ;;  %v9876_v35 = vmul.f32 %v11687_v9, %v2653_v28  ;;  %v9879_v32 = vmul.f32 %v11689_v10, %v2651_v45  ;;  %v2652_v16 = vmax.f32 %v2636_v19, 0.0  ;;  %v11691_v38 = vld [vmem:[#allocation37_spill] sm:$0xff]  ;;  %v9896_v19 = vpop.f32.mrb[113].mxu0  ;;  %v9898_v55 = vpop.permute.xlu0 %4277 }
 0x1bc   :  { %11684 = vst [vmem:[#allocation23_spill] sm:$0xff] %v9867_v20  ;;  %v9890_v46 = vmul.f32 %v11691_v38, %v2654_v44  ;;  %v2623_v34 = vmul.f32 %v9529_v49, %v9448_v52  ;;  %v2626_v45 = vmul.f32 %v9538_v1, %v9448_v52  ;;  %v2641_v53 = vadd.f32 %v2625_v41, %v9469_v62  ;;  %v9908_v9 = vpop.f32.mrb[114].mxu0 }
 0x1bd   :  { %11688 = vst [vmem:[#allocation15_spill] sm:$0xff] %v9876_v35  ;;  %11690 = vst [vmem:[#allocation30_spill] sm:$0xff] %v9879_v32  ;;  %v9901_v28 = vmul.f32 %v11693_v33, %v2652_v16  ;;  %v1597_v57 = vpack.c.bf16 %v9684_v0, %v9642_v30  ;;  %v2624_v44 = vmul.f32 %v9547_v47, %v9448_v52  ;;  %v8063_v16 = vld [vmem:[%s11382_s4 + $0x8] sm:$0xff]   ;;  %v9919_v0 = vpop.f32.mrb[115].mxu0  ;;  %v11847_v35 = vld [vmem:[#allocation111_spill] sm:$0xff] }
 0x1be   :  { %11692 = vst [vmem:[#allocation50_spill] sm:$0xff] %v9890_v46  ;;  %v2639_v49 = vadd.f32 %v2623_v34, %v9469_v62  ;;  %v2642_v1 = vadd.f32 %v2626_v45, %v9469_v62  ;;  %v1599_v10 = vpack.c.bf16 %v9748_v11, %v9704_v2  ;;  %v2629_v41 = vmul.f32 %v9579_v63, %v9448_v52 }
 0x1bf   :  { %v2657_v30 = vmax.f32 %v2641_v53, 0.0  ;;  %7367 = vmatprep.mubr.bf16.mxu1 %v1597_v57  ;;  %v2640_v47 = vadd.f32 %v2624_v44, %v9469_v62  ;;  %v2627_v38 = vmul.f32 %v9590_v58, %v9448_v52  ;;  %v2630_v34 = vmul.f32 %v9598_v42, %v9448_v52  ;;  %v11695_v53 = vld [vmem:[#allocation52_spill] sm:$0xff] }
 0x1c0   :  { %v2655_v11 = vmax.f32 %v2639_v49, 0.0  ;;  %v2658_v2 = vmax.f32 %v2642_v1, 0.0  ;;  %v11694_v45 = vpack.c.bf16 %v9677_v31, %v9628_v61  ;;  %v2645_v63 = vadd.f32 %v2629_v41, %v9469_v62  ;;  %v9938_v49 = vpop.permute.xlu1 %4292  ;;  %v11698_v31 = vld [vmem:[#allocation47_spill] sm:$0xff]  ;;  %v11700_v1 = vld [vmem:[#allocation49_spill] sm:$0xff] }
 0x1c1   :  { %v2628_v33 = vmul.f32 %v9607_v6, %v9448_v52  ;;  %v9933_v57 = vmul.f32 %v11695_v53, %v2657_v30  ;;  %v2656_v44 = vmax.f32 %v2640_v47, 0.0  ;;  %v2643_v58 = vadd.f32 %v2627_v38, %v9469_v62  ;;  %v8064_v30 = vld [vmem:[%s11382_s4 + $0x10] sm:$0xff]   ;;  %v11704_v53 = vld [vmem:[#allocation61_spill] sm:$0xff] }
 0x1c2   :  { %7368 = vmatmul.mubr.bf16.vlgmr.msra.gmra.mrb[32].mxu1 %v11694_v45  ;;  %v2646_v42 = vadd.f32 %v2630_v34, %v9469_v62  ;;  %v9941_v61 = vmul.f32 %v11698_v31, %v2655_v11  ;;  %v9944_v41 = vmul.f32 %v11700_v1, %v2658_v2  ;;  %v2661_v6 = vmax.f32 %v2645_v63, 0.0  ;;  %v11702_v47 = vld [vmem:[#allocation43_spill] sm:$0xff]  ;;  %v9957_v2 = vpop.f32.mrb[116].mxu0 }
 0x1c3   :  { %11696 = vst [vmem:[#allocation13_spill] sm:$0xff] %v9933_v57  ;;  %7384 = vmatpush3.bf16.msra.mxu1 %v11697_v56  ;;  %7371 = vmatprep.mubr.bf16.mxu1 %v1599_v10  ;;  %v2644_v56 = vadd.f32 %v2628_v33, %v9469_v62  ;;  %v9950_v10 = vpop.permute.xlu0 %4287  ;;  %v9953_v38 = vmul.f32 %v11702_v47, %v2656_v44  ;;  %v2659_v34 = vmax.f32 %v2643_v58, 0.0  ;;  %v9966_v50 = vpop.f32.mrb[117].mxu0  ;;  %v11706_v44 = vld [vmem:[#allocation59_spill] sm:$0xff]  ;;  %v11770_v57 = vld [vmem:[#allocation120_spill] sm:$0xff] }
 0x1c4   :  { %11699 = vst [vmem:[#allocation82_spill] sm:$0xff] %v9941_v61  ;;  %11701 = vst [vmem:[#allocation51_spill] sm:$0xff] %v9944_v41  ;;  %7385 = vmatprep.subr.bf16.mxu1 %v8063_v16  ;;  %v2662_v45 = vmax.f32 %v2646_v42, 0.0  ;;  %v1600_v11 = vpack.c.bf16 %v9739_v26, %v9690_v21  ;;  %v9960_v63 = vmul.f32 %v11704_v53, %v2661_v6  ;;  %v11708_v42 = vld [vmem:[#allocation60_spill] sm:$0xff]  ;;  %v11769_v41 = vld [vmem:[#allocation114_spill] sm:$0xff] }
 0x1c5   :  { %11703 = vst [vmem:[#allocation83_spill] sm:$0xff] %v9953_v38  ;;  %v2660_v31 = vmax.f32 %v2644_v56, 0.0  ;;  %v1601_v1 = vpack.c.bf16 %v9810_v8, %v9766_v15  ;;  %v3142_v33 = vmul.f32 %v9639_v60, %v9448_v52  ;;  %v9969_v58 = vmul.f32 %v11706_v44, %v2659_v34  ;;  %v9978_v56 = vpop.f32.mrb[118].mxu0  ;;  %v11710_v8 = vld [vmem:[#allocation56_spill] sm:$0xff]  ;;  %v9999_v44 = vpop.permute.xlu1 %4302 }
 0x1c6   :  { %11705 = vst [vmem:[#allocation28_spill] sm:$0xff] %v9960_v63  ;;  %v9972_v21 = vmul.f32 %v11708_v42, %v2662_v45  ;;  %v3140_v26 = vmul.f32 %v9650_v27, %v9448_v52  ;;  %v3143_v6 = vmul.f32 %v9659_v25, %v9448_v52  ;;  %v8065_v15 = vld [vmem:[%s11382_s4 + $0x18] sm:$0xff]   ;;  %v3141_v47 = vmul.f32 %v9673_v22, %v9448_v52  ;;  %v9991_v34 = vpop.f32.mrb[119].mxu0 }
 0x1c7   :  { %7386 = vmatpush3.bf16.msra.mxu1 %v8063_v16  ;;  %11707 = vst [vmem:[#allocation54_spill] sm:$0xff] %v9969_v58  ;;  %v9981_v60 = vmul.f32 %v11710_v8, %v2660_v31  ;;  %v3158_v16 = vadd.f32 %v3142_v33, %v9469_v62  ;;  %v1602_v27 = vpack.c.bf16 %v9803_v14, %v9756_v5  ;;  %v10006_v42 = vpop.permute.xlu0 %4297  ;;  %v11772_v61 = vld [vmem:[#allocation100_spill] sm:$0xff] }
 0x1c8   :  { %11709 = vst [vmem:[#allocation86_spill] sm:$0xff] %v9972_v21  ;;  %7387 = vmatprep.subr.bf16.mxu1 %v8064_v30  ;;  %v3156_v25 = vadd.f32 %v3140_v26, %v9469_v62  ;;  %v3159_v45 = vadd.f32 %v3143_v6, %v9469_v62  ;;  %v1603_v53 = vpack.c.bf16 %v9870_v51, %v9826_v24  ;;  %v11712_v26 = vld [vmem:[#allocation65_spill] sm:$0xff] }
 0x1c9   :  { %11711 = vst [vmem:[#allocation55_spill] sm:$0xff] %v9981_v60  ;;  %v3146_v31 = vmul.f32 %v9699_v36, %v9448_v52  ;;  %v3174_v33 = vmax.f32 %v3158_v16, 0.0  ;;  %v3157_v22 = vadd.f32 %v3141_v47, %v9469_v62  ;;  %v3144_v14 = vmul.f32 %v9712_v17, %v9448_v52  ;;  %v8066_v17 = vld [vmem:[%s11382_s4 + $0x20] sm:$0xff]   ;;  %v11716_v47 = vld [vmem:[#allocation64_spill] sm:$0xff] }
 0x1ca   :  { %7372 = vmatmul.mubr.bf16.gmra.mrb[36].mxu1 %v1600_v11  ;;  %v3147_v5 = vmul.f32 %v9724_v18, %v9448_v52  ;;  %v3172_v24 = vmax.f32 %v3156_v25, 0.0  ;;  %v3175_v51 = vmax.f32 %v3159_v45, 0.0  ;;  %v3145_v11 = vmul.f32 %v9731_v54, %v9448_v52 }
 0x1cb   :  { %7388 = vmatpush3.bf16.msra.mxu1 %v8064_v30  ;;  %7375 = vmatprep.mubr.bf16.mxu1 %v1601_v1  ;;  %v3162_v36 = vadd.f32 %v3146_v31, %v9469_v62  ;;  %v10012_v6 = vmul.f32 %v11712_v26, %v3174_v33  ;;  %v3173_v18 = vmax.f32 %v3157_v22, 0.0  ;;  %v3160_v8 = vadd.f32 %v3144_v14, %v9469_v62  ;;  %v11714_v1 = vld [vmem:[#allocation63_spill] sm:$0xff]  ;;  %v10026_v31 = vpop.f32.mrb[120].mxu0  ;;  %v11718_v33 = vld [vmem:[#allocation62_spill] sm:$0xff] }
 0x1cc   :  { %7389 = vmatprep.subr.bf16.mxu1 %v8065_v15  ;;  %v3163_v30 = vadd.f32 %v3147_v5, %v9469_v62  ;;  %v10020_v16 = vmul.f32 %v11714_v1, %v3172_v24  ;;  %v10023_v25 = vmul.f32 %v11716_v47, %v3175_v51  ;;  %v3161_v45 = vadd.f32 %v3145_v11, %v9469_v62  ;;  %v10033_v5 = vpop.f32.mrb[121].mxu0  ;;  %v11720_v51 = vld [vmem:[#allocation69_spill] sm:$0xff]  ;;  %v10061_v1 = vpop.permute.xlu0 %4307  ;;  %v11726_v14 = vld [vmem:[#allocation66_spill] sm:$0xff] }
 0x1cd   :  { %11713 = vst [vmem:[#allocation87_spill] sm:$0xff] %v10012_v6  ;;  %v3178_v54 = vmax.f32 %v3162_v36, 0.0  ;;  %v10029_v26 = vmul.f32 %v11718_v33, %v3173_v18  ;;  %v3176_v20 = vmax.f32 %v3160_v8, 0.0  ;;  %v10042_v18 = vpop.f32.mrb[122].mxu0  ;;  %v10044_v8 = vpop.permute.xlu1 %4312  ;;  %v11724_v33 = vld [vmem:[#allocation68_spill] sm:$0xff] }
 0x1ce   :  { %11715 = vst [vmem:[#allocation14_spill] sm:$0xff] %v10020_v16  ;;  %11717 = vst [vmem:[#allocation29_spill] sm:$0xff] %v10023_v25  ;;  %v3179_v22 = vmax.f32 %v3163_v30, 0.0  ;;  %v3177_v11 = vmax.f32 %v3161_v45, 0.0  ;;  %v8067_v30 = vld [vmem:[%s11382_s4 + $0x28] sm:$0xff]   ;;  %v3148_v45 = vmul.f32 %v9774_v7, %v9448_v52 }
 0x1cf   :  { %11719 = vst [vmem:[#allocation12_spill] sm:$0xff] %v10029_v26  ;;  %7390 = vmatpush3.bf16.msra.mxu1 %v8065_v15  ;;  %v10038_v36 = vmul.f32 %v11720_v51, %v3178_v54  ;;  %v11722_v15 = vld [vmem:[#allocation67_spill] sm:$0xff]  ;;  %v3150_v54 = vmul.f32 %v9763_v29, %v9448_v52  ;;  %v10059_v51 = vpop.f32.mrb[123].mxu0 }
 0x1d0   :  { %7391 = vmatprep.subr.bf16.mxu1 %v8066_v17  ;;  %v10050_v47 = vmul.f32 %v11722_v15, %v3176_v20  ;;  %v10053_v24 = vmul.f32 %v11724_v33, %v3179_v22  ;;  %v10064_v6 = vmul.f32 %v11726_v14, %v3177_v11  ;;  %v3151_v20 = vmul.f32 %v9784_v23, %v9448_v52  ;;  %v11728_v33 = vld [vmem:[#allocation46_spill] sm:$0xff] }
 0x1d1   :  { %11721 = vst [vmem:[#allocation27_spill] sm:$0xff] %v10038_v36  ;;  %v3149_v22 = vmul.f32 %v9791_v43, %v9448_v52  ;;  %v3166_v29 = vadd.f32 %v3150_v54, %v9469_v62  ;;  %v3164_v7 = vadd.f32 %v3148_v45, %v9469_v62  ;;  %v3154_v25 = vmul.f32 %v11728_v33, %v9448_v52  ;;  %v11729_v14 = vld [vmem:[#allocation78_spill] sm:$0xff] }
 0x1d2   :  { %11723 = vst [vmem:[#allocation19_spill] sm:$0xff] %v10050_v47  ;;  %11725 = vst [vmem:[#allocation34_spill] sm:$0xff] %v10053_v24  ;;  %7376 = vmatmul.mubr.bf16.gmra.mrb[40].mxu1 %v1602_v27  ;;  %v3152_v11 = vmul.f32 %v11729_v14, %v9448_v52  ;;  %v3167_v23 = vadd.f32 %v3151_v20, %v9469_v62  ;;  %v11730_v24 = vld [vmem:[#allocation80_spill] sm:$0xff]  ;;  %v8068_v27 = vld [vmem:[%s11382_s4 + $0x30] sm:$0xff]  }
 0x1d3   :  { %11727 = vst [vmem:[#allocation57_spill] sm:$0xff] %v10064_v6  ;;  %7392 = vmatpush3.bf16.msra.mxu1 %v8066_v17  ;;  %7379 = vmatprep.mubr.bf16.mxu1 %v1603_v53  ;;  %v3165_v43 = vadd.f32 %v3149_v22, %v9469_v62  ;;  %v3155_v15 = vmul.f32 %v11730_v24, %v9448_v52  ;;  %v3182_v54 = vmax.f32 %v3166_v29, 0.0  ;;  %v3180_v45 = vmax.f32 %v3164_v7, 0.0  ;;  %v11731_v22 = vld [vmem:[#allocation25_spill] sm:$0xff]  ;;  %v10090_v6 = vpop.f32.mrb[124].mxu0  ;;  %v10092_v24 = vpop.permute.xlu1 %4322  ;;  %v11733_v47 = vld [vmem:[#allocation76_spill] sm:$0xff] }
 0x1d4   :  { %7393 = vmatprep.subr.bf16.mxu1 %v8067_v30  ;;  %v3170_v33 = vadd.f32 %v3154_v25, %v9469_v62  ;;  %v3168_v14 = vadd.f32 %v3152_v11, %v9469_v62  ;;  %v3183_v17 = vmax.f32 %v3167_v23, 0.0  ;;  %v3153_v36 = vmul.f32 %v11731_v22, %v9448_v52  ;;  %11732 = vst [vmem:[#allocation17_spill] sm:$0xff] %v10092_v24  ;;  %v11735_v29 = vld [vmem:[#allocation72_spill] sm:$0xff]  ;;  %v10100_v11 = vpop.f32.mrb[125].mxu0  ;;  %v10102_v23 = vpop.permute.xlu0 %4317  ;;  %v11739_v22 = vld [vmem:[#allocation71_spill] sm:$0xff] }
 0x1d5   :  { %v3181_v53 = vmax.f32 %v3165_v43, 0.0  ;;  %v3171_v20 = vadd.f32 %v3155_v15, %v9469_v62  ;;  %v10095_v26 = vmul.f32 %v11733_v47, %v3182_v54  ;;  %v10098_v7 = vmul.f32 %v11735_v29, %v3180_v45  ;;  %v11737_v15 = vld [vmem:[#allocation75_spill] sm:$0xff]  ;;  %v10111_v54 = vpop.f32.mrb[126].mxu0  ;;  %v8069_v45 = vld [vmem:[%s11382_s4 + $0x38] sm:$0xff]  }
 0x1d6   :  { %v3186_v25 = vmax.f32 %v3170_v33, 0.0  ;;  %v3184_v16 = vmax.f32 %v3168_v14, 0.0  ;;  %v10105_v43 = vmul.f32 %v11737_v15, %v3183_v17  ;;  %v3169_v47 = vadd.f32 %v3153_v36, %v9469_v62  ;;  %v11741_v33 = vld [vmem:[#allocation85_spill] sm:$0xff]  ;;  %v11745_v17 = vld [vmem:[#allocation102_spill] sm:$0xff]  ;;  %v11746_v15 = vld [vmem:[#allocation103_spill] sm:$0xff]  ;;  %v10126_v36 = vpop.f32.mrb[127].mxu0 }
 0x1d7   :  { %11734 = vst [vmem:[#allocation89_spill] sm:$0xff] %v10095_v26  ;;  %11736 = vst [vmem:[#allocation58_spill] sm:$0xff] %v10098_v7  ;;  %7394 = vmatpush3.bf16.msra.mxu1 %v8067_v30  ;;  %v10108_v21 = vmul.f32 %v11739_v22, %v3181_v53  ;;  %v3187_v63 = vmax.f32 %v3171_v20, 0.0  ;;  %v11743_v30 = vld [vmem:[#allocation81_spill] sm:$0xff]  ;;  %v11747_v22 = vld [vmem:[#allocation106_spill] sm:$0xff]  ;;  %v3667_v24 = vmul.f32 %v9883_v59, %v9448_v52 }
 0x1d8   :  { %11738 = vst [vmem:[#allocation90_spill] sm:$0xff] %v10105_v43  ;;  %7395 = vmatprep.subr.bf16.mxu1 %v8068_v27  ;;  %v10117_v14 = vmul.f32 %v11741_v33, %v3186_v25  ;;  %v10120_v29 = vmul.f32 %v11743_v30, %v3184_v16  ;;  %v11748_v20 = vld [vmem:[#allocation109_spill] sm:$0xff]  ;;  %v11749_v26 = vld [vmem:[#allocation84_spill] sm:$0xff]  ;;  %v3185_v7 = vmax.f32 %v3169_v47, 0.0  ;;  %v3665_v25 = vmul.f32 %v9896_v19, %v9448_v52  ;;  %v11755_v53 = vld [vmem:[#allocation119_spill] sm:$0xff] }
 0x1d9   :  { %11740 = vst [vmem:[#allocation32_spill] sm:$0xff] %v10108_v21  ;;  %v10129_v21 = vmul.f32 %v11749_v26, %v3187_v63  ;;  %v11751_v16 = vpack.c.bf16 %v9863_v4, %v9816_v12  ;;  %v3668_v33 = vmul.f32 %v9908_v9, %v9448_v52  ;;  %v3666_v30 = vmul.f32 %v9919_v0, %v9448_v52  ;;  %v11752_v43 = vld [vmem:[#allocation105_spill] sm:$0xff]  ;;  %v11753_v63 = vld [vmem:[#allocation107_spill] sm:$0xff] }
 0x1da   :  { %11742 = vst [vmem:[#allocation93_spill] sm:$0xff] %v10117_v14  ;;  %11744 = vst [vmem:[#allocation94_spill] sm:$0xff] %v10120_v29  ;;  %v11754_v47 = vld [vmem:[#allocation113_spill] sm:$0xff]  ;;  %v11756_v59 = vpack.c.bf16 %v9511_v3, %v9505_v37  ;;  %v11757_v19 = vld [vmem:[#allocation79_spill] sm:$0xff]  ;;  %v3683_v4 = vadd.f32 %v3667_v24, %v9469_v62  ;;  %v3681_v9 = vadd.f32 %v3665_v25, %v9469_v62  ;;  %v10165_v24 = vpop.permute.xlu0 %4327  ;;  %v10171_v26 = vpop.f32.mrb[128].mxu0 }
 0x1db   :  { %11750 = vst [vmem:[#allocation95_spill] sm:$0xff] %v10129_v21  ;;  %7380 = vmatmul.mubr.bf16.gmra.mrb[44].mxu1 %v11751_v16  ;;  %v10150_v12 = vmul.f32 %v11757_v19, %v3185_v7  ;;  %v10154_v16 = vpop.permute.xlu1 %4332  ;;  %v8070_v0 = vld [vmem:[%s11382_s4 + $0x80] sm:$0xff]   ;;  %v3682_v21 = vadd.f32 %v3666_v30, %v9469_v62  ;;  %v3671_v37 = vmul.f32 %v9957_v2, %v9448_v52 }
 0x1dc   :  { %7396 = vmatpush3.bf16.msra.mxu1 %v8068_v27  ;;  %7399 = vmatprep.mubr.bf16.mxu1 %v11756_v59  ;;  %11759 = vst [vmem:[#allocation18_spill] sm:$0xff] %v10154_v16  ;;  %v3684_v27 = vadd.f32 %v3668_v33, %v9469_v62  ;;  %v3669_v3 = vmul.f32 %v9966_v50, %v9448_v52  ;;  %v3699_v7 = vmax.f32 %v3683_v4, 0.0  ;;  %v3697_v25 = vmax.f32 %v3681_v9, 0.0  ;;  %v11760_v50 = vld [vmem:[#allocation97_spill] sm:$0xff]  ;;  %v11762_v9 = vld [vmem:[#allocation92_spill] sm:$0xff] }
 0x1dd   :  { %11758 = vst [vmem:[#allocation98_spill] sm:$0xff] %v10150_v12  ;;  %7397 = vmatprep.subr.bf16.mxu1 %v8069_v45  ;;  %v3672_v59 = vmul.f32 %v9978_v56, %v9448_v52  ;;  %v3670_v19 = vmul.f32 %v9991_v34, %v9448_v52  ;;  %v3698_v30 = vmax.f32 %v3682_v21, 0.0  ;;  %v3687_v14 = vadd.f32 %v3671_v37, %v9469_v62  ;;  %v10175_v12 = vpop.f32.mrb[129].mxu0  ;;  %v8071_v21 = vld [vmem:[%s11382_s4 + $0x88] sm:$0xff]  }
 0x1de   :  { %v3700_v33 = vmax.f32 %v3684_v27, 0.0  ;;  %v3685_v2 = vadd.f32 %v3669_v3, %v9469_v62  ;;  %v10178_v4 = vmul.f32 %v11760_v50, %v3699_v7  ;;  %v10181_v29 = vmul.f32 %v11762_v9, %v3697_v25  ;;  %v10185_v60 = vpop.f32.mrb[130].mxu0  ;;  %v11764_v27 = vld [vmem:[#allocation96_spill] sm:$0xff]  ;;  %v10217_v58 = vpop.permute.xlu0 %4782 }
 0x1df   :  { %v3688_v56 = vadd.f32 %v3672_v59, %v9469_v62  ;;  %v3686_v34 = vadd.f32 %v3670_v19, %v9469_v62  ;;  %v3703_v7 = vmax.f32 %v3687_v14, 0.0  ;;  %v10196_v50 = vpop.f32.mrb[131].mxu0  ;;  %v11767_v19 = vld [vmem:[#allocation110_spill] sm:$0xff]  ;;  %v10202_v38 = vpop.permute.xlu1 %4787  ;;  %11779 = vst [vmem:[#allocation35_spill] sm:$0xff] %v10217_v58  ;;  %v11780_v16 = vpack.c.bf16 %v9527_v48, %v9521_v40 }
 0x1e0   :  { %7398 = vmatpush3.bf16.msra.mxu1 %v8069_v45  ;;  %11761 = vst [vmem:[#allocation33_spill] sm:$0xff] %v10178_v4  ;;  %11763 = vst [vmem:[#allocation16_spill] sm:$0xff] %v10181_v29  ;;  %v10191_v37 = vmul.f32 %v11764_v27, %v3700_v33  ;;  %v11766_v45 = vld [vmem:[#allocation91_spill] sm:$0xff]  ;;  %v3701_v25 = vmax.f32 %v3685_v2, 0.0  ;;  %v11768_v29 = vld [vmem:[#allocation117_spill] sm:$0xff]  ;;  %v3676_v40 = vmul.f32 %v10042_v18, %v9448_v52 }
 0x1e1   :  { %7433 = vmatprep.subr.bf16.mxu1 %v8070_v0  ;;  %v10194_v3 = vmul.f32 %v11766_v45, %v3698_v30  ;;  %v3704_v59 = vmax.f32 %v3688_v56, 0.0  ;;  %v3702_v9 = vmax.f32 %v3686_v34, 0.0  ;;  %11771 = vst [vmem:[#allocation42_spill] sm:$0xff] %v10202_v38  ;;  %v11773_v33 = vld [vmem:[#allocation99_spill] sm:$0xff]  ;;  %v11775_v30 = vld [vmem:[#allocation112_spill] sm:$0xff]  ;;  %v3675_v45 = vmul.f32 %v10026_v31, %v9448_v52 }
 0x1e2   :  { %11765 = vst [vmem:[#allocation31_spill] sm:$0xff] %v10191_v37  ;;  %v11774_v27 = vpack.c.bf16 %v11772_v61, %v11773_v33  ;;  %v10210_v2 = vmul.f32 %v11775_v30, %v3703_v7  ;;  %v11777_v56 = vld [vmem:[#allocation104_spill] sm:$0xff]  ;;  %v3673_v7 = vmul.f32 %v10033_v5, %v9448_v52  ;;  %v8072_v31 = vld [vmem:[%s11382_s4 + $0x90] sm:$0xff]   ;;  %v3674_v48 = vmul.f32 %v10059_v51, %v9448_v52  ;;  %v10263_v38 = vpop.permute.xlu0 %4792 }
 0x1e3   :  { %v10213_v34 = vmul.f32 %v11777_v56, %v3701_v25  ;;  %v11781_v61 = vld [vmem:[#allocation108_spill] sm:$0xff]  ;;  %v3679_v5 = vmul.f32 %v10090_v6, %v9448_v52  ;;  %v3677_v30 = vmul.f32 %v10100_v11, %v9448_v52  ;;  %v3680_v56 = vmul.f32 %v10111_v54, %v9448_v52  ;;  %v10254_v54 = vpop.permute.xlu1 %4797  ;;  %11790 = vst [vmem:[#allocation43_spill] sm:$0xff] %v10263_v38 }
 0x1e4   :  { %7400 = vmatmul.mubr.bf16.vlgmr.msra.gmra.mrb[32].mxu1 %v11774_v27  ;;  %11776 = vst [vmem:[#allocation36_spill] sm:$0xff] %v10210_v2  ;;  %v10223_v33 = vmul.f32 %v11781_v61, %v3704_v59  ;;  %v11783_v27 = vld [vmem:[#allocation101_spill] sm:$0xff]  ;;  %v11786_v25 = vld [vmem:[#allocation40_spill] sm:$0xff]  ;;  %v3692_v18 = vadd.f32 %v3676_v40, %v9469_v62  ;;  %v3690_v51 = vadd.f32 %v3674_v48, %v9469_v62  ;;  %11787 = vst [vmem:[#allocation47_spill] sm:$0xff] %v10254_v54 }
 0x1e5   :  { %11778 = vst [vmem:[#allocation37_spill] sm:$0xff] %v10213_v34  ;;  %7434 = vmatpush3.bf16.msra.mxu1 %v8070_v0  ;;  %7403 = vmatprep.mubr.bf16.mxu1 %v11780_v16  ;;  %v10226_v14 = vmul.f32 %v11783_v27, %v3702_v9  ;;  %v3691_v0 = vadd.f32 %v3675_v45, %v9469_v62  ;;  %v11785_v16 = vld [vmem:[#allocation38_spill] sm:$0xff]  ;;  %v7623_v45 = vpop.f32.mrb[132].mxu0  ;;  %v11788_v40 = vld [vmem:[#allocation5_spill] sm:$0xff] }
 0x1e6   :  { %11782 = vst [vmem:[#allocation52_spill] sm:$0xff] %v10223_v33  ;;  %7435 = vmatprep.subr.bf16.mxu1 %v8071_v21  ;;  %v3689_v9 = vadd.f32 %v3673_v7, %v9469_v62  ;;  %v3678_v27 = vmul.f32 %v10126_v36, %v9448_v52  ;;  %v4143_v59 = vpop.f32.mrb[133].mxu0  ;;  %v3695_v6 = vadd.f32 %v3679_v5, %v9469_v62  ;;  %v3708_v36 = vmax.f32 %v3692_v18, 0.0  ;;  %v11794_v18 = vld [vmem:[#allocation115_spill] sm:$0xff] }
 0x1e7   :  { %11784 = vst [vmem:[#allocation53_spill] sm:$0xff] %v10226_v14  ;;  %v3707_v61 = vmax.f32 %v3691_v0, 0.0  ;;  %v3693_v4 = vadd.f32 %v3677_v30, %v9469_v62  ;;  %v3696_v11 = vadd.f32 %v3680_v56, %v9469_v62  ;;  %v7624_v37 = vpop.f32.mrb[134].mxu0  ;;  %v8073_v0 = vld [vmem:[%s11382_s4 + $0x98] sm:$0xff]   ;;  %v11792_v2 = vpack.c.bf16 %v11746_v15, %v11745_v17  ;;  %v11793_v14 = vld [vmem:[#allocation70_spill] sm:$0xff]  ;;  %v11799_v17 = vld [vmem:[#allocation73_spill] sm:$0xff] }
 0x1e8   :  { %v3705_v7 = vmax.f32 %v3689_v9, 0.0  ;;  %v3694_v9 = vadd.f32 %v3678_v27, %v9469_v62  ;;  %v4146_v5 = vpop.f32.mrb[135].mxu0  ;;  %v11791_v30 = vld [vmem:[#allocation116_spill] sm:$0xff]  ;;  %v3711_v58 = vmax.f32 %v3695_v6, 0.0 }
 0x1e9   :  { %7436 = vmatpush3.bf16.msra.mxu1 %v8071_v21  ;;  %v10260_v48 = vmul.f32 %v11788_v40, %v3707_v61  ;;  %v3706_v21 = vmax.f32 %v3690_v51, 0.0  ;;  %v3709_v54 = vmax.f32 %v3693_v4, 0.0  ;;  %v3712_v33 = vmax.f32 %v3696_v11, 0.0  ;;  %v11795_v40 = vld [vmem:[#allocation121_spill] sm:$0xff]  ;;  %v11798_v4 = vld [vmem:[#allocation11_spill] sm:$0xff] }
 0x1ea   :  { %7437 = vmatprep.subr.bf16.mxu1 %v8072_v31  ;;  %v10266_v56 = vmul.f32 %v11791_v30, %v3705_v7  ;;  %v10272_v61 = vmul.f32 %v11793_v14, %v3708_v36  ;;  %v3710_v27 = vmax.f32 %v3694_v9, 0.0  ;;  %v11797_v7 = vpack.c.bf16 %v11748_v20, %v11747_v22  ;;  %v11801_v14 = vld [vmem:[#allocation22_spill] sm:$0xff]  ;;  %v8074_v11 = vld [vmem:[%s11382_s4 + $0xa0] sm:$0xff]  }
 0x1eb   :  { %11789 = vst [vmem:[#allocation49_spill] sm:$0xff] %v10260_v48  ;;  %v10275_v51 = vmul.f32 %v11794_v18, %v3706_v21  ;;  %v11796_v48 = vld [vmem:[#allocation39_spill] sm:$0xff]  ;;  %v10283_v6 = vmul.f32 %v11798_v4, %v3711_v58  ;;  %v10286_v15 = vmul.f32 %v11799_v17, %v3709_v54  ;;  %v11802_v36 = vld [vmem:[#allocation41_spill] sm:$0xff]  ;;  %v4192_v58 = vmul.f32 %v10171_v26, %v9448_v52  ;;  %v10317_v21 = vpop.permute.xlu0 %4802 }
 0x1ec   :  { %7404 = vmatmul.mubr.bf16.gmra.mrb[36].mxu1 %v11792_v2  ;;  %v10289_v2 = vmul.f32 %v11801_v14, %v3712_v33  ;;  %v4190_v54 = vmul.f32 %v10175_v12, %v9448_v52  ;;  %v4193_v33 = vmul.f32 %v10185_v60, %v9448_v52  ;;  %v4191_v9 = vmul.f32 %v10196_v50, %v9448_v52  ;;  %v7627_v14 = vpop.f32.mrb[136].mxu0 }
 0x1ed   :  { %7438 = vmatpush3.bf16.msra.mxu1 %v8072_v31  ;;  %7407 = vmatprep.mubr.bf16.mxu1 %v11797_v7  ;;  %11800 = vst [vmem:[#allocation61_spill] sm:$0xff] %v10286_v15  ;;  %v10295_v31 = vmul.f32 %v11802_v36, %v3710_v27  ;;  %v10311_v36 = vpop.permute.xlu1 %4807  ;;  %v4208_v26 = vadd.f32 %v4192_v58, %v9469_v62  ;;  %v4159_v38 = vpop.f32.mrb[137].mxu0  ;;  %11810 = vst [vmem:[#allocation60_spill] sm:$0xff] %v10317_v21 }
 0x1ee   :  { %7439 = vmatprep.subr.bf16.mxu1 %v8073_v0  ;;  %11809 = vst [vmem:[#allocation59_spill] sm:$0xff] %v10311_v36  ;;  %v4206_v20 = vadd.f32 %v4190_v54, %v9469_v62  ;;  %v4196_v12 = vmul.f32 %v7623_v45, %v9448_v52  ;;  %v4194_v60 = vmul.f32 %v4143_v59, %v9448_v52  ;;  %v7628_v4 = vpop.f32.mrb[138].mxu0  ;;  %v8075_v45 = vld [vmem:[%s11382_s4 + $0xa8] sm:$0xff]   ;;  %v11812_v36 = vld [vmem:[#allocation8_spill] sm:$0xff] }
 0x1ef   :  { %v4209_v50 = vadd.f32 %v4193_v33, %v9469_v62  ;;  %v4207_v7 = vadd.f32 %v4191_v9, %v9469_v62  ;;  %v4197_v17 = vmul.f32 %v7624_v37, %v9448_v52  ;;  %v4195_v27 = vmul.f32 %v4146_v5, %v9448_v52  ;;  %v4162_v30 = vpop.f32.mrb[139].mxu0 }
 0x1f0   :  { %v4224_v58 = vmax.f32 %v4208_v26, 0.0  ;;  %v4222_v59 = vmax.f32 %v4206_v20, 0.0  ;;  %v4212_v54 = vadd.f32 %v4196_v12, %v9469_v62  ;;  %v11811_v5 = vpack.c.bf16 %v11753_v63, %v11752_v43  ;;  %v11814_v26 = vld [vmem:[#allocation74_spill] sm:$0xff] }
 0x1f1   :  { %7440 = vmatpush3.bf16.msra.mxu1 %v8073_v0  ;;  %v4210_v0 = vadd.f32 %v4194_v60, %v9469_v62  ;;  %v4225_v33 = vmax.f32 %v4209_v50, 0.0  ;;  %v4223_v18 = vmax.f32 %v4207_v7, 0.0  ;;  %v4213_v9 = vadd.f32 %v4197_v17, %v9469_v62  ;;  %v11816_v17 = vld [vmem:[#allocation10_spill] sm:$0xff] }
 0x1f2   :  { %7441 = vmatprep.subr.bf16.mxu1 %v8074_v11  ;;  %v4211_v37 = vadd.f32 %v4195_v27, %v9469_v62  ;;  %v10334_v21 = vmul.f32 %v11812_v36, %v4224_v58  ;;  %v10337_v20 = vmul.f32 %v11814_v26, %v4222_v59  ;;  %v4228_v12 = vmax.f32 %v4212_v54, 0.0  ;;  %v11818_v27 = vld [vmem:[#allocation9_spill] sm:$0xff]  ;;  %v10348_v36 = vpop.permute.xlu1 %4817  ;;  %v8076_v58 = vld [vmem:[%s11382_s4 + $0xb0] sm:$0xff]  }
 0x1f3   :  { %v4226_v22 = vmax.f32 %v4210_v0, 0.0  ;;  %v11815_v7 = vpack.c.bf16 %v11755_v53, %v11754_v47  ;;  %v10343_v60 = vmul.f32 %v11816_v17, %v4225_v33  ;;  %v10346_v50 = vmul.f32 %v11818_v27, %v4223_v18  ;;  %v11820_v47 = vld [vmem:[#allocation26_spill] sm:$0xff]  ;;  %v11821_v59 = vld [vmem:[#allocation45_spill] sm:$0xff]  ;;  %v11822_v18 = vld [vmem:[#allocation48_spill] sm:$0xff]  ;;  %v10363_v33 = vpop.permute.xlu0 %4812 }
 0x1f4   :  { %7408 = vmatmul.mubr.bf16.gmra.mrb[40].mxu1 %v11811_v5  ;;  %11813 = vst [vmem:[#allocation56_spill] sm:$0xff] %v10334_v21  ;;  %v4229_v43 = vmax.f32 %v4213_v9, 0.0  ;;  %v4227_v63 = vmax.f32 %v4211_v37, 0.0  ;;  %v4198_v5 = vmul.f32 %v4159_v38, %v9448_v52  ;;  %v4201_v26 = vmul.f32 %v7628_v4, %v9448_v52  ;;  %v8077_v38 = vld [vmem:[%s11382_s4 + $0xb8] sm:$0xff]   ;;  %v11842_v21 = vld [vmem:[#allocation58_spill] sm:$0xff]  ;;  %v11862_v34 = vld [vmem:[#allocation49_spill] sm:$0xff] }
 0x1f5   :  { %7442 = vmatpush3.bf16.msra.mxu1 %v8074_v11  ;;  %7411 = vmatprep.mubr.bf16.mxu1 %v11815_v7  ;;  %11817 = vst [vmem:[#allocation65_spill] sm:$0xff] %v10343_v60  ;;  %v10354_v11 = vmul.f32 %v9950_v10, %v4228_v12  ;;  %v10357_v53 = vmul.f32 %v9898_v55, %v4226_v22  ;;  %v7631_v22 = vpop.f32.mrb[140].mxu0 }
 0x1f6   :  { %7443 = vmatprep.subr.bf16.mxu1 %v8075_v45  ;;  %v10368_v37 = vmul.f32 %v9938_v49, %v4229_v43  ;;  %v10371_v10 = vmul.f32 %v9885_v13, %v4227_v63  ;;  %v4200_v55 = vmul.f32 %v7627_v14, %v9448_v52  ;;  %v4199_v12 = vmul.f32 %v4162_v30, %v9448_v52  ;;  %v4175_v17 = vpop.f32.mrb[141].mxu0  ;;  %v10394_v7 = vpop.permute.xlu1 %4827 }
 0x1f7   :  { %11819 = vst [vmem:[#allocation63_spill] sm:$0xff] %v10354_v11  ;;  %v4204_v27 = vmul.f32 %v7631_v22, %v9448_v52  ;;  %v4202_v13 = vmul.f32 %v4175_v17, %v9448_v52  ;;  %v7632_v43 = vpop.f32.mrb[142].mxu0  ;;  %v4214_v30 = vadd.f32 %v4198_v5, %v9469_v62  ;;  %v4217_v4 = vadd.f32 %v4201_v26, %v9469_v62 }
 0x1f8   :  { %v4216_v49 = vadd.f32 %v4200_v55, %v9469_v62  ;;  %v4205_v63 = vmul.f32 %v7632_v43, %v9448_v52  ;;  %v4178_v55 = vpop.f32.mrb[143].mxu0  ;;  %v11823_v0 = vpack.c.bf16 %v11768_v29, %v11767_v19  ;;  %v10400_v43 = vpop.permute.xlu0 %4822  ;;  %v8078_v19 = vld [vmem:[%s11382_s4 + $0xc0] sm:$0xff]  }
 0x1f9   :  { %7444 = vmatpush3.bf16.msra.mxu1 %v8075_v45  ;;  %v4215_v45 = vadd.f32 %v4199_v12, %v9469_v62  ;;  %v4220_v17 = vadd.f32 %v4204_v27, %v9469_v62  ;;  %v4218_v9 = vadd.f32 %v4202_v13, %v9469_v62  ;;  %v4203_v14 = vmul.f32 %v4178_v55, %v9448_v52 }
 0x1fa   :  { %7445 = vmatprep.subr.bf16.mxu1 %v8076_v58  ;;  %v4232_v22 = vmax.f32 %v4216_v49, 0.0  ;;  %v4230_v5 = vmax.f32 %v4214_v30, 0.0  ;;  %v4233_v26 = vmax.f32 %v4217_v4, 0.0  ;;  %v4221_v12 = vadd.f32 %v4205_v63, %v9469_v62  ;;  %v7669_v63 = vpop.f32.mrb[144].mxu0  ;;  %v10445_v60 = vpop.permute.xlu1 %4837 }
 0x1fb   :  { %v4231_v54 = vmax.f32 %v4215_v45, 0.0  ;;  %v11824_v49 = vpack.c.bf16 %v11770_v57, %v11769_v41  ;;  %v4236_v13 = vmax.f32 %v4220_v17, 0.0  ;;  %v4234_v55 = vmax.f32 %v4218_v9, 0.0  ;;  %v4652_v17 = vpop.f32.mrb[145].mxu0 }
 0x1fc   :  { %7412 = vmatmul.mubr.bf16.gmra.mrb[44].mxu1 %v11823_v0  ;;  %v10406_v27 = vmul.f32 %v10061_v1, %v4232_v22  ;;  %v4219_v29 = vadd.f32 %v4203_v14, %v9469_v62  ;;  %v10413_v0 = vmul.f32 %v10006_v42, %v4230_v5  ;;  %v4237_v41 = vmax.f32 %v4221_v12, 0.0  ;;  %v11828_v42 = vld [vmem:[#allocation18_spill] sm:$0xff]  ;;  %v10456_v45 = vpop.permute.xlu0 %4832  ;;  %v11851_v5 = vld [vmem:[#allocation93_spill] sm:$0xff] }
 0x1fd   :  { %7446 = vmatpush3.bf16.msra.mxu1 %v8076_v58  ;;  %7449 = vmatprep.mubr.bf16.mxu1 %v11824_v49  ;;  %v10416_v58 = vmul.f32 %v10044_v8, %v4233_v26  ;;  %v10419_v57 = vmul.f32 %v9999_v44, %v4231_v54  ;;  %v10422_v1 = vmul.f32 %v10165_v24, %v4236_v13  ;;  %v8079_v12 = vld [vmem:[%s11382_s4 + $0xc8] sm:$0xff]   ;;  %v11843_v44 = vld [vmem:[#allocation32_spill] sm:$0xff] }
 0x1fe   :  { %7447 = vmatprep.subr.bf16.mxu1 %v8077_v38  ;;  %v10425_v9 = vmul.f32 %v10102_v23, %v4234_v55  ;;  %v4235_v14 = vmax.f32 %v4219_v29, 0.0  ;;  %v10430_v22 = vmul.f32 %v11828_v42, %v4237_v41  ;;  %v4717_v8 = vmul.f32 %v7669_v63, %v9448_v52  ;;  %v11833_v23 = vld [vmem:[#allocation17_spill] sm:$0xff]  ;;  %v7670_v55 = vpop.f32.mrb[146].mxu0  ;;  %v11849_v29 = vld [vmem:[#allocation94_spill] sm:$0xff] }
 0x1ff   :  { %v4715_v13 = vmul.f32 %v4652_v17, %v9448_v52  ;;  %v11850_v24 = vld [vmem:[#allocation98_spill] sm:$0xff] }
 0x200   :  { %11825 = vst [vmem:[#allocation64_spill] sm:$0xff] %v10425_v9  ;;  %v10438_v49 = vmul.f32 %v11833_v23, %v4235_v14  ;;  %v4718_v14 = vmul.f32 %v7670_v55, %v9448_v52  ;;  %v4655_v23 = vpop.f32.mrb[147].mxu0  ;;  %v11846_v55 = vld [vmem:[#allocation118_spill] sm:$0xff] }
 0x201   :  { %7448 = vmatpush3.bf16.msra.mxu1 %v8077_v38  ;;  %v4733_v38 = vadd.f32 %v4717_v8, %v9469_v62  ;;  %v4731_v63 = vadd.f32 %v4715_v13, %v9469_v62  ;;  %v4716_v42 = vmul.f32 %v4655_v23, %v9448_v52  ;;  %v11845_v8 = vld [vmem:[#allocation90_spill] sm:$0xff]  ;;  %v11848_v46 = vpack.c.bf16 %v11846_v55, %v11847_v35  ;;  %v11852_v13 = vld [vmem:[#allocation95_spill] sm:$0xff] }
 0x202   :  { %7483 = vmatprep.subr.bf16.mxu1 %v8078_v19  ;;  %v4734_v17 = vadd.f32 %v4718_v14, %v9469_v62  ;;  %v11853_v23 = vpack.c.bf16 %v11786_v25, %v11785_v16  ;;  %v8080_v14 = vld [vmem:[%s11382_s4 + $0xd0] sm:$0xff]   ;;  %v11859_v25 = vld [vmem:[#allocation52_spill] sm:$0xff] }
 0x203   :  { %v4749_v26 = vmax.f32 %v4733_v38, 0.0  ;;  %v4747_v54 = vmax.f32 %v4731_v63, 0.0  ;;  %v4732_v4 = vadd.f32 %v4716_v42, %v9469_v62  ;;  %v11856_v55 = vld [vmem:[#allocation43_spill] sm:$0xff]  ;;  %v7673_v38 = vpop.f32.mrb[148].mxu0 }
 0x204   :  { %7450 = vmatmul.mubr.bf16.vlgmr.msra.gmra.mrb[32].mxu1 %v11848_v46  ;;  %v4750_v32 = vmax.f32 %v4734_v17, 0.0  ;;  %v11863_v17 = vld [vmem:[#allocation47_spill] sm:$0xff]  ;;  %v4721_v63 = vmul.f32 %v7673_v38, %v9448_v52  ;;  %v4668_v16 = vpop.f32.mrb[149].mxu0  ;;  %v11865_v46 = vld [vmem:[#allocation42_spill] sm:$0xff] }
 0x205   :  { %7484 = vmatpush3.bf16.msra.mxu1 %v8078_v19  ;;  %7453 = vmatprep.mubr.bf16.mxu1 %v11853_v23  ;;  %v10484_v19 = vmul.f32 %v11856_v55, %v4749_v26  ;;  %v11860_v23 = vld [vmem:[#allocation35_spill] sm:$0xff]  ;;  %v4748_v41 = vmax.f32 %v4732_v4, 0.0  ;;  %v10497_v26 = vpop.permute.xlu1 %4847  ;;  %v4719_v30 = vmul.f32 %v4668_v16, %v9448_v52  ;;  %v7674_v15 = vpop.f32.mrb[150].mxu0 }
 0x206   :  { %7485 = vmatprep.subr.bf16.mxu1 %v8079_v12  ;;  %v10491_v35 = vmul.f32 %v11860_v23, %v4747_v54  ;;  %v10500_v55 = vmul.f32 %v11863_v17, %v4750_v32  ;;  %v10507_v23 = vpop.permute.xlu0 %4842  ;;  %v8081_v17 = vld [vmem:[%s11382_s4 + $0xd8] sm:$0xff]   ;;  %v4671_v16 = vpop.f32.mrb[151].mxu0 }
 0x207   :  { %11857 = vst [vmem:[#allocation62_spill] sm:$0xff] %v10484_v19  ;;  %v10510_v42 = vmul.f32 %v11865_v46, %v4748_v41  ;;  %v4737_v41 = vadd.f32 %v4721_v63, %v9469_v62  ;;  %v4722_v46 = vmul.f32 %v7674_v15, %v9448_v52  ;;  %v4735_v32 = vadd.f32 %v4719_v30, %v9469_v62  ;;  %v11869_v19 = vld [vmem:[#allocation6_spill] sm:$0xff]  ;;  %v11874_v30 = vld [vmem:[#allocation59_spill] sm:$0xff] }
 0x208   :  { %11861 = vst [vmem:[#allocation69_spill] sm:$0xff] %v10491_v35  ;;  %11864 = vst [vmem:[#allocation67_spill] sm:$0xff] %v10500_v55  ;;  %v4720_v38 = vmul.f32 %v4671_v16, %v9448_v52  ;;  %v11868_v16 = vld [vmem:[#allocation20_spill] sm:$0xff] }
 0x209   :  { %7486 = vmatpush3.bf16.msra.mxu1 %v8079_v12  ;;  %11866 = vst [vmem:[#allocation68_spill] sm:$0xff] %v10510_v42  ;;  %v11867_v12 = vpack.c.bf16 %v11796_v48, %v11795_v40  ;;  %v4753_v63 = vmax.f32 %v4737_v41, 0.0  ;;  %v4738_v15 = vadd.f32 %v4722_v46, %v9469_v62  ;;  %v11870_v54 = vpack.c.bf16 %v11868_v16, %v11869_v19  ;;  %v10544_v9 = vpop.permute.xlu1 %4857  ;;  %v8082_v48 = vld [vmem:[%s11382_s4 + $0xe0] sm:$0xff]  }
 0x20a   :  { %7487 = vmatprep.subr.bf16.mxu1 %v8080_v14  ;;  %v4751_v55 = vmax.f32 %v4735_v32, 0.0  ;;  %v4736_v11 = vadd.f32 %v4720_v38, %v9469_v62  ;;  %v7677_v46 = vpop.f32.mrb[152].mxu0  ;;  %v11873_v38 = vld [vmem:[#allocation60_spill] sm:$0xff] }
 0x20b   :  { %v4754_v40 = vmax.f32 %v4738_v15, 0.0  ;;  %v4684_v32 = vpop.f32.mrb[153].mxu0 }
 0x20c   :  { %7454 = vmatmul.mubr.bf16.gmra.mrb[36].mxu1 %v11867_v12  ;;  %v10549_v12 = vpop.permute.xlu0 %4852  ;;  %v4752_v41 = vmax.f32 %v4736_v11, 0.0  ;;  %v10559_v16 = vmul.f32 %v11873_v38, %v4751_v55  ;;  %v4723_v15 = vmul.f32 %v4684_v32, %v9448_v52  ;;  %v7678_v11 = vpop.f32.mrb[154].mxu0  ;;  %v11875_v32 = vld [vmem:[#allocation7_spill] sm:$0xff]  ;;  %v11876_v38 = vld [vmem:[#allocation21_spill] sm:$0xff] }
 0x20d   :  { %7488 = vmatpush3.bf16.msra.mxu1 %v8080_v14  ;;  %7457 = vmatprep.mubr.bf16.mxu1 %v11870_v54  ;;  %v10552_v14 = vmul.f32 %v10363_v33, %v4753_v63  ;;  %v10555_v19 = vmul.f32 %v10348_v36, %v4754_v40  ;;  %v4725_v54 = vmul.f32 %v7677_v46, %v9448_v52  ;;  %v8083_v33 = vld [vmem:[%s11382_s4 + $0xe8] sm:$0xff]   ;;  %v4687_v40 = vpop.f32.mrb[155].mxu0  ;;  %v10576_v46 = vpop.permute.xlu1 %5312  ;;  %v11878_v55 = vld [vmem:[#allocation77_spill] sm:$0xff] }
 0x20e   :  { %7489 = vmatprep.subr.bf16.mxu1 %v8081_v17  ;;  %v10562_v4 = vmul.f32 %v11874_v30, %v4752_v41  ;;  %v4726_v63 = vmul.f32 %v7678_v11, %v9448_v52  ;;  %v4724_v30 = vmul.f32 %v4687_v40, %v9448_v52  ;;  %v11877_v35 = vpack.c.bf16 %v11875_v32, %v11876_v38  ;;  %v8084_v41 = vld [vmem:[%s11382_s4 + $0xf0] sm:$0xff]  }
 0x20f   :  { %11871 = vst [vmem:[#allocation66_spill] sm:$0xff] %v10552_v14  ;;  %11872 = vst [vmem:[#allocation46_spill] sm:$0xff] %v10555_v19  ;;  %v4741_v36 = vadd.f32 %v4725_v54, %v9469_v62  ;;  %v11879_v14 = vld [vmem:[#allocation44_spill] sm:$0xff] }
 0x210   :  { %v4742_v11 = vadd.f32 %v4726_v63, %v9469_v62  ;;  %v10582_v42 = vpop.permute.xlu0 %5307  ;;  %v4740_v19 = vadd.f32 %v4724_v30, %v9469_v62 }
 0x211   :  { %7490 = vmatpush3.bf16.msra.mxu1 %v8081_v17  ;;  %v4739_v17 = vadd.f32 %v4723_v15, %v9469_v62  ;;  %v4757_v54 = vmax.f32 %v4741_v36, 0.0  ;;  %v11880_v15 = vpack.c.bf16 %v11878_v55, %v11879_v14 }
 0x212   :  { %7491 = vmatprep.subr.bf16.mxu1 %v8082_v48  ;;  %v4758_v32 = vmax.f32 %v4742_v11, 0.0  ;;  %v7681_v36 = vpop.f32.mrb[156].mxu0  ;;  %v5323_v11 = vpop.permute.xlu1 %5322 }
 0x213   :  { %v4755_v40 = vmax.f32 %v4739_v17, 0.0  ;;  %v10592_v63 = vmul.f32 %v10456_v45, %v4757_v54  ;;  %v4729_v14 = vmul.f32 %v7681_v36, %v9448_v52  ;;  %v4700_v55 = vpop.f32.mrb[157].mxu0 }
 0x214   :  { %7458 = vmatmul.mubr.bf16.gmra.mrb[40].mxu1 %v11877_v35  ;;  %v4756_v35 = vmax.f32 %v4740_v19, 0.0  ;;  %v4727_v38 = vmul.f32 %v4700_v55, %v9448_v52  ;;  %v7682_v19 = vpop.f32.mrb[158].mxu0  ;;  %v11882_v55 = vpack.c.bf16 %v9873_v39, %v11822_v18 }
 0x215   :  { %7492 = vmatpush3.bf16.msra.mxu1 %v8082_v48  ;;  %7461 = vmatprep.mubr.bf16.mxu1 %v11880_v15  ;;  %v10595_v48 = vmul.f32 %v10445_v60, %v4758_v32  ;;  %v10599_v17 = vmul.f32 %v10400_v43, %v4755_v40  ;;  %v8085_v60 = vld [vmem:[%s11382_s4 + $0xf8] sm:$0xff]   ;;  %v4745_v45 = vadd.f32 %v4729_v14, %v9469_v62  ;;  %v5318_v15 = vpop.permute.xlu0 %5317 }
 0x216   :  { %7493 = vmatprep.subr.bf16.mxu1 %v8083_v33  ;;  %v10602_v30 = vmul.f32 %v10394_v7, %v4756_v35  ;;  %v4730_v54 = vmul.f32 %v7682_v19, %v9448_v52  ;;  %v4743_v7 = vadd.f32 %v4727_v38, %v9469_v62  ;;  %v11881_v35 = vpack.c.bf16 %v11821_v59, %v11820_v47  ;;  %v10627_v59 = vpop.permute.xlu1 %5332 }
 0x217   :  { %v4761_v36 = vmax.f32 %v4745_v45, 0.0 }
 0x218   :  { %v4746_v14 = vadd.f32 %v4730_v54, %v9469_v62  ;;  %v4759_v19 = vmax.f32 %v4743_v7, 0.0 }
 0x219   :  { %7494 = vmatpush3.bf16.msra.mxu1 %v8083_v33  ;;  %v4703_v33 = vpop.f32.mrb[159].mxu0  ;;  %v10630_v45 = vmul.f32 %v10549_v12, %v4761_v36  ;;  %v10636_v54 = vpop.permute.xlu0 %5327 }
 0x21a   :  { %7495 = vmatprep.subr.bf16.mxu1 %v8084_v41  ;;  %v4728_v40 = vmul.f32 %v4703_v33, %v9448_v52  ;;  %v8086_v33 = vld [vmem:[%s11382_s4 + $0x100] sm:$0xff]   ;;  %v4762_v43 = vmax.f32 %v4746_v14, 0.0  ;;  %v7719_v47 = vpop.f32.mrb[160].mxu0  ;;  %v10639_v7 = vmul.f32 %v10507_v23, %v4759_v19  ;;  %v11886_v19 = vld [vmem:[#allocation24_spill] sm:$0xff] }
 0x21b   :  { %11883 = vst [vmem:[#allocation78_spill] sm:$0xff] %v10630_v45  ;;  %v5242_v39 = vmul.f32 %v7719_v47, %v9448_v52  ;;  %v5177_v18 = vpop.f32.mrb[161].mxu0  ;;  %v5343_v45 = vpop.permute.xlu1 %5342 }
 0x21c   :  { %7462 = vmatmul.mubr.bf16.gmra.mrb[44].mxu1 %v11881_v35  ;;  %v4744_v38 = vadd.f32 %v4728_v40, %v9469_v62  ;;  %v5240_v35 = vmul.f32 %v5177_v18, %v9448_v52  ;;  %v7720_v14 = vpop.f32.mrb[162].mxu0  ;;  %v11888_v18 = vld [vmem:[#allocation30_spill] sm:$0xff] }
 0x21d   :  { %7496 = vmatpush3.bf16.msra.mxu1 %v8084_v41  ;;  %7499 = vmatprep.mubr.bf16.mxu1 %v11882_v55  ;;  %v10633_v41 = vmul.f32 %v10544_v9, %v4762_v43  ;;  %v8087_v9 = vld [vmem:[%s11382_s4 + $0x108] sm:$0xff]   ;;  %v5258_v12 = vadd.f32 %v5242_v39, %v9469_v62  ;;  %v5243_v43 = vmul.f32 %v7720_v14, %v9448_v52  ;;  %v5180_v36 = vpop.f32.mrb[163].mxu0  ;;  %v11885_v55 = vld [vmem:[#allocation23_spill] sm:$0xff] }
 0x21e   :  { %7497 = vmatprep.subr.bf16.mxu1 %v8085_v60  ;;  %v4760_v32 = vmax.f32 %v4744_v38, 0.0  ;;  %v11887_v38 = vpack.c.bf16 %v11885_v55, %v11886_v19  ;;  %v11889_v14 = vpack.c.bf16 %v9901_v28, %v11888_v18  ;;  %v5338_v55 = vpop.permute.xlu0 %5337 }
 0x21f   :  { %11884 = vst [vmem:[#allocation80_spill] sm:$0xff] %v10633_v41  ;;  %v5274_v47 = vmax.f32 %v5258_v12, 0.0  ;;  %v5259_v39 = vadd.f32 %v5243_v43, %v9469_v62 }
 0x220   :  { %v10642_v40 = vmul.f32 %v10497_v26, %v4760_v32  ;;  %v5241_v26 = vmul.f32 %v5180_v36, %v9448_v52  ;;  %v8088_v36 = vld [vmem:[%s11382_s4 + $0x110] sm:$0xff]  }
 0x221   :  { %7498 = vmatpush3.bf16.msra.mxu1 %v8085_v60  ;;  %v5256_v60 = vadd.f32 %v5240_v35, %v9469_v62  ;;  %v5275_v32 = vmax.f32 %v5259_v39, 0.0 }
 0x222   :  { %7533 = vmatprep.subr.bf16.mxu1 %v8086_v33  ;;  %v5257_v35 = vadd.f32 %v5241_v26, %v9469_v62  ;;  %v7723_v12 = vpop.f32.mrb[164].mxu0 }
 0x223   :  { %v5272_v23 = vmax.f32 %v5256_v60, 0.0  ;;  %v5246_v28 = vmul.f32 %v7723_v12, %v9448_v52  ;;  %v5193_v43 = vpop.f32.mrb[165].mxu0 }
 0x224   :  { %7500 = vmatmul.mubr.bf16.vlgmr.msra.gmra.mrb[32].mxu1 %v11887_v38  ;;  %v5273_v19 = vmax.f32 %v5257_v35, 0.0  ;;  %v10667_v38 = vmul.f32 %v5318_v15, %v5274_v47  ;;  %v5244_v18 = vmul.f32 %v5193_v43, %v9448_v52  ;;  %v7724_v39 = vpop.f32.mrb[166].mxu0  ;;  %v8089_v15 = vld [vmem:[%s11382_s4 + $0x118] sm:$0xff]   ;;  %v11894_v35 = vld [vmem:[#allocation50_spill] sm:$0xff]  ;;  %v8090_v47 = vld [vmem:[%s11382_s4 + $0x120] sm:$0xff]  }
 0x225   :  { %7534 = vmatpush3.bf16.msra.mxu1 %v8086_v33  ;;  %7503 = vmatprep.mubr.bf16.mxu1 %v11889_v14  ;;  %v10669_v33 = vmul.f32 %v5323_v11, %v5275_v32  ;;  %v10673_v60 = vmul.f32 %v10582_v42, %v5272_v23  ;;  %v5262_v32 = vadd.f32 %v5246_v28, %v9469_v62  ;;  %v5196_v42 = vpop.f32.mrb[167].mxu0  ;;  %v5353_v14 = vpop.permute.xlu1 %5352  ;;  %v11897_v28 = vld [vmem:[#allocation83_spill] sm:$0xff] }
 0x226   :  { %7535 = vmatprep.subr.bf16.mxu1 %v8087_v9  ;;  %11890 = vst [vmem:[#allocation25_spill] sm:$0xff] %v10667_v38  ;;  %v10676_v26 = vmul.f32 %v10576_v46, %v5273_v19  ;;  %v5260_v23 = vadd.f32 %v5244_v18, %v9469_v62  ;;  %v5245_v46 = vmul.f32 %v5196_v42, %v9448_v52  ;;  %v11895_v19 = vld [vmem:[#allocation15_spill] sm:$0xff]  ;;  %v5348_v38 = vpop.permute.xlu0 %5347 }
 0x227   :  { %11891 = vst [vmem:[#allocation76_spill] sm:$0xff] %v10669_v33  ;;  %11892 = vst [vmem:[#allocation72_spill] sm:$0xff] %v10673_v60  ;;  %v11896_v12 = vpack.c.bf16 %v11894_v35, %v11895_v19  ;;  %v5278_v43 = vmax.f32 %v5262_v32, 0.0 }
 0x228   :  { %11893 = vst [vmem:[#allocation75_spill] sm:$0xff] %v10676_v26  ;;  %v5276_v18 = vmax.f32 %v5260_v23, 0.0  ;;  %v5261_v42 = vadd.f32 %v5245_v46, %v9469_v62  ;;  %v11906_v26 = vld [vmem:[#allocation54_spill] sm:$0xff] }
 0x229   :  { %7536 = vmatpush3.bf16.msra.mxu1 %v8087_v9  ;;  %v5247_v9 = vmul.f32 %v7724_v39, %v9448_v52  ;;  %v11898_v39 = vld [vmem:[#allocation82_spill] sm:$0xff]  ;;  %v10701_v32 = vmul.f32 %v5338_v55, %v5278_v43 }
 0x22a   :  { %7537 = vmatprep.subr.bf16.mxu1 %v8088_v36  ;;  %v11899_v33 = vpack.c.bf16 %v11897_v28, %v11898_v39  ;;  %v5277_v35 = vmax.f32 %v5261_v42, 0.0  ;;  %v7727_v19 = vpop.f32.mrb[168].mxu0  ;;  %v5358_v43 = vpop.permute.xlu0 %5357  ;;  %v11902_v42 = vld [vmem:[#allocation51_spill] sm:$0xff] }
 0x22b   :  { %v5263_v11 = vadd.f32 %v5247_v9, %v9469_v62  ;;  %11900 = vst [vmem:[#allocation71_spill] sm:$0xff] %v10701_v32 }
 0x22c   :  { %7504 = vmatmul.mubr.bf16.gmra.mrb[36].mxu1 %v11896_v12  ;;  %v5209_v12 = vpop.f32.mrb[169].mxu0  ;;  %v10710_v23 = vmul.f32 %v10627_v59, %v5277_v35  ;;  %v11903_v35 = vld [vmem:[#allocation13_spill] sm:$0xff] }
 0x22d   :  { %7538 = vmatpush3.bf16.msra.mxu1 %v8088_v36  ;;  %7507 = vmatprep.mubr.bf16.mxu1 %v11899_v33  ;;  %v5279_v60 = vmax.f32 %v5263_v11, 0.0  ;;  %v5250_v36 = vmul.f32 %v7727_v19, %v9448_v52  ;;  %v10707_v33 = vmul.f32 %v10636_v54, %v5276_v18  ;;  %v5248_v46 = vmul.f32 %v5209_v12, %v9448_v52  ;;  %v7728_v28 = vpop.f32.mrb[170].mxu0  ;;  %v5363_v11 = vpop.permute.xlu1 %5362 }
 0x22e   :  { %7539 = vmatprep.subr.bf16.mxu1 %v8089_v15  ;;  %v11904_v19 = vpack.c.bf16 %v11902_v42, %v11903_v35 }
 0x22f   :  { %v10703_v9 = vmul.f32 %v5343_v45, %v5279_v60  ;;  %v8091_v45 = vld [vmem:[%s11382_s4 + $0x128] sm:$0xff]   ;;  %v5266_v55 = vadd.f32 %v5250_v36, %v9469_v62  ;;  %v5251_v60 = vmul.f32 %v7728_v28, %v9448_v52  ;;  %v5264_v59 = vadd.f32 %v5248_v46, %v9469_v62  ;;  %v11905_v28 = vld [vmem:[#allocation55_spill] sm:$0xff] }
 0x230   :  { %v11907_v41 = vpack.c.bf16 %v11905_v28, %v11906_v26 }
 0x231   :  { %11901 = vst [vmem:[#allocation85_spill] sm:$0xff] %v10703_v9  ;;  %7540 = vmatpush3.bf16.msra.mxu1 %v8089_v15  ;;  %v5212_v15 = vpop.f32.mrb[171].mxu0  ;;  %v5282_v12 = vmax.f32 %v5266_v55, 0.0  ;;  %v5267_v36 = vadd.f32 %v5251_v60, %v9469_v62  ;;  %v5280_v54 = vmax.f32 %v5264_v59, 0.0  ;;  %v5373_v35 = vpop.permute.xlu1 %5372 }
 0x232   :  { %7541 = vmatprep.subr.bf16.mxu1 %v8090_v47  ;;  %v5249_v39 = vmul.f32 %v5212_v15, %v9448_v52  ;;  %v8092_v15 = vld [vmem:[%s11382_s4 + $0x130] sm:$0xff]   ;;  %v7731_v42 = vpop.f32.mrb[172].mxu0 }
 0x233   :  { %v5283_v18 = vmax.f32 %v5267_v36, 0.0  ;;  %v10735_v55 = vmul.f32 %v5358_v43, %v5282_v12  ;;  %v5225_v26 = vpop.f32.mrb[173].mxu0  ;;  %v10740_v59 = vmul.f32 %v5348_v38, %v5280_v54  ;;  %v8093_v43 = vld [vmem:[%s11382_s4 + $0x138] sm:$0xff]   ;;  %v11908_v54 = vld [vmem:[#allocation86_spill] sm:$0xff] }
 0x234   :  { %7508 = vmatmul.mubr.bf16.gmra.mrb[40].mxu1 %v11904_v19  ;;  %v5265_v46 = vadd.f32 %v5249_v39, %v9469_v62  ;;  %v5252_v19 = vmul.f32 %v5225_v26, %v9448_v52  ;;  %v7732_v28 = vpop.f32.mrb[174].mxu0  ;;  %v11909_v36 = vld [vmem:[#allocation28_spill] sm:$0xff] }
 0x235   :  { %7542 = vmatpush3.bf16.msra.mxu1 %v8090_v47  ;;  %7511 = vmatprep.mubr.bf16.mxu1 %v11907_v41  ;;  %v10737_v60 = vmul.f32 %v5363_v11, %v5283_v18  ;;  %v5254_v47 = vmul.f32 %v7731_v42, %v9448_v52  ;;  %v5368_v41 = vpop.permute.xlu0 %5367  ;;  %v5255_v18 = vmul.f32 %v7732_v28, %v9448_v52  ;;  %v5228_v12 = vpop.f32.mrb[175].mxu0  ;;  %v11911_v26 = vld [vmem:[#allocation12_spill] sm:$0xff]  ;;  %v11912_v28 = vld [vmem:[#allocation14_spill] sm:$0xff] }
 0x236   :  { %7543 = vmatprep.subr.bf16.mxu1 %v8091_v45  ;;  %v5281_v32 = vmax.f32 %v5265_v46, 0.0  ;;  %v5268_v38 = vadd.f32 %v5252_v19, %v9469_v62  ;;  %v11910_v46 = vpack.c.bf16 %v11908_v54, %v11909_v36  ;;  %v11913_v9 = vpack.c.bf16 %v11911_v26, %v11912_v28  ;;  %v11920_v26 = vld [vmem:[#allocation34_spill] sm:$0xff]  ;;  %v11921_v28 = vld [vmem:[#allocation27_spill] sm:$0xff] }
 0x237   :  { %v5270_v11 = vadd.f32 %v5254_v47, %v9469_v62  ;;  %v5271_v47 = vadd.f32 %v5255_v18, %v9469_v62 }
 0x238   :  { %v10742_v39 = vmul.f32 %v5353_v14, %v5281_v32  ;;  %v5253_v14 = vmul.f32 %v5228_v12, %v9448_v52  ;;  %v8094_v52 = vld [vmem:[%s11382_s4 + $0x140] sm:$0xff]   ;;  %v5383_v32 = vpop.permute.xlu1 %5382 }
 0x239   :  { %7544 = vmatpush3.bf16.msra.mxu1 %v8091_v45  ;;  %v5286_v42 = vmax.f32 %v5270_v11, 0.0  ;;  %v5284_v45 = vmax.f32 %v5268_v38, 0.0  ;;  %v5287_v12 = vmax.f32 %v5271_v47, 0.0  ;;  %v5378_v54 = vpop.permute.xlu0 %5377  ;;  %v8097_v47 = vld [vmem:[%s11382_s4 + $0x158] sm:$0xff]  }
 0x23a   :  { %7545 = vmatprep.subr.bf16.mxu1 %v8092_v15  ;;  %v5269_v19 = vadd.f32 %v5253_v14, %v9469_v62  ;;  %v8095_v62 = vld [vmem:[%s11382_s4 + $0x148] sm:$0xff]  }
 0x23b   :  { %v10767_v11 = vmul.f32 %v5378_v54, %v5286_v42  ;;  %v10769_v18 = vmul.f32 %v5383_v32, %v5287_v12  ;;  %v11915_v42 = vld [vmem:[#allocation87_spill] sm:$0xff]  ;;  %v8098_v12 = vld [vmem:[%s11382_s4 + $0x160] sm:$0xff]   ;;  %v8099_v54 = vld [vmem:[%s11382_s4 + $0x168] sm:$0xff]  }
 0x23c   :  { %7512 = vmatmul.mubr.bf16.gmra.mrb[44].mxu1 %v11910_v46  ;;  %v5285_v36 = vmax.f32 %v5269_v19, 0.0  ;;  %v11914_v46 = vld [vmem:[#allocation29_spill] sm:$0xff]  ;;  %v11922_v19 = vpack.c.bf16 %v11920_v26, %v11921_v28  ;;  %v11936_v26 = vld [vmem:[#allocation36_spill] sm:$0xff] }
 0x23d   :  { %7546 = vmatpush3.bf16.msra.mxu1 %v8092_v15  ;;  %7549 = vmatprep.mubr.bf16.mxu1 %v11913_v9  ;;  %v10771_v15 = vmul.f32 %v5368_v41, %v5284_v45  ;;  %v5408_v38 = vpack.c.bf16 %v10769_v18, %v10767_v11  ;;  %v11916_v32 = vpack.c.bf16 %v11914_v46, %v11915_v42  ;;  %v11917_v41 = vld [vmem:[#allocation57_spill] sm:$0xff]  ;;  %v8096_v45 = vld [vmem:[%s11382_s4 + $0x150] sm:$0xff]   ;;  %v8101_v46 = vld [vmem:[%s11382_s4 + $0x178] sm:$0xff]  }
 0x23e   :  { %7547 = vmatprep.subr.bf16.mxu1 %v8093_v43  ;;  %v10773_v9 = vmul.f32 %v5373_v35, %v5285_v36  ;;  %v11924_v36 = vld [vmem:[#allocation89_spill] sm:$0xff]  ;;  %v11928_v42 = vld [vmem:[#allocation16_spill] sm:$0xff]  ;;  %v11937_v28 = vpack.c.bf16 %v11859_v25, %v11936_v26  ;;  %v11939_v25 = vpack.c.bf16 %v10272_v61, %v11862_v34  ;;  %v11942_v34 = vpack.c.bf16 %v10289_v2, %v10283_v6  ;;  %v8150_v11 = vld [vmem:[%s11379_s1 + $0x128] sm:$0xff]  }
 0x23f   :  { %v11943_v61 = vpack.c.bf16 %v10346_v50, %v10337_v20  ;;  %v11947_v2 = vpack.c.bf16 %v10371_v10, %v10357_v53  ;;  %v8112_v20 = vld [vmem:[%s11382_s4 + $0x1d0] sm:$0xff]   ;;  %v8113_v50 = vld [vmem:[%s11382_s4 + $0x1d8] sm:$0xff]   ;;  %v11950_v53 = vpack.c.bf16 %v10419_v57, %v10413_v0  ;;  %v8114_v10 = vld [vmem:[%s11382_s4 + $0x1e0] sm:$0xff]  }
 0x240   :  { %v5407_v14 = vpack.c.bf16 %v10773_v9, %v10771_v15  ;;  %v8116_v57 = vld [vmem:[%s11382_s4 + $0x1f0] sm:$0xff]   ;;  %v8152_v15 = vld [vmem:[%s11379_s1 + $0x138] sm:$0xff]   ;;  %v8127_v9 = vld [vmem:[%s11383_s5] sm:$0xff]  }
 0x241   :  { %7548 = vmatpush3.bf16.msra.mxu1 %v8093_v43  ;;  %v11918_v43 = vld [vmem:[#allocation19_spill] sm:$0xff]  ;;  %7765 = vmatprep.subr.bf16.mxu0 %v8127_v9 }
 0x242   :  { %7583 = vmatprep.subr.bf16.mxu1 %v8094_v52  ;;  %v11919_v35 = vpack.c.bf16 %v11917_v41, %v11918_v43  ;;  %v11930_v41 = vld [vmem:[#allocation31_spill] sm:$0xff]  ;;  %v11931_v43 = vld [vmem:[#allocation33_spill] sm:$0xff]  ;;  %7766 = vmatpush3.bf16.msra.mxu0 %v8127_v9 }
 0x243   :  { %v8151_v18 = vld [vmem:[%s11379_s1 + $0x130] sm:$0xff]  }
 0x244   :  { %7550 = vmatmul.mubr.bf16.vlgmr.msra.gmra.mrb[32].mxu1 %v11916_v32  ;;  %v8103_v32 = vld [vmem:[%s11382_s4 + $0x188] sm:$0xff]  }
 0x245   :  { %7584 = vmatpush3.bf16.msra.mxu1 %v8094_v52  ;;  %7553 = vmatprep.mubr.bf16.mxu1 %v11919_v35  ;;  %v11923_v52 = vpack.c.bf16 %v11843_v44, %v11842_v21  ;;  %v11926_v21 = vpack.c.bf16 %v11850_v24, %v11849_v29  ;;  %v8100_v44 = vld [vmem:[%s11382_s4 + $0x170] sm:$0xff]   ;;  %v11929_v24 = vpack.c.bf16 %v10194_v3, %v11928_v42  ;;  %v8102_v29 = vld [vmem:[%s11382_s4 + $0x180] sm:$0xff]   ;;  %v8115_v42 = vld [vmem:[%s11382_s4 + $0x1e8] sm:$0xff]  }
 0x246   :  { %7585 = vmatprep.subr.bf16.mxu1 %v8095_v62  ;;  %v11934_v35 = vld [vmem:[#allocation37_spill] sm:$0xff] }
 0x249   :  { %7586 = vmatpush3.bf16.msra.mxu1 %v8095_v62  ;;  %v11925_v62 = vpack.c.bf16 %v11845_v8, %v11924_v36  ;;  %v11927_v8 = vpack.c.bf16 %v11852_v13, %v11851_v5  ;;  %v11932_v5 = vpack.c.bf16 %v11930_v41, %v11931_v43  ;;  %v11933_v13 = vld [vmem:[#allocation53_spill] sm:$0xff]  ;;  %v8109_v36 = vld [vmem:[%s11382_s4 + $0x1b8] sm:$0xff]   ;;  %v8119_v43 = vld [vmem:[%s11382_s4 + $0x208] sm:$0xff]  }
 0x24a   :  { %7587 = vmatprep.subr.bf16.mxu1 %v8096_v45  ;;  %v11935_v3 = vpack.c.bf16 %v11933_v13, %v11934_v35  ;;  %v8118_v41 = vld [vmem:[%s11382_s4 + $0x200] sm:$0xff]   ;;  %v11959_v13 = vld [vmem:[#allocation62_spill] sm:$0xff]  ;;  %v8120_v35 = vld [vmem:[%s11382_s4 + $0x210] sm:$0xff]  }
 0x24c   :  { %7554 = vmatmul.mubr.bf16.gmra.mrb[36].mxu1 %v11922_v19  ;;  %v11938_v19 = vpack.c.bf16 %v10275_v51, %v10266_v56  ;;  %v8108_v51 = vld [vmem:[%s11382_s4 + $0x1b0] sm:$0xff]  }
 0x24d   :  { %7588 = vmatpush3.bf16.msra.mxu1 %v8096_v45  ;;  %7557 = vmatprep.mubr.bf16.mxu1 %v11923_v52  ;;  %v8104_v45 = vld [vmem:[%s11382_s4 + $0x190] sm:$0xff]   ;;  %v8106_v52 = vld [vmem:[%s11382_s4 + $0x1a0] sm:$0xff]  }
 0x24e   :  { %7589 = vmatprep.subr.bf16.mxu1 %v8097_v47 }
 0x251   :  { %7590 = vmatpush3.bf16.msra.mxu1 %v8097_v47  ;;  %v8105_v47 = vld [vmem:[%s11382_s4 + $0x198] sm:$0xff]  }
 0x252   :  { %7591 = vmatprep.subr.bf16.mxu1 %v8098_v12 }
 0x254   :  { %7558 = vmatmul.mubr.bf16.gmra.mrb[40].mxu1 %v11925_v62  ;;  %v8111_v62 = vld [vmem:[%s11382_s4 + $0x1c8] sm:$0xff]  }
 0x255   :  { %7592 = vmatpush3.bf16.msra.mxu1 %v8098_v12  ;;  %7561 = vmatprep.mubr.bf16.mxu1 %v11926_v21  ;;  %v8107_v12 = vld [vmem:[%s11382_s4 + $0x1a8] sm:$0xff]   ;;  %v11944_v21 = vld [vmem:[#allocation65_spill] sm:$0xff] }
 0x256   :  { %7593 = vmatprep.subr.bf16.mxu1 %v8099_v54 }
 0x259   :  { %7594 = vmatpush3.bf16.msra.mxu1 %v8099_v54  ;;  %v11940_v54 = vld [vmem:[#allocation61_spill] sm:$0xff] }
 0x25a   :  { %7595 = vmatprep.subr.bf16.mxu1 %v8100_v44  ;;  %v11941_v56 = vpack.c.bf16 %v10295_v31, %v11940_v54  ;;  %v8110_v31 = vld [vmem:[%s11382_s4 + $0x1c0] sm:$0xff]   ;;  %v11972_v54 = vld [vmem:[#allocation72_spill] sm:$0xff] }
 0x25c   :  { %7562 = vmatmul.mubr.bf16.gmra.mrb[44].mxu1 %v11927_v8 }
 0x25d   :  { %7596 = vmatpush3.bf16.msra.mxu1 %v8100_v44  ;;  %7599 = vmatprep.mubr.bf16.mxu1 %v11929_v24  ;;  %v11945_v44 = vld [vmem:[#allocation56_spill] sm:$0xff] }
 0x25e   :  { %7597 = vmatprep.subr.bf16.mxu1 %v8101_v46  ;;  %v11946_v6 = vpack.c.bf16 %v11944_v21, %v11945_v44  ;;  %v11952_v24 = vld [vmem:[#allocation64_spill] sm:$0xff]  ;;  %v11982_v21 = vpack.c.bf16 %v10737_v60, %v10735_v55  ;;  %v8146_v55 = vld [vmem:[%s11379_s1 + $0x108] sm:$0xff]   ;;  %v8147_v60 = vld [vmem:[%s11379_s1 + $0x110] sm:$0xff]  }
 0x25f   :  { %v11953_v0 = vpack.c.bf16 %v10438_v49, %v11952_v24  ;;  %v8130_v44 = vld [vmem:[%s11383_s5 + $0x18] sm:$0xff]  }
 0x261   :  { %7598 = vmatpush3.bf16.msra.mxu1 %v8101_v46  ;;  %v11948_v46 = vld [vmem:[#allocation63_spill] sm:$0xff] }
 0x262   :  { %7633 = vmatprep.subr.bf16.mxu1 %v8102_v29  ;;  %v11949_v8 = vpack.c.bf16 %v10368_v37, %v11948_v46  ;;  %v11951_v37 = vpack.c.bf16 %v10416_v58, %v10406_v27  ;;  %v11954_v27 = vpack.c.bf16 %v10430_v22, %v10422_v1  ;;  %v11955_v58 = vld [vmem:[#allocation68_spill] sm:$0xff]  ;;  %v11961_v22 = vpack.c.bf16 %v10562_v4, %v10559_v16  ;;  %v8122_v16 = vld [vmem:[%s11382_s4 + $0x220] sm:$0xff]  }
 0x263   :  { %v11965_v4 = vpack.c.bf16 %v10602_v30, %v10599_v17  ;;  %v11967_v17 = vpack.c.bf16 %v10642_v40, %v10639_v7  ;;  %v8124_v30 = vld [vmem:[%s11382_s4 + $0x230] sm:$0xff]   ;;  %v11974_v40 = vld [vmem:[#allocation76_spill] sm:$0xff] }
 0x264   :  { %7600 = vmatmul.mubr.bf16.vlgmr.msra.gmra.mrb[32].mxu1 %v11932_v5  ;;  %v11958_v5 = vld [vmem:[#allocation67_spill] sm:$0xff] }
 0x265   :  { %7634 = vmatpush3.bf16.msra.mxu1 %v8102_v29  ;;  %7603 = vmatprep.mubr.bf16.mxu1 %v11935_v3  ;;  %v8117_v29 = vld [vmem:[%s11382_s4 + $0x1f8] sm:$0xff]   ;;  %v11960_v1 = vpack.c.bf16 %v11958_v5, %v11959_v13 }
 0x266   :  { %7635 = vmatprep.subr.bf16.mxu1 %v8103_v32  ;;  %v8121_v3 = vld [vmem:[%s11382_s4 + $0x218] sm:$0xff]  }
 0x269   :  { %7636 = vmatpush3.bf16.msra.mxu1 %v8103_v32  ;;  %v11956_v32 = vld [vmem:[#allocation69_spill] sm:$0xff] }
 0x26a   :  { %7637 = vmatprep.subr.bf16.mxu1 %v8104_v45  ;;  %v11957_v49 = vpack.c.bf16 %v11955_v58, %v11956_v32 }
 0x26c   :  { %7604 = vmatmul.mubr.bf16.gmra.mrb[36].mxu1 %v11937_v28  ;;  %v8123_v28 = vld [vmem:[%s11382_s4 + $0x228] sm:$0xff]  }
 0x26d   :  { %7638 = vmatpush3.bf16.msra.mxu1 %v8104_v45  ;;  %7607 = vmatprep.mubr.bf16.mxu1 %v11938_v19  ;;  %v11962_v45 = vld [vmem:[#allocation46_spill] sm:$0xff]  ;;  %v11966_v19 = vpack.c.bf16 %v10595_v48, %v10592_v63  ;;  %v11971_v48 = vld [vmem:[#allocation75_spill] sm:$0xff] }
 0x26e   :  { %7639 = vmatprep.subr.bf16.mxu1 %v8105_v47  ;;  %v11973_v7 = vpack.c.bf16 %v11971_v48, %v11972_v54 }
 0x271   :  { %7640 = vmatpush3.bf16.msra.mxu1 %v8105_v47  ;;  %v11963_v47 = vld [vmem:[#allocation66_spill] sm:$0xff] }
 0x272   :  { %7641 = vmatprep.subr.bf16.mxu1 %v8106_v52  ;;  %v11964_v26 = vpack.c.bf16 %v11962_v45, %v11963_v47 }
 0x274   :  { %7608 = vmatmul.mubr.bf16.gmra.mrb[40].mxu1 %v11939_v25  ;;  %v11969_v25 = vld [vmem:[#allocation78_spill] sm:$0xff] }
 0x275   :  { %7642 = vmatpush3.bf16.msra.mxu1 %v8106_v52  ;;  %7611 = vmatprep.mubr.bf16.mxu1 %v11941_v56  ;;  %v8125_v52 = vld [vmem:[%s11382_s4 + $0x238] sm:$0xff]   ;;  %v11975_v56 = vld [vmem:[#allocation25_spill] sm:$0xff] }
 0x276   :  { %7643 = vmatprep.subr.bf16.mxu1 %v8107_v12 }
 0x279   :  { %7644 = vmatpush3.bf16.msra.mxu1 %v8107_v12  ;;  %v11968_v12 = vld [vmem:[#allocation80_spill] sm:$0xff] }
 0x27a   :  { %7645 = vmatprep.subr.bf16.mxu1 %v8108_v51  ;;  %v11970_v63 = vpack.c.bf16 %v11968_v12, %v11969_v25 }
 0x27c   :  { %7612 = vmatmul.mubr.bf16.gmra.mrb[44].mxu1 %v11942_v34  ;;  %v11978_v34 = vld [vmem:[#allocation85_spill] sm:$0xff] }
 0x27d   :  { %7646 = vmatpush3.bf16.msra.mxu1 %v8108_v51  ;;  %7649 = vmatprep.mubr.bf16.mxu1 %v11943_v61  ;;  %v11976_v51 = vpack.c.bf16 %v11974_v40, %v11975_v56  ;;  %v11979_v61 = vld [vmem:[#allocation71_spill] sm:$0xff] }
 0x27e   :  { %7647 = vmatprep.subr.bf16.mxu1 %v8109_v36 }
 0x281   :  { %7648 = vmatpush3.bf16.msra.mxu1 %v8109_v36  ;;  %v11977_v36 = vpack.c.bf16 %v10710_v23, %v10707_v33  ;;  %v8145_v33 = vld [vmem:[%s11379_s1 + $0x100] sm:$0xff]  }
 0x282   :  { %7683 = vmatprep.subr.bf16.mxu1 %v8110_v31  ;;  %v8126_v23 = vld [vmem:[%s11384_s6] sm:$0xff]  }
 0x284   :  { %7650 = vmatmul.mubr.bf16.vlgmr.msra.gmra.mrb[32].mxu1 %v11946_v6  ;;  %v8131_v6 = vld [vmem:[%s11383_s5 + $0x20] sm:$0xff]  }
 0x285   :  { %7684 = vmatpush3.bf16.msra.mxu1 %v8110_v31  ;;  %7653 = vmatprep.mubr.bf16.mxu1 %v11947_v2  ;;  %v11980_v31 = vpack.c.bf16 %v11978_v34, %v11979_v61  ;;  %v8132_v2 = vld [vmem:[%s11383_s5 + $0x28] sm:$0xff]  }
 0x286   :  { %7685 = vmatprep.subr.bf16.mxu1 %v8111_v62 }
 0x289   :  { %7686 = vmatpush3.bf16.msra.mxu1 %v8111_v62  ;;  %v11981_v62 = vpack.c.bf16 %v10742_v39, %v10740_v59  ;;  %v8148_v59 = vld [vmem:[%s11379_s1 + $0x118] sm:$0xff]   ;;  %v8149_v39 = vld [vmem:[%s11379_s1 + $0x120] sm:$0xff]  }
 0x28a   :  { %7687 = vmatprep.subr.bf16.mxu1 %v8112_v20 }
 0x28c   :  { %7654 = vmatmul.mubr.bf16.gmra.mrb[36].mxu1 %v11949_v8 }
 0x28d   :  { %7688 = vmatpush3.bf16.msra.mxu1 %v8112_v20  ;;  %7657 = vmatprep.mubr.bf16.mxu1 %v11950_v53  ;;  %v8133_v20 = vld [vmem:[%s11383_s5 + $0x30] sm:$0xff]  }
 0x28e   :  { %7689 = vmatprep.subr.bf16.mxu1 %v8113_v50 }
 0x291   :  { %7690 = vmatpush3.bf16.msra.mxu1 %v8113_v50  ;;  %v8134_v50 = vld [vmem:[%s11383_s5 + $0x38] sm:$0xff]  }
 0x292   :  { %7691 = vmatprep.subr.bf16.mxu1 %v8114_v10 }
 0x294   :  { %7658 = vmatmul.mubr.bf16.gmra.mrb[40].mxu1 %v11951_v37 }
 0x295   :  { %7692 = vmatpush3.bf16.msra.mxu1 %v8114_v10  ;;  %7661 = vmatprep.mubr.bf16.mxu1 %v11953_v0 }
 0x296   :  { %7693 = vmatprep.subr.bf16.mxu1 %v8115_v42 }
 0x299   :  { %7694 = vmatpush3.bf16.msra.mxu1 %v8115_v42 }
 0x29a   :  { %7695 = vmatprep.subr.bf16.mxu1 %v8116_v57 }
 0x29c   :  { %7662 = vmatmul.mubr.bf16.gmra.mrb[44].mxu1 %v11954_v27 }
 0x29d   :  { %7696 = vmatpush3.bf16.msra.mxu1 %v8116_v57  ;;  %7699 = vmatprep.mubr.bf16.mxu1 %v11957_v49 }
 0x29e   :  { %7697 = vmatprep.subr.bf16.mxu1 %v8117_v29 }
 0x2a1   :  { %7698 = vmatpush3.bf16.msra.mxu1 %v8117_v29 }
 0x2a2   :  { %7733 = vmatprep.subr.bf16.mxu1 %v8118_v41 }
 0x2a4   :  { %7700 = vmatmul.mubr.bf16.vlgmr.msra.gmra.mrb[32].mxu1 %v11960_v1 }
 0x2a5   :  { %7734 = vmatpush3.bf16.msra.mxu1 %v8118_v41  ;;  %7703 = vmatprep.mubr.bf16.mxu1 %v11961_v22 }
 0x2a6   :  { %7735 = vmatprep.subr.bf16.mxu1 %v8119_v43 }
 0x2a9   :  { %7736 = vmatpush3.bf16.msra.mxu1 %v8119_v43 }
 0x2aa   :  { %7737 = vmatprep.subr.bf16.mxu1 %v8120_v35 }
 0x2ac   :  { %7704 = vmatmul.mubr.bf16.gmra.mrb[36].mxu1 %v11964_v26 }
 0x2ad   :  { %7738 = vmatpush3.bf16.msra.mxu1 %v8120_v35  ;;  %7707 = vmatprep.mubr.bf16.mxu1 %v11965_v4 }
 0x2ae   :  { %7739 = vmatprep.subr.bf16.mxu1 %v8121_v3 }
 0x2b1   :  { %7740 = vmatpush3.bf16.msra.mxu1 %v8121_v3 }
 0x2b2   :  { %7741 = vmatprep.subr.bf16.mxu1 %v8122_v16 }
 0x2b4   :  { %7708 = vmatmul.mubr.bf16.gmra.mrb[40].mxu1 %v11966_v19 }
 0x2b5   :  { %7742 = vmatpush3.bf16.msra.mxu1 %v8122_v16  ;;  %7711 = vmatprep.mubr.bf16.mxu1 %v11967_v17 }
 0x2b6   :  { %7743 = vmatprep.subr.bf16.mxu1 %v8123_v28 }
 0x2b9   :  { %7744 = vmatpush3.bf16.msra.mxu1 %v8123_v28 }
 0x2ba   :  { %7745 = vmatprep.subr.bf16.mxu1 %v8124_v30 }
 0x2bc   :  { %7712 = vmatmul.mubr.bf16.gmra.mrb[44].mxu1 %v11970_v63 }
 0x2bd   :  { %7746 = vmatpush3.bf16.msra.mxu1 %v8124_v30  ;;  %7749 = vmatprep.mubr.bf16.mxu1 %v11973_v7 }
 0x2be   :  { %7747 = vmatprep.subr.bf16.mxu1 %v8125_v52 }
 0x2c1   :  { %7748 = vmatpush3.bf16.msra.mxu1 %v8125_v52 }
 0x2c2   :  { %7797 = vmatprep.subr.bf16.mxu1 %v8126_v23 }
 0x2c4   :  { %7750 = vmatmul.mubr.bf16.vlgmr.msra.gmra.mrb[32].mxu1 %v11976_v51 }
 0x2c5   :  { %7753 = vmatprep.mubr.bf16.mxu1 %v11977_v36  ;;  %7798 = vmatpush3.bf16.msra.mxu1 %v8126_v23 }
 0x2cc   :  { %7754 = vmatmul.mubr.bf16.gmra.mrb[36].mxu1 %v11980_v31 }
 0x2cd   :  { %7757 = vmatprep.mubr.bf16.mxu1 %v11981_v62 }
 0x2d4   :  { %7758 = vmatmul.mubr.bf16.gmra.mrb[40].mxu1 %v11982_v21 }
 0x2d5   :  { %7761 = vmatprep.mubr.bf16.mxu1 %v5407_v14  ;;  %v8129_v14 = vld [vmem:[%s11383_s5 + $0x10] sm:$0xff]  }
 0x2dc   :  { %7762 = vmatmul.mubr.bf16.gmra.mrb[44].mxu1 %v5408_v38  ;;  %v8128_v38 = vld [vmem:[%s11383_s5 + $0x8] sm:$0xff]  }
 0x2dd   :  { %7799 = vmatprep.mubr.msk.bf16.mxu1 %vm284_vm0, %v8145_v33  ;;  %7767 = vmatprep.subr.bf16.mxu0 %v8128_v38 }
 0x2de   :  { %7768 = vmatpush3.bf16.msra.mxu0 %v8128_v38 }
 0x2df   :  { %7769 = vmatprep.subr.bf16.mxu0 %v8129_v14 }
 0x2e2   :  { %7770 = vmatpush3.bf16.msra.mxu0 %v8129_v14 }
 0x2e3   :  { %7771 = vmatprep.subr.bf16.mxu0 %v8130_v44 }
 0x2e4   :  { %7800 = vmatmul.mubr.msk.bf16.vlgmr.msra.gmra.mrb[48].mxu1 %vm284_vm0, %v8146_v55 }
 0x2e5   :  { %7803 = vmatprep.mubr.msk.bf16.mxu1 %vm284_vm0, %v8147_v60 }
 0x2e6   :  { %7772 = vmatpush3.bf16.msra.mxu0 %v8130_v44 }
 0x2e7   :  { %7773 = vmatprep.subr.bf16.mxu0 %v8131_v6 }
 0x2ea   :  { %7774 = vmatpush3.bf16.msra.mxu0 %v8131_v6 }
 0x2eb   :  { %7775 = vmatprep.subr.bf16.mxu0 %v8132_v2 }
 0x2ec   :  { %7804 = vmatmul.mubr.msk.bf16.gmra.mrb[52].mxu1 %vm284_vm0, %v8148_v59 }
 0x2ed   :  { %7807 = vmatprep.mubr.msk.bf16.mxu1 %vm284_vm0, %v8149_v39 }
 0x2ee   :  { %7776 = vmatpush3.bf16.msra.mxu0 %v8132_v2 }
 0x2ef   :  { %7777 = vmatprep.subr.bf16.mxu0 %v8133_v20 }
 0x2f2   :  { %7778 = vmatpush3.bf16.msra.mxu0 %v8133_v20 }
 0x2f3   :  { %7779 = vmatprep.subr.bf16.mxu0 %v8134_v50 }
 0x2f4   :  { %7808 = vmatmul.mubr.msk.bf16.gmra.mrb[56].mxu1 %vm284_vm0, %v8150_v11 }
 0x2f5   :  { %7811 = vmatprep.mubr.msk.bf16.mxu1 %vm284_vm0, %v8151_v18 }
 0x2f6   :  { %7780 = vmatpush3.bf16.msra.mxu0 %v8134_v50 }
 0x2fc   :  { %7812 = vmatmul.mubr.msk.bf16.gmra.mrb[60].mxu1 %vm284_vm0, %v8152_v15 }
 0x397   :  { %v11048_v46 = vpop.f32.mrb[32].mxu1 }
 0x398   :  { %v11050_v8 = vpop.f32.mrb[33].mxu1  ;;  %v5612_v0 = vmul.f32 %v11048_v46, %v11048_v46 }
 0x399   :  { %v11052_v53 = vpop.f32.mrb[34].mxu1  ;;  %v5610_v42 = vmul.f32 %v11050_v8, %v11050_v8 }
 0x39a   :  { %v11054_v10 = vpop.f32.mrb[35].mxu1  ;;  %v5613_v27 = vmul.f32 %v11052_v53, %v11052_v53 }
 0x39b   :  { %v5587_v37 = vadd.f32 %v11054_v10, %v11050_v8  ;;  %v5611_v24 = vmul.f32 %v11054_v10, %v11054_v10 }
 0x39d   :  { %v5588_v57 = vadd.f32 %v11048_v46, %v5587_v37  ;;  %v5626_v29 = vadd.f32 %v5611_v24, %v5610_v42 }
 0x39f   :  { %v5627_v58 = vadd.f32 %v5626_v29, %v5612_v0  ;;  %v11067_v32 = vpop.f32.mrb[36].mxu1  ;;  %v5589_v49 = vadd.f32 %v11052_v53, %v5588_v57 }
 0x3a0   :  { %v11070_v41 = vpop.f32.mrb[37].mxu1  ;;  %v5616_v47 = vmul.f32 %v11067_v32, %v11067_v32 }
 0x3a1   :  { %v5590_v43 = vadd.f32 %v5589_v49, %v11070_v41  ;;  %v5614_v5 = vmul.f32 %v11070_v41, %v11070_v41  ;;  %v5628_v13 = vadd.f32 %v5627_v58, %v5613_v27  ;;  %v11075_v1 = vpop.f32.mrb[38].mxu1 }
 0x3a2   :  { %v11077_v22 = vpop.f32.mrb[39].mxu1  ;;  %v5617_v16 = vmul.f32 %v11075_v1, %v11075_v1 }
 0x3a3   :  { %v5629_v35 = vadd.f32 %v5628_v13, %v5614_v5  ;;  %v5591_v3 = vadd.f32 %v5590_v43, %v11077_v22  ;;  %v5615_v45 = vmul.f32 %v11077_v22, %v11077_v22 }
 0x3a5   :  { %v5592_v26 = vadd.f32 %v11067_v32, %v5591_v3  ;;  %v5630_v4 = vadd.f32 %v5629_v35, %v5615_v45 }
 0x3a7   :  { %v5631_v28 = vadd.f32 %v5630_v4, %v5616_v47  ;;  %v11087_v19 = vpop.f32.mrb[40].mxu1  ;;  %v5593_v17 = vadd.f32 %v11075_v1, %v5592_v26  ;;  %v5651_v26 = vld [vmem:[%s11387_s9] sm:$0x1] }
 0x3a8   :  { %v11090_v30 = vpop.f32.mrb[41].mxu1  ;;  %v5620_v56 = vmul.f32 %v11087_v19, %v11087_v19 }
 0x3a9   :  { %v5594_v52 = vadd.f32 %v5593_v17, %v11090_v30  ;;  %v5618_v12 = vmul.f32 %v11090_v30, %v11090_v30  ;;  %v5632_v25 = vadd.f32 %v5631_v28, %v5617_v16  ;;  %v11095_v63 = vpop.f32.mrb[42].mxu1  ;;  %v5655_v28 = vld [vmem:[%s11388_s10] sm:$0x1] }
 0x3aa   :  { %v11097_v48 = vpop.f32.mrb[43].mxu1  ;;  %v5621_v34 = vmul.f32 %v11095_v63, %v11095_v63 }
 0x3ab   :  { %v5633_v54 = vadd.f32 %v5632_v25, %v5618_v12  ;;  %v5595_v7 = vadd.f32 %v5594_v52, %v11097_v48  ;;  %v5619_v40 = vmul.f32 %v11097_v48, %v11097_v48  ;;  %v11983_v52 = vld [vmem:[#allocation88_spill] sm:$0xff] }
 0x3ad   :  { %v5596_v51 = vadd.f32 %v11087_v19, %v5595_v7  ;;  %v5634_v36 = vadd.f32 %v5633_v54, %v5619_v40 }
 0x3af   :  { %v5635_v61 = vadd.f32 %v5634_v36, %v5620_v56  ;;  %v11107_v31 = vpop.f32.mrb[44].mxu1  ;;  %v5597_v62 = vadd.f32 %v11095_v63, %v5596_v51 }
 0x3b0   :  { %v5556_v21 = vpop.f32.mrb[45].mxu1  ;;  %v5624_v15 = vmul.f32 %v11107_v31, %v11107_v31 }
 0x3b1   :  { %v5598_v33 = vadd.f32 %v5597_v62, %v5556_v21  ;;  %v5622_v23 = vmul.f32 %v5556_v21, %v5556_v21  ;;  %v5636_v55 = vadd.f32 %v5635_v61, %v5621_v34  ;;  %v11110_v60 = vpop.f32.mrb[46].mxu1 }
 0x3b2   :  { %v5559_v59 = vpop.f32.mrb[47].mxu1  ;;  %v5625_v14 = vmul.f32 %v11110_v60, %v11110_v60 }
 0x3b3   :  { %v5637_v39 = vadd.f32 %v5636_v55, %v5622_v23  ;;  %v5599_v11 = vadd.f32 %v5598_v33, %v5559_v59  ;;  %v5623_v18 = vmul.f32 %v5559_v59, %v5559_v59 }
 0x3b5   :  { %v5600_v9 = vadd.f32 %v11107_v31, %v5599_v11  ;;  %v5638_v38 = vadd.f32 %v5637_v39, %v5623_v18 }
 0x3b7   :  { %v5601_v44 = vadd.f32 %v11110_v60, %v5600_v9  ;;  %v5639_v6 = vadd.f32 %v5638_v38, %v5624_v15 }
 0x3b9   :  { %v5602_v2 = vrot.slane %v5601_v44, 4  ;;  %v5640_v20 = vadd.f32 %v5639_v6, %v5625_v14 }
 0x3bb   :  { %v5603_v50 = vadd.f32 %v5602_v2, %v5601_v44  ;;  %v5641_v42 = vrot.slane %v5640_v20, 4 }
 0x3bd   :  { %v5604_v37 = vrot.slane %v5603_v50, 2  ;;  %v5642_v24 = vadd.f32 %v5641_v42, %v5640_v20 }
 0x3bf   :  { %v5605_v0 = vadd.f32 %v5604_v37, %v5603_v50  ;;  %v5643_v57 = vrot.slane %v5642_v24, 2 }
 0x3c1   :  { %v5606_v29 = vrot.slane %v5605_v0, 1  ;;  %v5644_v27 = vadd.f32 %v5643_v57, %v5642_v24 }
 0x3c3   :  { %v5607_v58 = vadd.f32 %v5606_v29, %v5605_v0  ;;  %v5645_v49 = vrot.slane %v5644_v27, 1 }
 0x3c5   :  { %v5609_v43 = vmul.f32 0.0078125, %v5607_v58  ;;  %v5646_v5 = vadd.f32 %v5645_v49, %v5644_v27 }
 0x3c7   :  { %v5647_v13 = vmul.f32 0.0078125, %v5646_v5  ;;  %v5648_v35 = vmul.f32 %v5609_v43, %v5609_v43 }
 0x3c9   :  { %v5649_v3 = vsub.f32 %v5647_v13, %v5648_v35 }
 0x3cb   :  { %v5650_v45 = vmax.f32 %v5649_v3, 0.0 }
 0x3cd   :  { %v5652_v47 = vadd.f32 1e-05, %v5650_v45 }
 0x3cf   :  { %8137 = vrsqrt.f32 %v5652_v47 }
 0x3d9   :  { %v8138_v4 = vpop.eup %8137 }
 0x3da   :  { %v5654_v16 = vmul.f32 %v8138_v4, %v5651_v26 }
 0x3dc   :  { %v5656_v17 = vmul.f32 %v5654_v16, %v5609_v43  ;;  %v5662_v12 = vrot.slane %v5654_v16, %v11983_v52 }
 0x3de   :  { %v5657_v25 = vsub.f32 %v5655_v28, %v5656_v17  ;;  %v5677_v54 = vmul.f32 %v5662_v12, %v5559_v59  ;;  %v5664_v7 = vmul.f32 %v5662_v12, %v11050_v8  ;;  %v5665_v40 = vmul.f32 %v5662_v12, %v11054_v10  ;;  %v11140_v28 = vpop.f32.mrb[48].mxu1 }
 0x3df   :  { %v5666_v56 = vmul.f32 %v11048_v46, %v5662_v12  ;;  %v5667_v51 = vmul.f32 %v11052_v53, %v5662_v12  ;;  %v5668_v36 = vmul.f32 %v5662_v12, %v11070_v41  ;;  %v5669_v34 = vmul.f32 %v5662_v12, %v11077_v22  ;;  %v11142_v17 = vpop.f32.mrb[49].mxu1 }
 0x3e0   :  { %v5684_v61 = vrot.slane %v5657_v25, %v11983_v52  ;;  %v5670_v62 = vmul.f32 %v11067_v32, %v5662_v12  ;;  %v5671_v33 = vmul.f32 %v11075_v1, %v5662_v12  ;;  %v5672_v23 = vmul.f32 %v5662_v12, %v11090_v30  ;;  %v11146_v25 = vpop.f32.mrb[50].mxu1 }
 0x3e1   :  { %v5673_v8 = vmul.f32 %v5662_v12, %v11097_v48  ;;  %v5674_v10 = vmul.f32 %v11087_v19, %v5662_v12  ;;  %v5675_v46 = vmul.f32 %v11095_v63, %v5662_v12  ;;  %v5676_v55 = vmul.f32 %v5662_v12, %v5556_v21 }
 0x3e2   :  { %v5699_v53 = vadd.f32 %v5684_v61, %v5677_v54  ;;  %v5686_v59 = vadd.f32 %v5684_v61, %v5664_v7  ;;  %v5687_v41 = vadd.f32 %v5684_v61, %v5665_v40  ;;  %v5688_v39 = vadd.f32 %v5684_v61, %v5666_v56 }
 0x3e3   :  { %v5689_v22 = vadd.f32 %v5684_v61, %v5667_v51  ;;  %v5690_v11 = vadd.f32 %v5684_v61, %v5668_v36  ;;  %v5691_v18 = vadd.f32 %v5684_v61, %v5669_v34  ;;  %v5692_v15 = vadd.f32 %v5684_v61, %v5670_v62 }
 0x3e4   :  { %v5702_v32 = vmax.f32 %v5686_v59, 0.0  ;;  %v5703_v9 = vmax.f32 %v5687_v41, 0.0  ;;  %v5704_v1 = vmax.f32 %v5688_v39, 0.0  ;;  %v5693_v38 = vadd.f32 %v5684_v61, %v5671_v33 }
 0x3e5   :  { %v5705_v30 = vmax.f32 %v5689_v22, 0.0  ;;  %v5706_v14 = vmax.f32 %v5690_v11, 0.0  ;;  %v5707_v48 = vmax.f32 %v5691_v18, 0.0  ;;  %v5708_v44 = vmax.f32 %v5692_v15, 0.0 }
 0x3e6   :  { %v5718_v19 = vpack.c.bf16 %v5703_v9, %v5702_v32  ;;  %v5709_v6 = vmax.f32 %v5693_v38, 0.0  ;;  %v5694_v63 = vadd.f32 %v5684_v61, %v5672_v23  ;;  %v5695_v21 = vadd.f32 %v5684_v61, %v5673_v8 }
 0x3e7   :  { %v5719_v2 = vpack.c.bf16 %v5705_v30, %v5704_v1  ;;  %v5720_v20 = vpack.c.bf16 %v5707_v48, %v5706_v14  ;;  %v5696_v50 = vadd.f32 %v5684_v61, %v5674_v10  ;;  %v5697_v42 = vadd.f32 %v5684_v61, %v5675_v46 }
 0x3e8   :  { %7781 = vmatprep.mubr.bf16.mxu0 %v5718_v19  ;;  %v5721_v37 = vpack.c.bf16 %v5709_v6, %v5708_v44  ;;  %v5710_v24 = vmax.f32 %v5694_v63, 0.0  ;;  %v5711_v0 = vmax.f32 %v5695_v21, 0.0  ;;  %v5698_v57 = vadd.f32 %v5684_v61, %v5676_v55 }
 0x3e9   :  { %7782 = vmatmul.mubr.bf16.vlgmr.msra.gmra.mrb[176].mxu0 %v5719_v2  ;;  %v5712_v29 = vmax.f32 %v5696_v50, 0.0  ;;  %v5713_v27 = vmax.f32 %v5697_v42, 0.0  ;;  %v5715_v58 = vmax.f32 %v5699_v53, 0.0  ;;  %v5678_v49 = vmul.f32 %v11107_v31, %v5662_v12 }
 0x3ea   :  { %7785 = vmatprep.mubr.bf16.mxu0 %v5720_v20  ;;  %v5722_v43 = vpack.c.bf16 %v5711_v0, %v5710_v24  ;;  %v5714_v5 = vmax.f32 %v5698_v57, 0.0  ;;  %v5679_v13 = vmul.f32 %v11110_v60, %v5662_v12  ;;  %v6128_v31 = vmul.f32 %v11142_v17, %v11142_v17  ;;  %v11148_v60 = vpop.f32.mrb[51].mxu1 }
 0x3eb   :  { %v5723_v35 = vpack.c.bf16 %v5713_v27, %v5712_v29  ;;  %v5700_v3 = vadd.f32 %v5684_v61, %v5678_v49  ;;  %v6130_v12 = vmul.f32 %v11140_v28, %v11140_v28  ;;  %v6106_v54 = vadd.f32 %v11148_v60, %v11142_v17  ;;  %v11159_v34 = vpop.f32.mrb[52].mxu1 }
 0x3ec   :  { %v5724_v45 = vpack.c.bf16 %v5715_v58, %v5714_v5  ;;  %v5701_v47 = vadd.f32 %v5684_v61, %v5679_v13  ;;  %v6129_v7 = vmul.f32 %v11148_v60, %v11148_v60  ;;  %v6131_v40 = vmul.f32 %v11146_v25, %v11146_v25  ;;  %v11162_v62 = vpop.f32.mrb[53].mxu1 }
 0x3ed   :  { %v5716_v26 = vmax.f32 %v5700_v3, 0.0  ;;  %v6107_v56 = vadd.f32 %v11140_v28, %v6106_v54  ;;  %v6132_v23 = vmul.f32 %v11162_v62, %v11162_v62  ;;  %v11167_v10 = vpop.f32.mrb[54].mxu1  ;;  %v6134_v55 = vmul.f32 %v11159_v34, %v11159_v34 }
 0x3ee   :  { %v5717_v4 = vmax.f32 %v5701_v47, 0.0  ;;  %v6144_v51 = vadd.f32 %v6129_v7, %v6128_v31  ;;  %v11169_v46 = vpop.f32.mrb[55].mxu1  ;;  %v6135_v39 = vmul.f32 %v11167_v10, %v11167_v10 }
 0x3ef   :  { %v6108_v61 = vadd.f32 %v11146_v25, %v6107_v56  ;;  %v6133_v41 = vmul.f32 %v11169_v46, %v11169_v46  ;;  %v11179_v15 = vpop.f32.mrb[56].mxu1 }
 0x3f0   :  { %v5725_v16 = vpack.c.bf16 %v5717_v4, %v5716_v26  ;;  %v6145_v36 = vadd.f32 %v6144_v51, %v6130_v12  ;;  %v11182_v9 = vpop.f32.mrb[57].mxu1  ;;  %v6138_v44 = vmul.f32 %v11179_v15, %v11179_v15 }
 0x3f1   :  { %7786 = vmatmul.mubr.bf16.gmra.mrb[180].mxu0 %v5721_v37  ;;  %v6109_v33 = vadd.f32 %v6108_v61, %v11162_v62  ;;  %v6136_v38 = vmul.f32 %v11182_v9, %v11182_v9  ;;  %v11187_v14 = vpop.f32.mrb[58].mxu1 }
 0x3f2   :  { %7789 = vmatprep.mubr.bf16.mxu0 %v5722_v43  ;;  %v6146_v8 = vadd.f32 %v6145_v36, %v6131_v40  ;;  %v11189_v48 = vpop.f32.mrb[59].mxu1  ;;  %v6139_v21 = vmul.f32 %v11187_v14, %v11187_v14 }
 0x3f3   :  { %v6110_v59 = vadd.f32 %v6109_v33, %v11169_v46  ;;  %v6137_v63 = vmul.f32 %v11189_v48, %v11189_v48  ;;  %v11199_v42 = vpop.f32.mrb[60].mxu1 }
 0x3f4   :  { %v6147_v53 = vadd.f32 %v6146_v8, %v6132_v23  ;;  %v11202_v24 = vpop.f32.mrb[61].mxu1  ;;  %v6142_v49 = vmul.f32 %v11199_v42, %v11199_v42 }
 0x3f5   :  { %v6111_v22 = vadd.f32 %v11159_v34, %v6110_v59  ;;  %v6140_v57 = vmul.f32 %v11202_v24, %v11202_v24  ;;  %v11207_v27 = vpop.f32.mrb[62].mxu1 }
 0x3f6   :  { %v6148_v11 = vadd.f32 %v6147_v53, %v6133_v41  ;;  %v6094_v58 = vpop.f32.mrb[63].mxu1 }
 0x3f7   :  { %v6112_v32 = vadd.f32 %v11167_v10, %v6111_v22  ;;  %v6141_v13 = vmul.f32 %v6094_v58, %v6094_v58  ;;  %v6169_v22 = vld [vmem:[%s11391_s13] sm:$0x1] }
 0x3f8   :  { %v6149_v18 = vadd.f32 %v6148_v11, %v6134_v55 }
 0x3f9   :  { %7790 = vmatmul.mubr.bf16.gmra.mrb[184].mxu0 %v5723_v35  ;;  %v6113_v1 = vadd.f32 %v6112_v32, %v11182_v9  ;;  %v6143_v35 = vmul.f32 %v11207_v27, %v11207_v27  ;;  %v6173_v32 = vld [vmem:[%s11392_s14] sm:$0x1] }
 0x3fa   :  { %7793 = vmatprep.mubr.bf16.mxu0 %v5724_v45  ;;  %v6150_v30 = vadd.f32 %v6149_v18, %v6135_v39 }
 0x3fb   :  { %v6114_v6 = vadd.f32 %v6113_v1, %v11189_v48 }
 0x3fc   :  { %v6151_v19 = vadd.f32 %v6150_v30, %v6136_v38 }
 0x3fd   :  { %v6115_v2 = vadd.f32 %v11179_v15, %v6114_v6 }
 0x3fe   :  { %v6152_v20 = vadd.f32 %v6151_v19, %v6137_v63 }
 0x3ff   :  { %v6116_v37 = vadd.f32 %v11187_v14, %v6115_v2 }
 0x400   :  { %v6153_v50 = vadd.f32 %v6152_v20, %v6138_v44 }
 0x401   :  { %7794 = vmatmul.mubr.bf16.gmra.mrb[188].mxu0 %v5725_v16  ;;  %v6117_v0 = vadd.f32 %v6116_v37, %v11202_v24 }
 0x402   :  { %v6154_v29 = vadd.f32 %v6153_v50, %v6139_v21 }
 0x403   :  { %v6118_v5 = vadd.f32 %v6117_v0, %v6094_v58 }
 0x404   :  { %v6155_v43 = vadd.f32 %v6154_v29, %v6140_v57 }
 0x405   :  { %v6119_v3 = vadd.f32 %v11199_v42, %v6118_v5 }
 0x406   :  { %v6156_v45 = vadd.f32 %v6155_v43, %v6141_v13 }
 0x407   :  { %v6120_v47 = vadd.f32 %v11207_v27, %v6119_v3 }
 0x408   :  { %v6157_v26 = vadd.f32 %v6156_v45, %v6142_v49 }
 0x409   :  { %v6121_v4 = vrot.slane %v6120_v47, 4 }
 0x40a   :  { %v6158_v16 = vadd.f32 %v6157_v26, %v6143_v35 }
 0x40b   :  { %v6122_v31 = vadd.f32 %v6121_v4, %v6120_v47 }
 0x40c   :  { %v6159_v12 = vrot.slane %v6158_v16, 4 }
 0x40d   :  { %v6123_v54 = vrot.slane %v6122_v31, 2 }
 0x40e   :  { %v6160_v7 = vadd.f32 %v6159_v12, %v6158_v16 }
 0x40f   :  { %v6124_v40 = vadd.f32 %v6123_v54, %v6122_v31 }
 0x410   :  { %v6161_v56 = vrot.slane %v6160_v7, 2 }
 0x411   :  { %v6125_v51 = vrot.slane %v6124_v40, 1 }
 0x412   :  { %v6162_v36 = vadd.f32 %v6161_v56, %v6160_v7 }
 0x413   :  { %v6126_v61 = vadd.f32 %v6125_v51, %v6124_v40 }
 0x414   :  { %v6163_v33 = vrot.slane %v6162_v36, 1 }
 0x415   :  { %v6127_v23 = vmul.f32 0.0078125, %v6126_v61 }
 0x416   :  { %v6164_v8 = vadd.f32 %v6163_v33, %v6162_v36 }
 0x417   :  { %v6166_v53 = vmul.f32 %v6127_v23, %v6127_v23 }
 0x418   :  { %v6165_v55 = vmul.f32 0.0078125, %v6164_v8 }
 0x41a   :  { %v6167_v59 = vsub.f32 %v6165_v55, %v6166_v53 }
 0x41c   :  { %v6168_v41 = vmax.f32 %v6167_v59, 0.0 }
 0x41e   :  { %v6170_v39 = vadd.f32 1e-05, %v6168_v41 }
 0x420   :  { %8139 = vrsqrt.f32 %v6170_v39 }
 0x42a   :  { %v8140_v11 = vpop.eup %8139 }
 0x42b   :  { %v6172_v18 = vmul.f32 %v8140_v11, %v6169_v22 }
 0x42d   :  { %v6174_v1 = vmul.f32 %v6172_v18, %v6127_v23  ;;  %v6180_v38 = vrot.slane %v6172_v18, %v11983_v52 }
 0x42f   :  { %v6175_v30 = vsub.f32 %v6173_v32, %v6174_v1  ;;  %v6195_v44 = vmul.f32 %v6180_v38, %v6094_v58  ;;  %v6182_v63 = vmul.f32 %v6180_v38, %v11142_v17  ;;  %v6183_v21 = vmul.f32 %v6180_v38, %v11148_v60 }
 0x430   :  { %v6184_v2 = vmul.f32 %v11140_v28, %v6180_v38  ;;  %v6185_v20 = vmul.f32 %v11146_v25, %v6180_v38  ;;  %v6186_v29 = vmul.f32 %v6180_v38, %v11162_v62  ;;  %v6187_v58 = vmul.f32 %v6180_v38, %v11169_v46 }
 0x431   :  { %v6202_v19 = vrot.slane %v6175_v30, %v11983_v52  ;;  %v6188_v17 = vmul.f32 %v11159_v34, %v6180_v38  ;;  %v6189_v60 = vmul.f32 %v11167_v10, %v6180_v38  ;;  %v6190_v5 = vmul.f32 %v6180_v38, %v11182_v9 }
 0x432   :  { %v6191_v13 = vmul.f32 %v6180_v38, %v11189_v48  ;;  %v6192_v62 = vmul.f32 %v11179_v15, %v6180_v38  ;;  %v6193_v46 = vmul.f32 %v11187_v14, %v6180_v38  ;;  %v6194_v45 = vmul.f32 %v6180_v38, %v11202_v24 }
 0x433   :  { %v11223_v6 = vadd.f32 %v6202_v19, %v6195_v44  ;;  %v11229_v50 = vadd.f32 %v6202_v19, %v6182_v63  ;;  %v11231_v37 = vadd.f32 %v6202_v19, %v6183_v21  ;;  %v11233_v0 = vadd.f32 %v6202_v19, %v6184_v2 }
 0x434   :  { %v11235_v57 = vadd.f32 %v6202_v19, %v6185_v20  ;;  %v11241_v49 = vadd.f32 %v6202_v19, %v6186_v29  ;;  %v11243_v28 = vadd.f32 %v6202_v19, %v6187_v58  ;;  %v11245_v25 = vadd.f32 %v6202_v19, %v6188_v17 }
 0x435   :  { %v11247_v43 = vadd.f32 %v6202_v19, %v6189_v60  ;;  %v11253_v35 = vadd.f32 %v6202_v19, %v6190_v5  ;;  %v11255_v34 = vadd.f32 %v6202_v19, %v6191_v13  ;;  %v11257_v10 = vadd.f32 %v6202_v19, %v6192_v62 }
 0x436   :  { %v11259_v3 = vadd.f32 %v6202_v19, %v6193_v46  ;;  %v6196_v47 = vmul.f32 %v11199_v42, %v6180_v38  ;;  %v6197_v9 = vmul.f32 %v11207_v27, %v6180_v38  ;;  %v11264_v26 = vadd.f32 %v6202_v19, %v6194_v45 }
 0x438   :  { %v11266_v48 = vadd.f32 %v6202_v19, %v6196_v47  ;;  %v11268_v15 = vadd.f32 %v6202_v19, %v6197_v9 }
 0x4bc   :  { %v11270_v14 = vpop.f32.mrb[176].mxu0 }
 0x4bd   :  { %v11272_v4 = vpop.f32.mrb[177].mxu0  ;;  %v5911_v12 = vmul.f32 %v11270_v14, %v11270_v14 }
 0x4be   :  { %v11274_v16 = vpop.f32.mrb[178].mxu0  ;;  %v5909_v24 = vmul.f32 %v11272_v4, %v11272_v4 }
 0x4bf   :  { %v11276_v31 = vpop.f32.mrb[179].mxu0  ;;  %v5912_v40 = vmul.f32 %v11274_v16, %v11274_v16 }
 0x4c0   :  { %v5887_v42 = vadd.f32 %v11276_v31, %v11272_v4  ;;  %v5910_v27 = vmul.f32 %v11276_v31, %v11276_v31 }
 0x4c2   :  { %v5888_v54 = vadd.f32 %v11270_v14, %v5887_v42  ;;  %v5925_v7 = vadd.f32 %v5910_v27, %v5909_v24 }
 0x4c4   :  { %v5926_v56 = vadd.f32 %v5925_v7, %v5911_v12  ;;  %v11289_v51 = vpop.f32.mrb[180].mxu0  ;;  %v5889_v36 = vadd.f32 %v11274_v16, %v5888_v54 }
 0x4c5   :  { %v11292_v61 = vpop.f32.mrb[181].mxu0  ;;  %v5915_v22 = vmul.f32 %v11289_v51, %v11289_v51 }
 0x4c6   :  { %v5890_v33 = vadd.f32 %v5889_v36, %v11292_v61  ;;  %v5913_v23 = vmul.f32 %v11292_v61, %v11292_v61  ;;  %v5927_v8 = vadd.f32 %v5926_v56, %v5912_v40  ;;  %v11297_v55 = vpop.f32.mrb[182].mxu0 }
 0x4c7   :  { %v11299_v53 = vpop.f32.mrb[183].mxu0  ;;  %v5916_v32 = vmul.f32 %v11297_v55, %v11297_v55 }
 0x4c8   :  { %v5928_v59 = vadd.f32 %v5927_v8, %v5913_v23  ;;  %v5891_v41 = vadd.f32 %v5890_v33, %v11299_v53  ;;  %v5914_v39 = vmul.f32 %v11299_v53, %v11299_v53 }
 0x4ca   :  { %v5892_v11 = vadd.f32 %v11289_v51, %v5891_v41  ;;  %v5929_v18 = vadd.f32 %v5928_v59, %v5914_v39 }
 0x4cc   :  { %v5930_v1 = vadd.f32 %v5929_v18, %v5915_v22  ;;  %v11309_v38 = vpop.f32.mrb[184].mxu0  ;;  %v5893_v30 = vadd.f32 %v11297_v55, %v5892_v11 }
 0x4cd   :  { %v11312_v44 = vpop.f32.mrb[185].mxu0  ;;  %v5919_v60 = vmul.f32 %v11309_v38, %v11309_v38 }
 0x4ce   :  { %v5894_v19 = vadd.f32 %v5893_v30, %v11312_v44  ;;  %v5917_v63 = vmul.f32 %v11312_v44, %v11312_v44  ;;  %v5931_v21 = vadd.f32 %v5930_v1, %v5916_v32  ;;  %v11317_v2 = vpop.f32.mrb[186].mxu0 }
 0x4cf   :  { %v11319_v20 = vpop.f32.mrb[187].mxu0  ;;  %v5920_v62 = vmul.f32 %v11317_v2, %v11317_v2 }
 0x4d0   :  { %v5932_v29 = vadd.f32 %v5931_v21, %v5917_v63  ;;  %v5895_v58 = vadd.f32 %v5894_v19, %v11319_v20  ;;  %v5918_v17 = vmul.f32 %v11319_v20, %v11319_v20 }
 0x4d2   :  { %v5896_v5 = vadd.f32 %v11309_v38, %v5895_v58  ;;  %v5933_v13 = vadd.f32 %v5932_v29, %v5918_v17 }
 0x4d4   :  { %v5934_v46 = vadd.f32 %v5933_v13, %v5919_v60  ;;  %v7795_v45 = vpop.f32.mrb[188].mxu0  ;;  %v5897_v47 = vadd.f32 %v11317_v2, %v5896_v5 }
 0x4d5   :  { %v5872_v9 = vpop.f32.mrb[189].mxu0  ;;  %v5923_v36 = vmul.f32 %v7795_v45, %v7795_v45 }
 0x4d6   :  { %v5898_v24 = vadd.f32 %v5897_v47, %v5872_v9  ;;  %v5921_v42 = vmul.f32 %v5872_v9, %v5872_v9  ;;  %v5935_v27 = vadd.f32 %v5934_v46, %v5920_v62  ;;  %v7796_v12 = vpop.f32.mrb[190].mxu0 }
 0x4d7   :  { %v5875_v54 = vpop.f32.mrb[191].mxu0  ;;  %v5924_v8 = vmul.f32 %v7796_v12, %v7796_v12 }
 0x4d8   :  { %v5936_v7 = vadd.f32 %v5935_v27, %v5921_v42  ;;  %v5899_v40 = vadd.f32 %v5898_v24, %v5875_v54  ;;  %v5922_v56 = vmul.f32 %v5875_v54, %v5875_v54  ;;  %v5950_v24 = vld [vmem:[%s11389_s11] sm:$0x1]  ;;  %s8178_s11 = smov [#allocation2]  }
 0x4da   :  { %v5900_v33 = vadd.f32 %v7795_v45, %v5899_v40  ;;  %v5937_v23 = vadd.f32 %v5936_v7, %v5922_v56  ;;  %v5954_v7 = vld [vmem:[%s11390_s12] sm:$0x1]  ;;  %s6273_s12 = sshll.u32 %s8178_s11, 4  ;;  %s6274_s12 = int_to_ptr.vmem [resolvable:$true] %s6273_s12 }
 0x4db   :  { %s8153_s23 = scalar_lea.vmem %s6274_s12, 2048  ;;  %p8158_p1 = scmp.lt.s32.totalorder %s6274_s12, %s6274_s12 }
 0x4dc   :  { %v5901_v59 = vadd.f32 %v7796_v12, %v5900_v33  ;;  %v5938_v41 = vadd.f32 %v5937_v23, %v5923_v36  ;;  %p8154_p0 = scmp.ne.s32.totalorder %s6274_s12, %s8153_s23  ;;  %p8159_p2 = scmp.lt.s32.totalorder %s8153_s23, %s8153_s23 }
 0x4de   :  { %v5902_v39 = vrot.slane %v5901_v59, 4  ;;  %v5939_v22 = vadd.f32 %v5938_v41, %v5924_v8  ;;  %p8160_p3 = por %p8159_p2, %p8158_p1 }
 0x4e0   :  { %v5903_v11 = vadd.f32 %v5902_v39, %v5901_v59  ;;  %v5940_v18 = vrot.slane %v5939_v22, 4  ;;  %p8161_p4 = pnand %p8160_p3, %p8154_p0 }
 0x4e2   :  { %v5904_v32 = vrot.slane %v5903_v11, 2  ;;  %v5941_v1 = vadd.f32 %v5940_v18, %v5939_v22 }
 0x4e4   :  { %v5905_v30 = vadd.f32 %v5904_v32, %v5903_v11  ;;  %v5942_v19 = vrot.slane %v5941_v1, 2 }
 0x4e6   :  { %v5906_v63 = vrot.slane %v5905_v30, 1  ;;  %v5943_v21 = vadd.f32 %v5942_v19, %v5941_v1 }
 0x4e8   :  { %v5907_v29 = vadd.f32 %v5906_v63, %v5905_v30  ;;  %v5944_v58 = vrot.slane %v5943_v21, 1 }
 0x4ea   :  { %v5908_v17 = vmul.f32 0.0078125, %v5907_v29  ;;  %v5945_v60 = vadd.f32 %v5944_v58, %v5943_v21 }
 0x4ec   :  { %v5946_v5 = vmul.f32 0.0078125, %v5945_v60  ;;  %v5947_v13 = vmul.f32 %v5908_v17, %v5908_v17 }
 0x4ee   :  { %v5948_v62 = vsub.f32 %v5946_v5, %v5947_v13 }
 0x4f0   :  { %v5949_v46 = vmax.f32 %v5948_v62, 0.0 }
 0x4f2   :  { %v5951_v47 = vadd.f32 1e-05, %v5949_v46 }
 0x4f4   :  { %8141 = vrsqrt.f32 %v5951_v47 }
 0x4fe   :  { %v8142_v42 = vpop.eup %8141 }
 0x4ff   :  { %v5953_v27 = vmul.f32 %v8142_v42, %v5950_v24 }
 0x501   :  { %v5955_v40 = vmul.f32 %v5953_v27, %v5908_v17  ;;  %v5961_v56 = vrot.slane %v5953_v27, %v11983_v52 }
 0x503   :  { %v5956_v36 = vsub.f32 %v5954_v7, %v5955_v40  ;;  %v5976_v33 = vmul.f32 %v5961_v56, %v5875_v54  ;;  %v5963_v23 = vmul.f32 %v5961_v56, %v11272_v4  ;;  %v5964_v8 = vmul.f32 %v5961_v56, %v11276_v31 }
 0x504   :  { %v5965_v59 = vmul.f32 %v11270_v14, %v5961_v56  ;;  %v5966_v41 = vmul.f32 %v11274_v16, %v5961_v56  ;;  %v5967_v39 = vmul.f32 %v5961_v56, %v11292_v61  ;;  %v5968_v22 = vmul.f32 %v5961_v56, %v11299_v53 }
 0x505   :  { %v5983_v11 = vrot.slane %v5956_v36, %v11983_v52  ;;  %v5969_v18 = vmul.f32 %v11289_v51, %v5961_v56  ;;  %v5970_v32 = vmul.f32 %v11297_v55, %v5961_v56  ;;  %v5971_v54 = vmul.f32 %v5961_v56, %v11312_v44 }
 0x506   :  { %v5972_v4 = vmul.f32 %v5961_v56, %v11319_v20  ;;  %v5973_v31 = vmul.f32 %v11309_v38, %v5961_v56  ;;  %v5974_v14 = vmul.f32 %v11317_v2, %v5961_v56  ;;  %v5975_v1 = vmul.f32 %v5961_v56, %v5872_v9 }
 0x507   :  { %v5998_v16 = vadd.f32 %v5983_v11, %v5976_v33  ;;  %v5977_v30 = vmul.f32 %v7795_v45, %v5961_v56  ;;  %v5978_v61 = vmul.f32 %v7796_v12, %v5961_v56  ;;  %v5985_v19 = vadd.f32 %v5983_v11, %v5963_v23 }
 0x508   :  { %v5986_v53 = vadd.f32 %v5983_v11, %v5964_v8  ;;  %v5987_v63 = vadd.f32 %v5983_v11, %v5965_v59  ;;  %v5988_v52 = vadd.f32 %v5983_v11, %v5966_v41  ;;  %v5989_v21 = vadd.f32 %v5983_v11, %v5967_v39 }
 0x509   :  { %v6233_v51 = vadd.f32 %v11223_v6, %v5998_v16  ;;  %v5990_v55 = vadd.f32 %v5983_v11, %v5968_v22  ;;  %v5991_v29 = vadd.f32 %v5983_v11, %v5969_v18  ;;  %v5992_v44 = vadd.f32 %v5983_v11, %v5970_v32 }
 0x50a   :  { %v5993_v58 = vadd.f32 %v5983_v11, %v5971_v54  ;;  %v5994_v20 = vadd.f32 %v5983_v11, %v5972_v4  ;;  %v5995_v17 = vadd.f32 %v5983_v11, %v5973_v31  ;;  %v5996_v38 = vadd.f32 %v5983_v11, %v5974_v14 }
 0x50b   :  { %v6249_v60 = vmax.f32 %v6233_v51, 0.0  ;;  %v5997_v2 = vadd.f32 %v5983_v11, %v5975_v1  ;;  %v5999_v9 = vadd.f32 %v5983_v11, %v5977_v30  ;;  %v6000_v5 = vadd.f32 %v5983_v11, %v5978_v61 }
 0x50c   :  { %v6220_v45 = vadd.f32 %v11229_v50, %v5985_v19  ;;  %v6221_v12 = vadd.f32 %v11231_v37, %v5986_v53  ;;  %v6222_v13 = vadd.f32 %v11233_v0, %v5987_v63  ;;  %v6223_v62 = vadd.f32 %v11235_v57, %v5988_v52 }
 0x50d   :  { %6265 = vst [vmem:[#allocation2 + $0x68] sm:$0xff] %v6249_v60  ;;  %v6224_v6 = vadd.f32 %v11241_v49, %v5989_v21  ;;  %v6225_v46 = vadd.f32 %v11243_v28, %v5990_v55  ;;  %v6226_v47 = vadd.f32 %v11245_v25, %v5991_v29  ;;  %v6227_v24 = vadd.f32 %v11247_v43, %v5992_v44 }
 0x50e   :  { %v6228_v42 = vadd.f32 %v11253_v35, %v5993_v58  ;;  %v6229_v27 = vadd.f32 %v11255_v34, %v5994_v20  ;;  %v6230_v50 = vadd.f32 %v11257_v10, %v5995_v17  ;;  %v6231_v37 = vadd.f32 %v11259_v3, %v5996_v38 }
 0x50f   :  { %v6232_v0 = vadd.f32 %v11264_v26, %v5997_v2  ;;  %v6234_v57 = vadd.f32 %v11266_v48, %v5999_v9  ;;  %v6235_v49 = vadd.f32 %v11268_v15, %v6000_v5  ;;  %v6236_v7 = vmax.f32 %v6220_v45, 0.0 }
 0x510   :  { %v6237_v28 = vmax.f32 %v6221_v12, 0.0  ;;  %v6238_v40 = vmax.f32 %v6222_v13, 0.0  ;;  %v6239_v25 = vmax.f32 %v6223_v62, 0.0  ;;  %v6240_v56 = vmax.f32 %v6224_v6, 0.0 }
 0x511   :  { %v6241_v43 = vmax.f32 %v6225_v46, 0.0  ;;  %v6242_v35 = vmax.f32 %v6226_v47, 0.0  ;;  %v6243_v34 = vmax.f32 %v6227_v24, 0.0  ;;  %v6244_v36 = vmax.f32 %v6228_v42, 0.0  ;;  %6252 = vst [vmem:[#allocation2] sm:$0xff] %v6236_v7 }
 0x512   :  { %v6245_v10 = vmax.f32 %v6229_v27, 0.0  ;;  %v6246_v3 = vmax.f32 %v6230_v50, 0.0  ;;  %v6247_v33 = vmax.f32 %v6231_v37, 0.0  ;;  %v6248_v26 = vmax.f32 %v6232_v0, 0.0  ;;  %6253 = vst [vmem:[#allocation2 + $0x8] sm:$0xff] %v6237_v28  ;;  %6254 = vst [vmem:[#allocation2 + $0x10] sm:$0xff] %v6238_v40 }
 0x513   :  { %6255 = vst [vmem:[#allocation2 + $0x18] sm:$0xff] %v6239_v25  ;;  %6256 = vst [vmem:[#allocation2 + $0x20] sm:$0xff] %v6240_v56  ;;  %v6250_v48 = vmax.f32 %v6234_v57, 0.0  ;;  %v6251_v15 = vmax.f32 %v6235_v49, 0.0 }
 0x514   :  { %6257 = vst [vmem:[#allocation2 + $0x28] sm:$0xff] %v6241_v43  ;;  %6258 = vst [vmem:[#allocation2 + $0x30] sm:$0xff] %v6242_v35 }
 0x515   :  { %6259 = vst [vmem:[#allocation2 + $0x38] sm:$0xff] %v6243_v34  ;;  %6260 = vst [vmem:[#allocation2 + $0x40] sm:$0xff] %v6244_v36 }
 0x516   :  { %6261 = vst [vmem:[#allocation2 + $0x48] sm:$0xff] %v6245_v10  ;;  %6262 = vst [vmem:[#allocation2 + $0x50] sm:$0xff] %v6246_v3 }
 0x517   :  { %6263 = vst [vmem:[#allocation2 + $0x58] sm:$0xff] %v6247_v33  ;;  %6264 = vst [vmem:[#allocation2 + $0x60] sm:$0xff] %v6248_v26 }
 0x518   :  { %6266 = vst [vmem:[#allocation2 + $0x70] sm:$0xff] %v6250_v48  ;;  %6267 = vst [vmem:[#allocation2 + $0x78] sm:$0xff] %v6251_v15 }
 0x519   :  { %8164 = shalt.err (!%p8161_p4)
}
 0x51a   :  { %s8165_s25 = scalar_lea.hbm %s11393_s15, 2048 }
 0x51b   :  { %p8166_p5 = scmp.ne.s32.totalorder %s11393_s15, %s8165_s25  ;;  %p8169_p6 = scmp.lt.u32.totalorder %s8165_s25, %s11393_s15 }
 0x51d   :  { %p8171_p7 = pnand %p8169_p6, %p8166_p5 }
 0x51f   :  { %8174 = shalt.err (!%p8171_p7)
}
 0x520   :  { %s8179_s28 = smov 128   ;;  %s8180_s29 = smov 8  }
 0x521   :  { %6279 = dma.vmem_to_hbm [thread:$0]  %s6274_s12, 2048, %s11393_s15, [#allocation3], %s8179_s28, %s8179_s28, %s8180_s29  }
 0x522   :  { %8175 = dma.done.wait [#allocation3], 2048  }
 0x523   :  { %8176 = vsyncadd [#allocation3], 4294965248 }
 0x524   :  { %6283 = vsyncpa [#allocation3], 1 }

</bundles_post_ra>
